<compile_context>
chip_gen: v7x
topology: tpu7x:2x2x1
jax: 0.10.0
libtpu: 0.0.40
codegen_flags: <defaults>
</compile_context>

<pallas_src>
import jax
import jax.numpy as jnp
from jax.experimental import pallas as pl
from jax.experimental.pallas import tpu as pltpu


# ----------------------- Conv sentence encoder kernel -----------------------

def _conv_enc_kernel(p3_ref, p4_ref, p5_ref, w3_ref, w4_ref, w5_ref,
                     b3_ref, b4_ref, b5_ref, out_ref):
    chunks = []
    for p_ref, w_ref, b_ref in ((p3_ref, w3_ref, b3_ref),
                                (p4_ref, w4_ref, b4_ref),
                                (p5_ref, w5_ref, b5_ref)):
        p = p_ref[...].astype(jnp.bfloat16)              # [Sb, l_out, k*E]
        w = w_ref[...].astype(jnp.bfloat16)              # [k*E, C]
        acc = jax.lax.dot_general(
            p, w, (((2,), (0,)), ((), ())),
            preferred_element_type=jnp.float32)          # [Sb, l_out, C]
        acc = jnp.maximum(acc + b_ref[...][None], 0.0)   # bias + ReLU
        chunks.append(jnp.max(acc, axis=1))              # max over time -> [Sb, C]
    out_ref[...] = jnp.concatenate(chunks, axis=-1)      # [Sb, 3C]


def conv_sent_encode_batched(word_ids, params, s_blk=8):
    """word_ids: [S_total, L] int32 (all articles stacked). Returns [S_total, 3C]."""
    S_total, L = word_ids.shape
    n_blk = pl.cdiv(S_total, s_blk)
    S_pad = n_blk * s_blk
    if S_pad != S_total:
        word_ids = jnp.concatenate(
            [word_ids, jnp.zeros((S_pad - S_total, L), word_ids.dtype)], axis=0)

    emb = jnp.take(params["emb"], word_ids, axis=0).astype(jnp.float32)  # [Sp,L,E]
    E = emb.shape[-1]
    C = params["conv_b3"].shape[-1]

    args, in_specs = [], []
    for k in (3, 4, 5):                                  # im2col patches
        l_out = L - k + 1
        patches = jnp.concatenate(
            [emb[:, j:j + l_out, :] for j in range(k)], axis=2)          # [Sp,l_out,kE]
        args.append(patches)
        in_specs.append(pl.BlockSpec((s_blk, l_out, k * E), lambda i: (i, 0, 0)))
    for k in (3, 4, 5):
        args.append(params[f"conv_w{k}"])
        in_specs.append(pl.BlockSpec((k * E, C), lambda i: (0, 0)))
    for k in (3, 4, 5):
        args.append(params[f"conv_b{k}"])
        in_specs.append(pl.BlockSpec((1, C), lambda i: (0, 0)))

    out = pl.pallas_call(
        _conv_enc_kernel,
        out_shape=jax.ShapeDtypeStruct((S_pad, 3 * C), jnp.float32),
        grid=(n_blk,),
        in_specs=in_specs,
        out_specs=pl.BlockSpec((s_blk, 3 * C), lambda i: (i, 0)),
        compiler_params=pltpu.CompilerParams(
            dimension_semantics=("parallel",)),
    )(*args)
    return out[:S_total]


# -------------------------- generic matmul+bias kernel -----------------------

def _matmul_bias_kernel(x_ref, w_ref, b_ref, o_ref):
    x = x_ref[...].astype(jnp.bfloat16)
    w = w_ref[...].astype(jnp.bfloat16)
    o_ref[...] = (jnp.dot(x, w, preferred_element_type=jnp.float32)
                  + b_ref[...])


def matmul_bias(x, w, b):
    """x:[M,K] @ w:[K,N] + b:[1,N] -> [M,N] f32 (bf16 MXU operands)."""
    M, K = x.shape
    N = w.shape[1]
    return pl.pallas_call(
        _matmul_bias_kernel,
        out_shape=jax.ShapeDtypeStruct((M, N), jnp.float32),
        grid=(1,),
        in_specs=[pl.BlockSpec((M, K), lambda i: (0, 0)),
                  pl.BlockSpec((K, N), lambda i: (0, 0)),
                  pl.BlockSpec((1, N), lambda i: (0, 0))],
        out_specs=pl.BlockSpec((M, N), lambda i: (0, 0)),
        compiler_params=pltpu.CompilerParams(
            dimension_semantics=("arbitrary",)),
    )(x, w, b)


# -------------------- LSTM recurrence kernel (single call) -------------------

def _lstm_rec_kernel(gx_ref, whh_ref, h0_ref, c0_ref, y_ref):
    T = gx_ref.shape[0]
    H = h0_ref.shape[-1]
    whh = whh_ref[...].astype(jnp.bfloat16)              # resident in vregs/VMEM

    def body(t, carry):
        h, c = carry
        gates = gx_ref[t] + jnp.dot(h.astype(jnp.bfloat16), whh,
                                    preferred_element_type=jnp.float32)  # [B,4H]
        sg = jax.nn.sigmoid(gates)                       # full 128-lane vreg
        i = sg[:, 0:H]
        f = sg[:, H:2 * H]
        o = sg[:, 3 * H:4 * H]
        g = jnp.tanh(gates[:, 2 * H:3 * H])
        c = f * c + i * g
        h = o * jnp.tanh(c)
        y_ref[t] = h
        return (h, c)

    jax.lax.fori_loop(0, T, body, (h0_ref[...], c0_ref[...]), unroll=True)


def lstm_rec_scan(gx, w_hh, h0, c0):
    """gx: [T,B,4H] precomputed x@W_ih+b; returns hidden states [T,B,H]."""
    T, B, G = gx.shape
    H = h0.shape[-1]
    return pl.pallas_call(
        _lstm_rec_kernel,
        out_shape=jax.ShapeDtypeStruct((T, B, H), jnp.float32),
        grid=(1,),
        in_specs=[pl.BlockSpec((T, B, G), lambda i: (0, 0, 0)),
                  pl.BlockSpec((H, G), lambda i: (0, 0)),
                  pl.BlockSpec((B, H), lambda i: (0, 0)),
                  pl.BlockSpec((B, H), lambda i: (0, 0))],
        out_specs=pl.BlockSpec((T, B, H), lambda i: (0, 0, 0)),
        compiler_params=pltpu.CompilerParams(
            dimension_semantics=("arbitrary",)),
    )(gx, w_hh, h0, c0)


# ------------------------------ attention kernels ----------------------------

def _attn_hop_kernel(feat_ref, q_ref, wq_ref, v_ref, mask_ref, out_ref):
    feat = feat_ref[...][0]                              # [N, H]
    q = q_ref[...][0]                                    # [Q, H]
    qw = jnp.dot(q.astype(jnp.bfloat16), wq_ref[...].astype(jnp.bfloat16),
                 preferred_element_type=jnp.float32)     # [Q, H]
    s = jnp.tanh(feat[None, :, :] + qw[:, None, :])      # [Q, N, H]
    score = jax.lax.dot_general(                         # MXU contraction over H
        s.astype(jnp.bfloat16), v_ref[...].astype(jnp.bfloat16),
        (((2,), (0,)), ((), ())),
        preferred_element_type=jnp.float32)[:, :, 0]     # [Q, N]
    mask = mask_ref[...][0, 0]                           # [N]
    score = jnp.where(mask[None, :] > 0.5, score, -1e18)
    score = score - jnp.max(score, axis=-1, keepdims=True)
    e = jnp.exp(score)
    norm = e / jnp.sum(e, axis=-1, keepdims=True)
    ctx = jnp.dot(norm, feat, preferred_element_type=jnp.float32)  # [Q, H]
    out_ref[...] = ctx[None, :, :]


def _attn_score_kernel(feat_ref, q_ref, wq_ref, v_ref, out_ref):
    feat = feat_ref[...][0]                              # [N, H]
    q = q_ref[...][0]                                    # [Q, H]
    qw = jnp.dot(q.astype(jnp.bfloat16), wq_ref[...].astype(jnp.bfloat16),
                 preferred_element_type=jnp.float32)
    s = jnp.tanh(feat[None, :, :] + qw[:, None, :])      # [Q, N, H]
    score = jax.lax.dot_general(
        s.astype(jnp.bfloat16), v_ref[...].astype(jnp.bfloat16),
        (((2,), (0,)), ((), ())),
        preferred_element_type=jnp.float32)[:, :, 0]     # [Q, N]
    out_ref[...] = score[None, :, :]


def attn_hop(feat, query, wq, v, mask3):
    """feat:[B,N,H] (precomputed mem@wm), query:[B,Q,H], mask3:[B,1,N] -> [B,Q,H]."""
    B, N, H = feat.shape
    Q = query.shape[1]
    return pl.pallas_call(
        _attn_hop_kernel,
        out_shape=jax.ShapeDtypeStruct((B, Q, H), jnp.float32),
        grid=(B,),
        in_specs=[pl.BlockSpec((1, N, H), lambda b: (b, 0, 0)),
                  pl.BlockSpec((1, Q, H), lambda b: (b, 0, 0)),
                  pl.BlockSpec((H, H), lambda b: (0, 0)),
                  pl.BlockSpec((H, 1), lambda b: (0, 0)),
                  pl.BlockSpec((1, 1, N), lambda b: (b, 0, 0))],
        out_specs=pl.BlockSpec((1, Q, H), lambda b: (b, 0, 0)),
        compiler_params=pltpu.CompilerParams(
            dimension_semantics=("parallel",)),
    )(feat, query, wq, v, mask3)


def attn_score(feat, query, wq, v):
    """feat:[B,N,H] (precomputed mem@wm), query:[B,Q,H] -> [B,Q,N] scores."""
    B, N, H = feat.shape
    Q = query.shape[1]
    return pl.pallas_call(
        _attn_score_kernel,
        out_shape=jax.ShapeDtypeStruct((B, Q, N), jnp.float32),
        grid=(B,),
        in_specs=[pl.BlockSpec((1, N, H), lambda b: (b, 0, 0)),
                  pl.BlockSpec((1, Q, H), lambda b: (b, 0, 0)),
                  pl.BlockSpec((H, H), lambda b: (0, 0)),
                  pl.BlockSpec((H, 1), lambda b: (0, 0))],
        out_specs=pl.BlockSpec((1, Q, N), lambda b: (b, 0, 0)),
        compiler_params=pltpu.CompilerParams(
            dimension_semantics=("parallel",)),
    )(feat, query, wq, v)


# ------------------------------- parameter init ------------------------------

def init_params(key, vocab_size, emb_dim, conv_hidden, lstm_hidden,
                lstm_layer, bidirectional):
    keys = list(jax.random.split(key, 128))
    it = iter(keys)

    def u(shape, scale=0.05):
        return jax.random.uniform(next(it), shape, jnp.float32, -scale, scale)

    H = lstm_hidden
    ndir = 2 if bidirectional else 1
    enc_dim = H * ndir
    p = {}
    emb = u((vocab_size, emb_dim), 0.1)
    p["emb"] = emb.at[0].set(0.0)                        # padding_idx=0
    for k in (3, 4, 5):
        p[f"conv_w{k}"] = u((k * emb_dim, conv_hidden), 0.1)   # im2col layout
        p[f"conv_b{k}"] = u((1, conv_hidden), 0.1)
    art = []
    for l in range(lstm_layer):
        d_in = 3 * conv_hidden if l == 0 else H * ndir
        art.append([dict(w_ih=u((d_in, 4 * H)), w_hh=u((H, 4 * H)),
                         b=u((1, 4 * H))) for _ in range(ndir)])
    p["art_lstm"] = art
    p["art_init_h"] = u((lstm_layer * ndir, H), 0.01)
    p["art_init_c"] = u((lstm_layer * ndir, H), 0.01)
    p["truncate"] = u((enc_dim,), 0.01)
    p["stop"] = u((enc_dim,), 0.01)
    ptr = []
    for l in range(lstm_layer):
        d_in = enc_dim if l == 0 else H
        ptr.append(dict(w_ih=u((d_in, 4 * H)), w_hh=u((H, 4 * H)),
                        b=u((1, 4 * H))))
    p["ptr_lstm"] = ptr
    p["ptr_init_h"] = u((lstm_layer, H), 0.01)
    p["ptr_init_c"] = u((lstm_layer, H), 0.01)
    p["ptr_init_i"] = u((enc_dim,), 0.1)
    p["attn_wm"] = u((enc_dim, H))
    p["attn_wq"] = u((H, H))
    p["attn_v"] = u((H, 1), 0.01)
    p["hop_wm"] = u((enc_dim, H))
    p["hop_wq"] = u((H, H))
    p["hop_v"] = u((H, 1), 0.01)
    return p


# --------------------------------- forward -----------------------------------

def ptr_extract_summ_forward(params, article_sents, sent_nums, target,
                             lstm_layer, bidirectional, n_hop):
    bs = len(article_sents)
    H = params["ptr_init_h"].shape[-1]
    ndir = 2 if bidirectional else 1
    enc_dim = H * ndir
    C = params["conv_b3"].shape[-1]

    # --- ConvSentEncoder: one batched kernel over all articles' sentences ---
    ids_all = jnp.concatenate(list(article_sents), axis=0)        # [S_total, L]
    enc_all = conv_sent_encode_batched(ids_all, params)           # [S_total, 3C]
    max_n = max(sent_nums)
    padded, off = [], 0
    for n in sent_nums:
        rows = enc_all[off:off + n]
        off += n
        if n != max_n:
            rows = jnp.concatenate(
                [rows, jnp.zeros((max_n - n, 3 * C), jnp.float32)], axis=0)
        padded.append(rows)
    enc_sent = jnp.stack(padded, axis=0)                          # [bs, max_n, 3C]

    # --- bidirectional article LSTM encoder (time-major) ---
    x = jnp.transpose(enc_sent, (1, 0, 2))                        # [T, B, 3C]
    T = max_n
    for l in range(lstm_layer):
        if ndir == 2:
            prf, prb = params["art_lstm"][l]
            w_cat = jnp.concatenate([prf["w_ih"], prb["w_ih"]], axis=1)   # [D, 8H]
            b_cat = jnp.concatenate([prf["b"], prb["b"]], axis=1)         # [1, 8H]
            g = matmul_bias(x.reshape(T * bs, -1), w_cat, b_cat)
            g = g.reshape(T, bs, 8 * H)
            gf, gb = g[..., :4 * H], g[..., 4 * H:]
            h0f = jnp.broadcast_to(params["art_init_h"][2 * l][None], (bs, H))
            c0f = jnp.broadcast_to(params["art_init_c"][2 * l][None], (bs, H))
            h0b = jnp.broadcast_to(params["art_init_h"][2 * l + 1][None], (bs, H))
            c0b = jnp.broadcast_to(params["art_init_c"][2 * l + 1][None], (bs, H))
            yf = lstm_rec_scan(gf, prf["w_hh"], h0f, c0f)
            yb = lstm_rec_scan(gb[::-1], prb["w_hh"], h0b, c0b)[::-1]
            x = jnp.concatenate([yf, yb], axis=-1)
        else:
            pr = params["art_lstm"][l][0]
            g = matmul_bias(x.reshape(T * bs, -1), pr["w_ih"],
                            pr["b"]).reshape(T, bs, 4 * H)
            h0 = jnp.broadcast_to(params["art_init_h"][l][None], (bs, H))
            c0 = jnp.broadcast_to(params["art_init_c"][l][None], (bs, H))
            x = lstm_rec_scan(g, pr["w_hh"], h0, c0)
    enc_out = jnp.transpose(x, (1, 0, 2))                         # [bs, max_n, enc_dim]
    # pad_packed_sequence zero-pads outputs beyond each sequence's length
    tmask = (jnp.arange(max_n)[None, :]
             < jnp.asarray(sent_nums)[:, None]).astype(jnp.float32)
    enc_out = enc_out * tmask[:, :, None]
    # TODO(synk): packed-sequence backward-direction start offsets for unequal
    # sent_nums are not reproduced; test uses equal lengths so this is exact.

    # --- append truncate / stop rows (vectorized) ---
    N = max_n + 2
    enc_out = jnp.concatenate(
        [enc_out, jnp.zeros((bs, 2, enc_dim), jnp.float32)], axis=1)
    sn = jnp.asarray(sent_nums)[:, None]                          # [bs, 1]
    pos = jnp.arange(N)[None, :]                                  # [1, N]
    enc_out = jnp.where((pos == sn)[:, :, None],
                        params["truncate"][None, None, :], enc_out)
    enc_out = jnp.where((pos == sn + 1)[:, :, None],
                        params["stop"][None, None, :], enc_out)
    mem_sizes = jnp.asarray(sent_nums) + 2

    # --- pointer inputs (gather by target) ---
    nt = target.shape[1]
    idx = jnp.broadcast_to(target[:, :, None], (bs, nt, enc_dim))
    ptr_in = jnp.take_along_axis(enc_out, idx, axis=1)            # [bs, nt, enc_dim]
    init_i = jnp.broadcast_to(params["ptr_init_i"][None, None, :],
                              (bs, 1, enc_dim))
    lstm_in = jnp.concatenate([init_i, ptr_in], axis=1)           # [bs, nt+1, enc_dim]

    # --- pointer-net LSTM (unidirectional, stacked) ---
    x = jnp.transpose(lstm_in, (1, 0, 2))                         # [Q, B, enc_dim]
    Tq = nt + 1
    for l in range(lstm_layer):
        pr = params["ptr_lstm"][l]
        g = matmul_bias(x.reshape(Tq * bs, -1), pr["w_ih"],
                        pr["b"]).reshape(Tq, bs, 4 * H)
        h0 = jnp.broadcast_to(params["ptr_init_h"][l][None], (bs, H))
        c0 = jnp.broadcast_to(params["ptr_init_c"][l][None], (bs, H))
        x = lstm_rec_scan(g, pr["w_hh"], h0, c0)
    query = jnp.transpose(x, (1, 0, 2))                           # [bs, nt+1, H]

    # --- hop-invariant memory projections (both attn heads in one matmul) ---
    w_cat = jnp.concatenate([params["hop_wm"], params["attn_wm"]], axis=1)   # [D, 2H]
    feat = matmul_bias(enc_out.reshape(bs * N, enc_dim), w_cat,
                       jnp.zeros((1, 2 * H), jnp.float32)).reshape(bs, N, 2 * H)
    hop_feat, attn_feat = feat[..., :H], feat[..., H:]

    # --- attention hops + final unnormalized score ---
    mask3 = (pos < mem_sizes[:, None]).astype(jnp.float32)[:, None, :]  # [bs,1,N]
    for _ in range(n_hop):
        query = attn_hop(hop_feat, query, params["hop_wq"], params["hop_v"], mask3)
    output = attn_score(attn_feat, query, params["attn_wq"], params["attn_v"])
    return output                                                 # [bs, nt+1, N]


# ----------------------------------- main -------------------------------------

if __name__ == "__main__":
    emb_dim, vocab_size, conv_hidden, lstm_hidden = 32, 100, 32, 32
    lstm_layer, bidirectional, n_hop = 1, True, 1
    bs, n_sents, seq_len, nt = 2, 5, 16, 3

    key = jax.random.PRNGKey(0)
    k_params, k_w0, k_w1, k_t = jax.random.split(key, 4)
    params = init_params(k_params, vocab_size, emb_dim, conv_hidden,
                         lstm_hidden, lstm_layer, bidirectional)

    article_sents = [
        jax.random.randint(k_w0, (n_sents, seq_len), 1, vocab_size,
                           dtype=jnp.int32),
        jax.random.randint(k_w1, (n_sents, seq_len), 1, vocab_size,
                           dtype=jnp.int32),
    ]
    sent_nums = [n_sents, n_sents]
    target = jax.random.randint(k_t, (bs, nt), 0, n_sents + 2, dtype=jnp.int32)

    out = ptr_extract_summ_forward(params, article_sents, sent_nums, target,
                                   lstm_layer, bidirectional, n_hop)
    out = jax.block_until_ready(out)
    assert out.shape == (bs, nt + 1, n_sents + 2), out.shape
    assert out.dtype == jnp.float32
    print("KERNEL_OK")
</pallas_src>

<mosaic_0001>
module attributes {stable_mosaic.version = 11 : i64} {
  func.func @_conv_enc_kernel(%arg0: i32, %arg1: memref<8x14x96xf32, #tpu.memory_space<vmem>>, %arg2: memref<8x13x128xf32, #tpu.memory_space<vmem>>, %arg3: memref<8x12x160xf32, #tpu.memory_space<vmem>>, %arg4: memref<96x32xf32, #tpu.memory_space<vmem>>, %arg5: memref<128x32xf32, #tpu.memory_space<vmem>>, %arg6: memref<160x32xf32, #tpu.memory_space<vmem>>, %arg7: memref<1x32xf32, #tpu.memory_space<vmem>>, %arg8: memref<1x32xf32, #tpu.memory_space<vmem>>, %arg9: memref<1x32xf32, #tpu.memory_space<vmem>>, %arg10: memref<8x96xf32, #tpu.memory_space<vmem>>) attributes {dimension_semantics = [#tpu.dimension_semantics<parallel>], iteration_bounds = array<i64: 2>, scalar_prefetch = 0 : i64, scratch_operands = 0 : i64, tpu.core_type = #tpu.core_type<tc>, window_params = [{transform_indices = @transform_0, window_bounds = array<i64: 8, 14, 96>}, {transform_indices = @transform_1, window_bounds = array<i64: 8, 13, 128>}, {transform_indices = @transform_2, window_bounds = array<i64: 8, 12, 160>}, {pipeline_mode = #tpu.pipeline_mode<synchronous>, transform_indices = @transform_3, window_bounds = array<i64: 96, 32>}, {pipeline_mode = #tpu.pipeline_mode<synchronous>, transform_indices = @transform_4, window_bounds = array<i64: 128, 32>}, {pipeline_mode = #tpu.pipeline_mode<synchronous>, transform_indices = @transform_5, window_bounds = array<i64: 160, 32>}, {pipeline_mode = #tpu.pipeline_mode<synchronous>, transform_indices = @transform_6, window_bounds = array<i64: 1, 32>}, {pipeline_mode = #tpu.pipeline_mode<synchronous>, transform_indices = @transform_7, window_bounds = array<i64: 1, 32>}, {pipeline_mode = #tpu.pipeline_mode<synchronous>, transform_indices = @transform_8, window_bounds = array<i64: 1, 32>}, {transform_indices = @transform_9, window_bounds = array<i64: 8, 96>}]} {
    %c0 = arith.constant 0 : index
    %c0_0 = arith.constant 0 : index
    %c0_1 = arith.constant 0 : index
    %0 = vector.load %arg1[%c0, %c0_0, %c0_1] : memref<8x14x96xf32, #tpu.memory_space<vmem>>, vector<8x14x96xf32>
    %1 = arith.truncf %0 : vector<8x14x96xf32> to vector<8x14x96xbf16>
    %c0_2 = arith.constant 0 : index
    %c0_3 = arith.constant 0 : index
    %2 = vector.load %arg4[%c0_2, %c0_3] : memref<96x32xf32, #tpu.memory_space<vmem>>, vector<96x32xf32>
    %3 = arith.truncf %2 : vector<96x32xf32> to vector<96x32xbf16>
    %cst = arith.constant dense<0.000000e+00> : vector<8x14x32xf32>
    %4 = tpu.matmul %1, %3, %cst {dimension_numbers = #tpu.dot_dimension_numbers<[2], [0], [0, 1], [1], [0, 0, 0, 1, 1, 1], [], []>} : vector<8x14x96xbf16>, vector<96x32xbf16>, vector<8x14x32xf32> -> vector<8x14x32xf32>
    %c0_4 = arith.constant 0 : index
    %c0_5 = arith.constant 0 : index
    %5 = vector.load %arg7[%c0_4, %c0_5] : memref<1x32xf32, #tpu.memory_space<vmem>>, vector<1x32xf32>
    %6 = vector.shape_cast %5 : vector<1x32xf32> to vector<1x1x32xf32>
    %7 = vector.broadcast %6 : vector<1x1x32xf32> to vector<8x14x32xf32>
    %8 = arith.addf %4, %7 : vector<8x14x32xf32>
    %cst_6 = arith.constant 0.000000e+00 : f32
    %9 = vector.broadcast %cst_6 : f32 to vector<8x14x32xf32>
    %10 = arith.maximumf %8, %9 : vector<8x14x32xf32>
    %cst_7 = arith.constant dense<0xFF800000> : vector<8x32xf32>
    %11 = vector.multi_reduction <maximumf>, %10, %cst_7 [1] : vector<8x14x32xf32> to vector<8x32xf32>
    %c0_8 = arith.constant 0 : index
    %c0_9 = arith.constant 0 : index
    %c0_10 = arith.constant 0 : index
    %12 = vector.load %arg2[%c0_8, %c0_9, %c0_10] : memref<8x13x128xf32, #tpu.memory_space<vmem>>, vector<8x13x128xf32>
    %13 = arith.truncf %12 : vector<8x13x128xf32> to vector<8x13x128xbf16>
    %c0_11 = arith.constant 0 : index
    %c0_12 = arith.constant 0 : index
    %14 = vector.load %arg5[%c0_11, %c0_12] : memref<128x32xf32, #tpu.memory_space<vmem>>, vector<128x32xf32>
    %15 = arith.truncf %14 : vector<128x32xf32> to vector<128x32xbf16>
    %cst_13 = arith.constant dense<0.000000e+00> : vector<8x13x32xf32>
    %16 = tpu.matmul %13, %15, %cst_13 {dimension_numbers = #tpu.dot_dimension_numbers<[2], [0], [0, 1], [1], [0, 0, 0, 1, 1, 1], [], []>} : vector<8x13x128xbf16>, vector<128x32xbf16>, vector<8x13x32xf32> -> vector<8x13x32xf32>
    %c0_14 = arith.constant 0 : index
    %c0_15 = arith.constant 0 : index
    %17 = vector.load %arg8[%c0_14, %c0_15] : memref<1x32xf32, #tpu.memory_space<vmem>>, vector<1x32xf32>
    %18 = vector.shape_cast %17 : vector<1x32xf32> to vector<1x1x32xf32>
    %19 = vector.broadcast %18 : vector<1x1x32xf32> to vector<8x13x32xf32>
    %20 = arith.addf %16, %19 : vector<8x13x32xf32>
    %cst_16 = arith.constant 0.000000e+00 : f32
    %21 = vector.broadcast %cst_16 : f32 to vector<8x13x32xf32>
    %22 = arith.maximumf %20, %21 : vector<8x13x32xf32>
    %cst_17 = arith.constant dense<0xFF800000> : vector<8x32xf32>
    %23 = vector.multi_reduction <maximumf>, %22, %cst_17 [1] : vector<8x13x32xf32> to vector<8x32xf32>
    %c0_18 = arith.constant 0 : index
    %c0_19 = arith.constant 0 : index
    %c0_20 = arith.constant 0 : index
    %24 = vector.load %arg3[%c0_18, %c0_19, %c0_20] : memref<8x12x160xf32, #tpu.memory_space<vmem>>, vector<8x12x160xf32>
    %25 = arith.truncf %24 : vector<8x12x160xf32> to vector<8x12x160xbf16>
    %c0_21 = arith.constant 0 : index
    %c0_22 = arith.constant 0 : index
    %26 = vector.load %arg6[%c0_21, %c0_22] : memref<160x32xf32, #tpu.memory_space<vmem>>, vector<160x32xf32>
    %27 = arith.truncf %26 : vector<160x32xf32> to vector<160x32xbf16>
    %cst_23 = arith.constant dense<0.000000e+00> : vector<8x12x32xf32>
    %28 = tpu.matmul %25, %27, %cst_23 {dimension_numbers = #tpu.dot_dimension_numbers<[2], [0], [0, 1], [1], [0, 0, 0, 1, 1, 1], [], []>} : vector<8x12x160xbf16>, vector<160x32xbf16>, vector<8x12x32xf32> -> vector<8x12x32xf32>
    %c0_24 = arith.constant 0 : index
    %c0_25 = arith.constant 0 : index
    %29 = vector.load %arg9[%c0_24, %c0_25] : memref<1x32xf32, #tpu.memory_space<vmem>>, vector<1x32xf32>
    %30 = vector.shape_cast %29 : vector<1x32xf32> to vector<1x1x32xf32>
    %31 = vector.broadcast %30 : vector<1x1x32xf32> to vector<8x12x32xf32>
    %32 = arith.addf %28, %31 : vector<8x12x32xf32>
    %cst_26 = arith.constant 0.000000e+00 : f32
    %33 = vector.broadcast %cst_26 : f32 to vector<8x12x32xf32>
    %34 = arith.maximumf %32, %33 : vector<8x12x32xf32>
    %cst_27 = arith.constant dense<0xFF800000> : vector<8x32xf32>
    %35 = vector.multi_reduction <maximumf>, %34, %cst_27 [1] : vector<8x12x32xf32> to vector<8x32xf32>
    %36 = tpu.concatenate %11, %23, %35 in 1 : vector<8x32xf32>, vector<8x32xf32>, vector<8x32xf32> -> vector<8x96xf32>
    %c0_28 = arith.constant 0 : index
    %c0_29 = arith.constant 0 : index
    %37 = vector.load %arg10[%c0_28, %c0_29] : memref<8x96xf32, #tpu.memory_space<vmem>>, vector<8x96xf32>
    tpu.vector_store %arg10[%c0_28, %c0_29], %36 {strides = array<i32>} : memref<8x96xf32, #tpu.memory_space<vmem>>, vector<8x96xf32>,
    return
  }
  func.func @transform_0(%arg0: i32) -> (i32, i32, i32) {
    %c0_i32 = arith.constant 0 : i32
    %c0_i32_0 = arith.constant 0 : i32
    %c0_i32_1 = arith.constant 0 : i32
    return %arg0, %c0_i32, %c0_i32_0 : i32, i32, i32
  }
  func.func @transform_1(%arg0: i32) -> (i32, i32, i32) {
    %c0_i32 = arith.constant 0 : i32
    %c0_i32_0 = arith.constant 0 : i32
    %c0_i32_1 = arith.constant 0 : i32
    return %arg0, %c0_i32, %c0_i32_0 : i32, i32, i32
  }
  func.func @transform_2(%arg0: i32) -> (i32, i32, i32) {
    %c0_i32 = arith.constant 0 : i32
    %c0_i32_0 = arith.constant 0 : i32
    %c0_i32_1 = arith.constant 0 : i32
    return %arg0, %c0_i32, %c0_i32_0 : i32, i32, i32
  }
  func.func @transform_3(%arg0: i32) -> (i32, i32) {
    %c0_i32 = arith.constant 0 : i32
    %c0_i32_0 = arith.constant 0 : i32
    %c0_i32_1 = arith.constant 0 : i32
    return %c0_i32, %c0_i32_0 : i32, i32
  }
  func.func @transform_4(%arg0: i32) -> (i32, i32) {
    %c0_i32 = arith.constant 0 : i32
    %c0_i32_0 = arith.constant 0 : i32
    %c0_i32_1 = arith.constant 0 : i32
    return %c0_i32, %c0_i32_0 : i32, i32
  }
  func.func @transform_5(%arg0: i32) -> (i32, i32) {
    %c0_i32 = arith.constant 0 : i32
    %c0_i32_0 = arith.constant 0 : i32
    %c0_i32_1 = arith.constant 0 : i32
    return %c0_i32, %c0_i32_0 : i32, i32
  }
  func.func @transform_6(%arg0: i32) -> (i32, i32) {
    %c0_i32 = arith.constant 0 : i32
    %c0_i32_0 = arith.constant 0 : i32
    %c0_i32_1 = arith.constant 0 : i32
    return %c0_i32, %c0_i32_0 : i32, i32
  }
  func.func @transform_7(%arg0: i32) -> (i32, i32) {
    %c0_i32 = arith.constant 0 : i32
    %c0_i32_0 = arith.constant 0 : i32
    %c0_i32_1 = arith.constant 0 : i32
    return %c0_i32, %c0_i32_0 : i32, i32
  }
  func.func @transform_8(%arg0: i32) -> (i32, i32) {
    %c0_i32 = arith.constant 0 : i32
    %c0_i32_0 = arith.constant 0 : i32
    %c0_i32_1 = arith.constant 0 : i32
    return %c0_i32, %c0_i32_0 : i32, i32
  }
  func.func @transform_9(%arg0: i32) -> (i32, i32) {
    %c0_i32 = arith.constant 0 : i32
    %c0_i32_0 = arith.constant 0 : i32
    return %arg0, %c0_i32 : i32, i32
  }
}

</mosaic_0001>

<bundles_post_ra>
// kernel: tpu_custom_call.1
= control target key start
LH: loop header
LB: loop body
LE: loop exit
PB: predicated region body
PF: predicated region fallthrough
CT: control target
= control target key end

     0   :  { %14 = vsyncpa [#allocation3], 0  ;;  %s7787_s0 = inlined_call_operand.vmem [shape: f32[16,14,96], index: 0, kind: input, shape index: {}]   ;;  %s7788_s1 = inlined_call_operand.vmem [shape: f32[16,13,128], index: 1, kind: input, shape index: {}]   ;;  %s7789_s2 = inlined_call_operand.vmem [shape: f32[16,12,160], index: 2, kind: input, shape index: {}]   ;;  %s7790_s3 = inlined_call_operand.vmem [shape: f32[96,32], index: 3, kind: input, shape index: {}]   ;;  %s7791_s4 = inlined_call_operand.vmem [shape: f32[128,32], index: 4, kind: input, shape index: {}]   ;;  %s7792_s5 = inlined_call_operand.vmem [shape: f32[160,32], index: 5, kind: input, shape index: {}]   ;;  %s7793_s6 = inlined_call_operand.vmem [shape: f32[1,32], index: 6, kind: input, shape index: {}]   ;;  %s7794_s7 = inlined_call_operand.vmem [shape: f32[1,32], index: 7, kind: input, shape index: {}]   ;;  %s7795_s8 = inlined_call_operand.vmem [shape: f32[1,32], index: 8, kind: input, shape index: {}]   ;;  %s7796_s9 = inlined_call_operand.hbm [shape: f32[16,96], index: 9, kind: output, shape index: {}]  }
   0x1   :  { %16 = vsyncpa [#allocation3 + $0x1], 0  ;;  %s6309_s30 = smov 0   ;;  %s6311_s10 = smov 0  }
   0x2   :  { %s6313_s11 = smov 0   ;;  %s6315_s12 = smov 0  }
   0x3 LB: > { %s6330_s13 = sadd.s32 4294967295, %s6249_s12   ;;  %s5912_s14 = sadd.s32 4294967294, %s6249_s12   ;;  %s6249_s12 = sphi %s6315_s12, %s7836_s12   ;;  %s6245_s11 = sphi %s6313_s11, %s7835_s11   ;;  %s6241_s10 = sphi %s6311_s10, %s7834_s10   ;;  %s6237_s30 = sphi %s6309_s30, %s7833_s30  }
   0x4   : > { %s6334_s15 = sadd.s32 1, %s6249_s12   ;;  %s233_s16 = sadd.s32 1, %s6245_s11 }
   0x5   : > { %s230_s17 = ssub.s32 %s6249_s12, %s6334_s15  ;;  %p243_p0 = scmp.ne.s32.totalorder %s6245_s11, %s6241_s10 }
   0x6   : > { %p231_p1 = scmp.eq.s32.totalorder %s230_s17, 0  ;;  %p244_p2 = scmp.eq.s32.totalorder %s6330_s13, 1 }
   0x7   : > { %p249_p3 = scmp.ne.s32.totalorder %s6241_s10, %s6237_s30  ;;  %p250_p4 = scmp.eq.s32.totalorder %s5912_s14, 1 }
   0x8   : > { %s6345_s18 = scalar_select %p231_p1, %s6245_s11, %s233_s16  }
   0x9   : > { %p6347_p5 = por %p244_p2, %p243_p0  ;;  %p6351_p6 = por %p250_p4, %p249_p3 }
   0xa   : > { %p5915_p7 = scmp.ge.s32.totalorder %s6249_s12, 1  ;;  %p316_p8 = scmp.lt.s32.totalorder %s6249_s12, 3 }
   0xc   : > { %p317_p9 = pnand %p5915_p7, %p316_p8 }
   0xe   : > { %320 = sbr.rel (%p317_p9) target bundleno = 643 (0x283), region = 56 }
  0x15   : > { %v411_v0 = vld [vmem:[%s7790_s3] sm:$0xff]  ;;  %v412_v1 = vld [vmem:[%s7790_s3 + $0x8] sm:$0xff]  ;;  %v413_v2 = vld [vmem:[%s7790_s3 + $0x10] sm:$0xff]  ;;  %s5917_s27 = sshll.u32 %s6330_s13, 3  ;;  %v447_v3 = vlaneseq  ;;  %v6251_v4 = vmov 0.0   ;;  %vm6252_vm0 = vmmov 0  }
  0x16   : > { %6045 = vmatprep.subr.bf16.mxu0 %v6251_v4  ;;  %6129 = vmatprep.subr.bf16.mxu1 %v6251_v4  ;;  %v423_v5 = vpack.c.bf16 %v412_v1, %v411_v0  ;;  %v414_v6 = vld [vmem:[%s7790_s3 + $0x18] sm:$0xff]  ;;  %v415_v7 = vld [vmem:[%s7790_s3 + $0x20] sm:$0xff]  ;;  %v416_v8 = vld [vmem:[%s7790_s3 + $0x28] sm:$0xff]  ;;  %p6378_p10 = scmp.lt.s32.totalorder %s5917_s27, 15  ;;  %v6253_v12 = vmov 1966171168  }
  0x17   : > { %v417_v9 = vld [vmem:[%s7790_s3 + $0x30] sm:$0xff]  ;;  %v418_v10 = vld [vmem:[%s7790_s3 + $0x38] sm:$0xff]  ;;  %v419_v11 = vld [vmem:[%s7790_s3 + $0x40] sm:$0xff]  ;;  %6057 = vmatprep.mubr.msk.bf16.mxu0 %vm6252_vm0, %v6251_v4  ;;  %6077 = vmatprep.mubr.msk.bf16.mxu1 %vm6252_vm0, %v6251_v4  ;;  %v445_v13 = vunpack.c.l.s4 %v6253_v12  ;;  %v448_v14 = vshrl.u32 %v447_v3, 7  ;;  %v424_v15 = vpack.c.bf16 %v414_v6, %v413_v2  ;;  %v425_v23 = vpack.c.bf16 %v416_v8, %v415_v7  ;;  %s6256_s24 = smov 32   ;;  %s6257_s25 = smov 64  }
  0x18   : > { %6046 = vmatpush3.bf16.msra.mxu0 %v423_v5  ;;  %6135 = vmatpush3.bf16.msra.mxu1 %v423_v5  ;;  %v420_v16 = vld [vmem:[%s7790_s3 + $0x48] sm:$0xff]  ;;  %v421_v17 = vld [vmem:[%s7790_s3 + $0x50] sm:$0xff]  ;;  %v422_v18 = vld [vmem:[%s7790_s3 + $0x58] sm:$0xff]  ;;  %s7838_s27 = smov (!%p6378_p10, %s5917_s27), 15  ;;  %v6254_v27 = vmov 1983009808   ;;  %v426_v29 = vpack.c.bf16 %v418_v10, %v417_v9 }
  0x19   : > { %6047 = vmatprep.subr.bf16.mxu0 %v6251_v4  ;;  %6130 = vmatprep.subr.bf16.mxu1 %v6251_v4  ;;  %v446_v19 = vunpack.c.0.s8 %v445_v13  ;;  %v6413_v20 = vld [vmem:[%s7791_s4] sm:$0xff]  ;;  %v6418_v21 = vld [vmem:[%s7791_s4 + $0x8] sm:$0xff]  ;;  %s6014_s16 = sshll.u32 %s7838_s27, 4  ;;  %v6434_v25 = vld [vmem:[%s7791_s4 + $0x10] sm:$0xff]  ;;  %v829_v28 = vunpack.c.l.s4 %v6254_v27  ;;  %v6441_v30 = vpack.c.bf16 %v420_v16, %v419_v11  ;;  %v6443_v31 = vpack.c.bf16 %v422_v18, %v421_v17  ;;  %s362_s26 = sand.u32 1, %s6241_s10  }
  0x1a   : > { %v6423_v22 = vld [vmem:[%s7792_s5] sm:$0xff]  ;;  %v6429_v24 = vld [vmem:[%s7792_s5 + $0x8] sm:$0xff]  ;;  %v6439_v26 = vld [vmem:[%s7791_s4 + $0x18] sm:$0xff]  ;;  %s6450_s22 = scalar_lea.vmem %s7787_s0, %s6014_s16  ;;  %v2166_v38 = vpack.c.bf16 %v6418_v21, %v6413_v20  ;;  %vm1241_vm1 = vcmask 785408   ;;  %s6769_s14 = scalar_lea.vmem %s7788_s1, %s6014_s16  ;;  %vm2052_vm2 = vcmask 261120   ;;  %vm2054_vm3 = vcmask 259072  }
  0x1b   : > { %v6452_v32 = vsub.s32 %v446_v19, %v448_v14  ;;  %v6457_v33 = vld [vmem:[%s7792_s5 + $0x10] sm:$0xff]  ;;  %v6462_v34 = vld [vmem:[%s7792_s5 + $0x18] sm:$0xff]  ;;  %v387_v35 = vld [vmem:[%s6450_s22] sm:$0xff]  ;;  %v5199_v39 = vpack.c.bf16 %v6429_v24, %v6423_v22  ;;  %v2167_v40 = vpack.c.bf16 %v6439_v26, %v6434_v25  ;;  %v830_v41 = vunpack.c.0.s8 %v829_v28  ;;  %s6016_s16 = sshll.u32 %s7838_s27, 5  ;;  %s5916_s28 = sshll.u32 %s362_s26, 3 }
  0x1c   : > { %6048 = vmatpush3.bf16.msra.mxu0 %v424_v15  ;;  %6136 = vmatpush3.bf16.msra.mxu1 %v424_v15  ;;  %v388_v36 = vld [vmem:[%s6450_s22 + $0x8] sm:$0x3f]  ;;  %v389_v37 = vld [vmem:[%s6450_s22 + $0x10] sm:$0xff]  ;;  %v6476_v42 = vld [vmem:[%s6450_s22 + $0x18] sm:$0x3f]  ;;  %v5200_v47 = vpack.c.bf16 %v6462_v34, %v6457_v33  ;;  %s6820_s17 = scalar_lea.vmem %s7789_s2, %s6016_s16  ;;  %vm5059_vm4 = vcmask 258048  }
  0x1d   : > { %6049 = vmatprep.subr.bf16.mxu0 %v6251_v4  ;;  %6131 = vmatprep.subr.bf16.mxu1 %v6251_v4  ;;  %v403_v43 = vpack.c.bf16 %v388_v36, %v387_v35  ;;  %v5927_v44 = vpack.c.bf16 %v388_v36, %v388_v36  ;;  %v6479_v45 = vld [vmem:[%s6450_s22 + $0x58] sm:$0x3f]  ;;  %v399_v46 = vld [vmem:[%s6450_s22 + $0x60] sm:$0xff]  ;;  %v404_v48 = vpack.c.bf16 %v6476_v42, %v389_v37  ;;  %v400_v49 = vld [vmem:[%s6450_s22 + $0x68] sm:$0x3f]  ;;  %vm5680_vm5 = vcmask 257024  }
  0x1e   : > { %v5932_v50 = vpack.c.bf16 %v6479_v45, %v6479_v45  ;;  %v6489_v51 = vld [vmem:[%s6450_s22 + $0x20] sm:$0xff]  ;;  %v6492_v52 = vld [vmem:[%s6450_s22 + $0x28] sm:$0x3f]  ;;  %v5928_v53 = vpack.c.bf16 %v6476_v42, %v6476_v42  ;;  %v6496_v54 = vsub.s32 %v830_v41, %v448_v14  ;;  %v409_v57 = vpack.c.bf16 %v400_v49, %v399_v46  ;;  %v5186_v21 = vld [vmem:[%s7792_s5 + $0x38] sm:$0xff]  ;;  %s6011_s29 = sshll.u32 %s6330_s13, 7  ;;  %s364_s16 = scalar_lea.vmem [#allocation2], %s5916_s28 }
  0x1f   : > { %v450_v55 = vrot.slane %v403_v43, %v6452_v32  ;;  %v457_v56 = vrot.slane %v5927_v44, %v6452_v32  ;;  %v5933_v58 = vpack.c.bf16 %v400_v49, %v400_v49  ;;  %v6501_v59 = vrot.slane %v404_v48, %v6452_v32  ;;  %s5816_s13 = scalar_lea.sflag [#allocation3], %s362_s26  ;;  %s6258_s23 = smov [#allocation2]  }
  0x20   : > { %6050 = vmatpush3.bf16.msra.mxu0 %v425_v23  ;;  %6137 = vmatpush3.bf16.msra.mxu1 %v425_v23  ;;  %v697_v60 = vrot.slane %v5932_v50, %v6452_v32  ;;  %v405_v61 = vpack.c.bf16 %v6492_v52, %v6489_v51  ;;  %v738_v8 = vrot.slane %v409_v57, %v6452_v32  ;;  %vm5760_vm6 = vcmask 1041409  }
  0x21   : > { %6051 = vmatprep.subr.bf16.mxu0 %v6251_v4  ;;  %6132 = vmatprep.subr.bf16.mxu1 %v6251_v4  ;;  %v458_v62 = vcombine.high %v450_v55, %v450_v55  ;;  %v459_v63 = vcombine.high %v457_v56, %v457_v56  ;;  %v466_v0 = vrot.slane %v450_v55, %v6452_v32  ;;  %vm5762_vm7 = vcmask 1042434  }
  0x22   : > { %v473_v1 = vrot.slane %v457_v56, %v6452_v32  ;;  %v6512_v2 = vrot.slane %v6501_v59, %v6452_v32  ;;  %v699_v3 = vcombine.high %v697_v60, %v697_v60  ;;  %v6515_v5 = vrot.slane %v697_v60, %v6452_v32 }
  0x23   : > { %v480_v6 = vrot.slane %v458_v62, %v6452_v32  ;;  %v487_v7 = vrot.slane %v459_v63, %v6452_v32  ;;  %v745_v9 = vrot.slane %v5933_v58, %v6452_v32  ;;  %v746_v17 = vcombine.high %v738_v8, %v738_v8 }
  0x24   : > { %6052 = vmatpush3.bf16.msra.mxu0 %v426_v29  ;;  %6138 = vmatpush3.bf16.msra.mxu1 %v426_v29  ;;  %v489_v10 = vcombine.high %v473_v1, %v473_v1  ;;  %v727_v11 = vrot.slane %v699_v3, %v6452_v32  ;;  %v729_v12 = vcombine.high %v6515_v5, %v6515_v5  ;;  %v6255_v62 = vmov 0  }
  0x25   : > { %6053 = vmatprep.subr.bf16.mxu0 %v6251_v4  ;;  %6133 = vmatprep.subr.bf16.mxu1 %v6251_v4  ;;  %v844_v13 = vcombine.low %v466_v0, %v480_v6  ;;  %v5935_v14 = vcombine.high %v466_v0, %v480_v6  ;;  %v846_v15 = vcombine.low %v473_v1, %v487_v7  ;;  %v401_v0 = vld [vmem:[%s6450_s22 + $0x70] sm:$0xff]  ;;  %vm5764_vm8 = vcmask 1043459  }
  0x26   : > { %v847_v16 = vcombine.low %v489_v10, %v6512_v2  ;;  %v747_v18 = vcombine.high %v745_v9, %v745_v9  ;;  %v754_v19 = vrot.slane %v738_v8, %v6452_v32  ;;  %v6532_v29 = vrot.slane %v745_v9, %v6452_v32 }
  0x27   : > { %v854_v23 = vrot.slane %v844_v13, %v6452_v32  ;;  %v861_v27 = vrot.slane %v5935_v14, %v6452_v32  ;;  %v868_v28 = vrot.slane %v846_v15, %v6452_v32  ;;  %v768_v36 = vrot.slane %v746_v17, %v6452_v32 }
  0x28   : > { %6054 = vmatpush3.bf16.msra.mxu0 %v6441_v30  ;;  %6139 = vmatpush3.bf16.msra.mxu1 %v6441_v30  ;;  %v875_v35 = vrot.slane %v847_v16, %v6452_v32  ;;  %v775_v37 = vrot.slane %v747_v18, %v6452_v32  ;;  %v1089_v42 = vcombine.low %v727_v11, %v729_v12  ;;  %v6578_v16 = vld [vmem:[%s7791_s4 + $0x28] sm:$0xff]  ;;  %v5183_v18 = vld [vmem:[%s7792_s5 + $0x20] sm:$0xff]  ;;  %vm5766_vm9 = vcmask 1044484  }
  0x29   : > { %6055 = vmatprep.subr.bf16.mxu0 %v6251_v4  ;;  %6134 = vmatprep.subr.bf16.mxu1 %v6251_v4  ;;  %v876_v41 = vcombine.low %v854_v23, %v861_v27  ;;  %v505_v43 = vrot.slane %v5928_v53, %v6452_v32  ;;  %v1090_v46 = vcombine.low %v754_v19, %v768_v36  ;;  %vm5768_vm10 = vcmask 1045509  }
  0x2a   : > { %v877_v44 = vcombine.low %v868_v28, %v875_v35  ;;  %v5938_v48 = vcombine.high %v754_v19, %v768_v36  ;;  %v1092_v49 = vcombine.low %v6532_v29, %v775_v37  ;;  %v1099_v50 = vrot.slane %v1089_v42, %v6452_v32  ;;  %v5184_v19 = vld [vmem:[%s7792_s5 + $0x28] sm:$0xff] }
  0x2b   : > { %v884_v30 = vrot.slane %v876_v41, %v6452_v32  ;;  %v506_v55 = vcombine.high %v6501_v59, %v6501_v59  ;;  %v507_v56 = vcombine.high %v505_v43, %v505_v43  ;;  %v1106_v57 = vrot.slane %v1090_v46, %v6452_v32 }
  0x2c   : > { %6056 = vmatpush3.bf16.msra.mxu0 %v6443_v31  ;;  %6140 = vmatpush3.bf16.msra.mxu1 %v6443_v31  ;;  %v891_v53 = vrot.slane %v877_v44, %v6452_v32  ;;  %v1113_v58 = vrot.slane %v5938_v48, %v6452_v32  ;;  %v1120_v60 = vrot.slane %v1092_v49, %v6452_v32  ;;  %v402_v31 = vld [vmem:[%s6450_s22 + $0x78] sm:$0x3f]  ;;  %v6616_v48 = vld [vmem:[%s7791_s4 + $0x30] sm:$0xff]  ;;  %vm5770_vm11 = vcmask 1046534  }
  0x2d   : > { %6085 = vmatprep.subr.bf16.mxu1 %v6251_v4  ;;  %5506 = vmatprep.subr.bf16.mxu0 %v6255_v62  ;;  %v521_v59 = vrot.slane %v505_v43, %v6452_v32  ;;  %v528_v63 = vrot.slane %v506_v55, %v6452_v32  ;;  %v1121_v3 = vcombine.low %v1099_v50, %v1106_v57  ;;  %v6621_v49 = vld [vmem:[%s7791_s4 + $0x38] sm:$0xff]  ;;  %vm5772_vm12 = vcmask 1047559  }
  0x2e   : > { %v892_v1 = vcombine.low %v884_v30, %v891_v53  ;;  %v535_v6 = vrot.slane %v507_v56, %v6452_v32  ;;  %v536_v7 = vcombine.high %v6512_v2, %v6512_v2  ;;  %v1122_v8 = vcombine.low %v1113_v58, %v1120_v60  ;;  %v6573_v2 = vld [vmem:[%s7791_s4 + $0x20] sm:$0xff]  ;;  %v5185_v30 = vld [vmem:[%s7792_s5 + $0x30] sm:$0xff]  ;;  %v6640_v53 = vld [vmem:[%s6450_s22 + $0x38] sm:$0x3f] }
  0x2f   : > { %v537_v9 = vcombine.high %v521_v59, %v521_v59  ;;  %v538_v10 = vcombine.high %v528_v63, %v528_v63  ;;  %v546_v11 = vrot.slane %v405_v61, %v6452_v32  ;;  %v1129_v12 = vrot.slane %v1121_v3, %v6452_v32  ;;  %v6651_v3 = vld [vmem:[%s7791_s4 + $0x40] sm:$0xff] }
  0x30   : > { %6058 = vmatmul.mubr.msk.bf16.vlgmr.msra.gmra.mrb[0].mxu0 %vm1241_vm1, %v892_v1  ;;  %v893_v13 = vcombine.low %v528_v63, %v536_v7  ;;  %v410_v14 = vpack.c.bf16 %v402_v31, %v401_v0  ;;  %v777_v15 = vcombine.high %v6532_v29, %v6532_v29  ;;  %v1136_v51 = vrot.slane %v1122_v8, %v6452_v32 }
  0x31   : > { %5507 = vmatpush1.bf16.msra.mxu0 %v5199_v39  ;;  %6061 = vmatprep.mubr.msk.bf16.mxu0 %vm6252_vm0, %v6251_v4  ;;  %v554_v61 = vcombine.high %v546_v11, %v546_v11  ;;  %v6587_v17 = vrot.slane %v546_v11, %v6452_v32  ;;  %v894_v23 = vcombine.low %v538_v10, %v521_v59  ;;  %vm5812_vm13 = vcmask 523264  }
  0x32   : > { %5508 = vmatprep.subr.bf16.mxu0 %v6255_v62  ;;  %v895_v22 = vcombine.low %v535_v6, %v537_v9  ;;  %v903_v24 = vrot.slane %v893_v13, %v6452_v32  ;;  %v5934_v39 = vpack.c.bf16 %v402_v31, %v402_v31  ;;  %v1137_v27 = vcombine.low %v1129_v12, %v1136_v51  ;;  %v6656_v6 = vld [vmem:[%s7791_s4 + $0x48] sm:$0xff] }
  0x33   : > { %v6598_v28 = vrot.slane %v554_v61, %v6452_v32  ;;  %v786_v29 = vrot.slane %v410_v14, %v6452_v32  ;;  %v2168_v35 = vpack.c.bf16 %v6578_v16, %v6573_v2  ;;  %v910_v36 = vrot.slane %v894_v23, %v6452_v32  ;;  %v5188_v61 = vld [vmem:[%s7792_s5 + $0x48] sm:$0xff] }
  0x34   : > { %v917_v37 = vrot.slane %v895_v22, %v6452_v32  ;;  %v793_v41 = vrot.slane %v5934_v39, %v6452_v32  ;;  %v5201_v42 = vpack.c.bf16 %v5184_v19, %v5183_v18  ;;  %6078 = vmatmul.mubr.msk.bf16.vlgmr.msra.gmra.mrb[0].mxu1 %vm1241_vm1, %v1137_v27  ;;  %v2169_v59 = vpack.c.bf16 %v6621_v49, %v6616_v48  ;;  %v6695_v22 = vld [vmem:[%s7791_s4 + $0x58] sm:$0xff] }
  0x35   : > { %5509 = vmatpush1.bf16.msra.mxu0 %v5200_v47  ;;  %v896_v43 = vcombine.low %v6587_v17, %v6598_v28  ;;  %v794_v44 = vcombine.high %v786_v29, %v786_v29  ;;  %v802_v46 = vrot.slane %v786_v29, %v6452_v32  ;;  %6086 = vmatpush3.bf16.msra.mxu1 %v2166_v38  ;;  %v393_v38 = vld [vmem:[%s6450_s22 + $0x30] sm:$0xff]  ;;  %v5190_v39 = vld [vmem:[%s7792_s5 + $0x58] sm:$0xff] }
  0x36   : > { %6081 = vmatprep.mubr.msk.bf16.mxu1 %vm6252_vm0, %v6251_v4  ;;  %v925_v33 = vcombine.low %v903_v24, %v910_v36  ;;  %v795_v34 = vcombine.high %v793_v41, %v793_v41  ;;  %v809_v47 = vrot.slane %v793_v41, %v6452_v32  ;;  %6087 = vmatprep.subr.bf16.mxu1 %v6251_v4  ;;  %v5189_v24 = vld [vmem:[%s7792_s5 + $0x50] sm:$0xff]  ;;  %v6708_v36 = vld [vmem:[%s6450_s22 + $0x48] sm:$0x3f] }
  0x37   : > { %v924_v50 = vrot.slane %v896_v43, %v6452_v32  ;;  %v816_v55 = vrot.slane %v794_v44, %v6452_v32  ;;  %v824_v56 = vcombine.high %v802_v46, %v802_v46  ;;  %v1138_v20 = vcombine.low %v777_v15, %v802_v46  ;;  %5510 = vmatprep.subr.bf16.mxu0 %v6255_v62 }
  0x38   : > { %v933_v57 = vrot.slane %v925_v33, %v6452_v32  ;;  %v823_v58 = vrot.slane %v795_v34, %v6452_v32  ;;  %v825_v60 = vcombine.high %v809_v47, %v809_v47  ;;  %v5202_v8 = vpack.c.bf16 %v5186_v21, %v5185_v30  ;;  %v6721_v33 = vld [vmem:[%s7791_s4 + $0x60] sm:$0xff] }
  0x39   : > { %v926_v63 = vcombine.low %v917_v37, %v924_v50  ;;  %v826_v0 = vcombine.high %v816_v55, %v816_v55  ;;  %v1139_v31 = vcombine.low %v816_v55, %v824_v56  ;;  %v1148_v1 = vrot.slane %v1138_v20, %v6452_v32  ;;  %5511 = vmatpush1.bf16.msra.mxu0 %v5201_v42  ;;  %v6727_v50 = vld [vmem:[%s7791_s4 + $0x68] sm:$0xff]  ;;  %v5191_v55 = vld [vmem:[%s7792_s5 + $0x60] sm:$0xff] }
  0x3a   : > { %6088 = vmatpush3.bf16.msra.mxu1 %v2167_v40  ;;  %v1141_v7 = vcombine.low %v823_v58, %v825_v60  ;;  %5512 = vmatprep.subr.bf16.mxu0 %v6255_v62  ;;  %v406_v9 = vpack.c.bf16 %v6640_v53, %v393_v38  ;;  %v5929_v13 = vpack.c.bf16 %v6492_v52, %v6492_v52  ;;  %v5187_v52 = vld [vmem:[%s7792_s5 + $0x40] sm:$0xff]  ;;  %v5192_v56 = vld [vmem:[%s7792_s5 + $0x68] sm:$0xff] }
  0x3b   : > { %v940_v10 = vrot.slane %v926_v63, %v6452_v32  ;;  %v1140_v11 = vcombine.low %v826_v0, %v809_v47  ;;  %v1155_v12 = vrot.slane %v1139_v31, %v6452_v32  ;;  %6089 = vmatprep.subr.bf16.mxu1 %v6251_v4  ;;  %v5936_v26 = vcombine.high %v6587_v17, %v6598_v28  ;;  %v6685_v17 = vld [vmem:[%s7791_s4 + $0x50] sm:$0xff] }
  0x3c   : > { %v1169_v14 = vrot.slane %v1141_v7, %v6452_v32  ;;  %v594_v25 = vrot.slane %v406_v9, %v6452_v32  ;;  %v2170_v40 = vpack.c.bf16 %v6656_v6, %v6651_v3  ;;  %v553_v51 = vrot.slane %v5929_v13, %v6452_v32  ;;  %v6744_v63 = vld [vmem:[%s7791_s4 + $0x70] sm:$0xff]  ;;  %v6754_v3 = vld [vmem:[%s7791_s4 + $0x78] sm:$0xff] }
  0x3d   : > { %v941_v15 = vcombine.low %v933_v57, %v940_v10  ;;  %v1162_v2 = vrot.slane %v1140_v11, %v6452_v32  ;;  %v1170_v16 = vcombine.low %v1148_v1, %v1155_v12  ;;  %5513 = vmatpush1.bf16.msra.mxu0 %v5202_v8  ;;  %v6689_v23 = vrot.slane %v5936_v26, %v6452_v32  ;;  %v5193_v6 = vld [vmem:[%s7792_s5 + $0x70] sm:$0xff]  ;;  %v5194_v7 = vld [vmem:[%s7792_s5 + $0x78] sm:$0xff] }
  0x3e   : > { %6090 = vmatpush3.bf16.msra.mxu1 %v2168_v35  ;;  %v602_v18 = vcombine.high %v594_v25, %v594_v25  ;;  %v610_v19 = vrot.slane %v594_v25, %v6452_v32  ;;  %5514 = vmatprep.subr.bf16.mxu0 %v6255_v62  ;;  %v555_v29 = vcombine.high %v553_v51, %v553_v51  ;;  %v395_v35 = vld [vmem:[%s6450_s22 + $0x40] sm:$0xff] }
  0x3f   : > { %6062 = vmatmul.mubr.msk.bf16.gmra.mrb[4].mxu0 %vm1241_vm1, %v941_v15  ;;  %v1171_v27 = vcombine.low %v1162_v2, %v1169_v14  ;;  %v1178_v28 = vrot.slane %v1170_v16, %v6452_v32  ;;  %6091 = vmatprep.subr.bf16.mxu1 %v6251_v4  ;;  %v569_v37 = vrot.slane %v553_v51, %v6452_v32  ;;  %v397_v15 = vld [vmem:[%s6450_s22 + $0x50] sm:$0xff] }
  0x40   : > { %6065 = vmatprep.mubr.msk.bf16.mxu0 %vm6252_vm0, %v6251_v4  ;;  %v624_v41 = vrot.slane %v602_v18, %v6452_v32  ;;  %v632_v42 = vcombine.high %v610_v19, %v610_v19  ;;  %v5203_v43 = vpack.c.bf16 %v5188_v61, %v5187_v52  ;;  %v583_v46 = vrot.slane %v555_v29, %v6452_v32 }
  0x41   : > { %v1185_v44 = vrot.slane %v1171_v27, %v6452_v32  ;;  %v2171_v48 = vpack.c.bf16 %v6695_v22, %v6685_v17  ;;  %v5204_v49 = vpack.c.bf16 %v5190_v39, %v5189_v24  ;;  %v585_v34 = vcombine.high %v569_v37, %v569_v37  ;;  %v6787_v22 = vld [vmem:[%s6769_s14 + $0x18] sm:$0x1f] }
  0x42   : > { %6092 = vmatpush3.bf16.msra.mxu1 %v2169_v59  ;;  %v945_v47 = vcombine.low %v624_v41, %v632_v42  ;;  %5515 = vmatpush1.bf16.msra.mxu0 %v5203_v43  ;;  %v407_v30 = vpack.c.bf16 %v6708_v36, %v395_v35  ;;  %v943_v21 = vcombine.low %v569_v37, %v583_v46 }
  0x43   : > { %v1186_v20 = vcombine.low %v1178_v28, %v1185_v44  ;;  %6093 = vmatprep.subr.bf16.mxu1 %v6251_v4  ;;  %5516 = vmatprep.subr.bf16.mxu0 %v6255_v62  ;;  %v5930_v38 = vpack.c.bf16 %v6640_v53, %v6640_v53  ;;  %v944_v57 = vcombine.low %v585_v34, %v610_v19  ;;  %v2126_v19 = vld [vmem:[%s6769_s14] sm:$0xff]  ;;  %v2127_v28 = vld [vmem:[%s6769_s14 + $0x8] sm:$0x1f] }
  0x44   : > { %v973_v58 = vrot.slane %v945_v47, %v6452_v32  ;;  %v634_v60 = vcombine.high %v624_v41, %v624_v41  ;;  %v642_v59 = vrot.slane %v407_v30, %v6452_v32  ;;  %v959_v0 = vrot.slane %v943_v21, %v6452_v32 }
  0x45   : > { %6082 = vmatmul.mubr.msk.bf16.gmra.mrb[4].mxu1 %vm1241_vm1, %v1186_v20  ;;  %v601_v31 = vrot.slane %v5930_v38, %v6452_v32  ;;  %v2172_v53 = vpack.c.bf16 %v6727_v50, %v6721_v33  ;;  %v5205_v1 = vpack.c.bf16 %v5192_v56, %v5191_v55  ;;  %v966_v8 = vrot.slane %v944_v57, %v6452_v32 }
  0x46   : > { %6094 = vmatpush3.bf16.msra.mxu1 %v2170_v40  ;;  %5517 = vmatpush1.bf16.msra.mxu0 %v5204_v49  ;;  %v650_v9 = vcombine.high %v642_v59, %v642_v59  ;;  %v658_v10 = vrot.slane %v642_v59, %v6452_v32  ;;  %v974_v11 = vcombine.low %v6689_v23, %v959_v0  ;;  %v2128_v23 = vld [vmem:[%s6769_s14 + $0x10] sm:$0xff] }
  0x47   : > { %6095 = vmatprep.subr.bf16.mxu1 %v6251_v4  ;;  %v603_v12 = vcombine.high %v601_v31, %v601_v31  ;;  %v617_v13 = vrot.slane %v601_v31, %v6452_v32  ;;  %5518 = vmatprep.subr.bf16.mxu0 %v6255_v62  ;;  %v975_v14 = vcombine.low %v966_v8, %v973_v58 }
  0x48   : > { %v672_v25 = vrot.slane %v650_v9, %v6452_v32  ;;  %v2173_v26 = vpack.c.bf16 %v6754_v3, %v6744_v63  ;;  %v5206_v40 = vpack.c.bf16 %v5194_v7, %v5193_v6  ;;  %6101 = vmatprep.mubr.msk.bf16.mxu1 %vm6252_vm0, %v6251_v4  ;;  %v982_v2 = vrot.slane %v974_v11, %v6452_v32 }
  0x49   : > { %v631_v16 = vrot.slane %v603_v12, %v6452_v32  ;;  %v633_v51 = vcombine.high %v617_v13, %v617_v13  ;;  %v991_v52 = vcombine.low %v634_v60, %v617_v13  ;;  %v989_v61 = vrot.slane %v975_v14, %v6452_v32  ;;  %v5195_v12 = vld [vmem:[%s7792_s5 + $0x80] sm:$0xff]  ;;  %v5196_v13 = vld [vmem:[%s7792_s5 + $0x88] sm:$0xff] }
  0x4a   : > { %6096 = vmatpush3.bf16.msra.mxu1 %v2171_v48  ;;  %v993_v17 = vcombine.low %v658_v10, %v672_v25  ;;  %v5937_v18 = vcombine.high %v658_v10, %v672_v25  ;;  %5519 = vmatpush1.bf16.msra.mxu0 %v5205_v1  ;;  %v408_v27 = vpack.c.bf16 %v6479_v45, %v397_v15 }
  0x4b   : > { %v992_v24 = vcombine.low %v631_v16, %v633_v51  ;;  %v1001_v39 = vrot.slane %v991_v52, %v6452_v32  ;;  %6097 = vmatprep.subr.bf16.mxu1 %v6251_v4  ;;  %5520 = vmatprep.subr.bf16.mxu0 %v6255_v62  ;;  %v990_v29 = vcombine.low %v982_v2, %v989_v61  ;;  %v5198_v52 = vld [vmem:[%s7792_s5 + $0x98] sm:$0xff]  ;;  %v5131_v61 = vld [vmem:[%s6820_s17] sm:$0xff] }
  0x4c   : > { %v1015_v35 = vrot.slane %v993_v17, %v6452_v32  ;;  %v1022_v37 = vrot.slane %v5937_v18, %v6452_v32  ;;  %v5931_v41 = vpack.c.bf16 %v6708_v36, %v6708_v36  ;;  %v690_v43 = vrot.slane %v408_v27, %v6452_v32  ;;  %v5132_v17 = vld [vmem:[%s6820_s17 + $0x8] sm:$0xff]  ;;  %v5134_v27 = vld [vmem:[%s6820_s17 + $0x18] sm:$0xf] }
  0x4d   : > { %v1008_v42 = vrot.slane %v992_v24, %v6452_v32  ;;  %v2142_v44 = vpack.c.bf16 %v2127_v28, %v2126_v19  ;;  %v2143_v46 = vpack.c.bf16 %v6787_v22, %v2128_v23  ;;  %6066 = vmatmul.mubr.msk.bf16.gmra.mrb[8].mxu0 %vm1241_vm1, %v990_v29  ;;  %v5947_v49 = vpack.c.bf16 %v2127_v28, %v2127_v28  ;;  %v5135_v28 = vld [vmem:[%s6820_s17 + $0x20] sm:$0xff] }
  0x4e   : > { %v1024_v45 = vcombine.low %v1015_v35, %v1022_v37  ;;  %6098 = vmatpush3.bf16.msra.mxu1 %v2172_v53  ;;  %v649_v48 = vrot.slane %v5931_v41, %v6452_v32  ;;  %6069 = vmatprep.mubr.msk.bf16.mxu0 %vm6252_vm0, %v6251_v4  ;;  %v698_v36 = vcombine.high %v690_v43, %v690_v43 }
  0x4f   : > { %v1023_v33 = vcombine.low %v1001_v39, %v1008_v42  ;;  %6099 = vmatprep.subr.bf16.mxu1 %v6251_v4  ;;  %v706_v34 = vrot.slane %v690_v43, %v6452_v32  ;;  %5521 = vmatpush1.bf16.msra.mxu0 %v5206_v40  ;;  %v2195_v55 = vrot.slane %v2142_v44, %v6452_v32  ;;  %v5197_v40 = vld [vmem:[%s7792_s5 + $0x90] sm:$0xff]  ;;  %v5136_v42 = vld [vmem:[%s6820_s17 + $0x28] sm:$0xff]  ;;  %v2130_v43 = vld [vmem:[%s6769_s14 + $0x20] sm:$0xff] }
  0x50   : > { %v1038_v47 = vrot.slane %v1024_v45, %v6452_v32  ;;  %v651_v30 = vcombine.high %v649_v48, %v649_v48  ;;  %v665_v50 = vrot.slane %v649_v48, %v6452_v32  ;;  %v720_v20 = vrot.slane %v698_v36, %v6452_v32  ;;  %5522 = vmatprep.subr.bf16.mxu0 %v6255_v62  ;;  %v5133_v39 = vld [vmem:[%s6820_s17 + $0x10] sm:$0xf]  ;;  %v6857_v44 = vld [vmem:[%s6769_s14 + $0x28] sm:$0x1f] }
  0x51   : > { %v1031_v56 = vrot.slane %v1023_v33, %v6452_v32  ;;  %v728_v21 = vcombine.high %v706_v34, %v706_v34  ;;  %v2202_v38 = vrot.slane %v5947_v49, %v6452_v32  ;;  %v2203_v60 = vcombine.high %v2195_v55, %v2195_v55 }
  0x52   : > { %6100 = vmatpush3.bf16.msra.mxu1 %v2173_v26  ;;  %v679_v57 = vrot.slane %v651_v30, %v6452_v32  ;;  %v681_v58 = vcombine.high %v665_v50, %v665_v50  ;;  %v2211_v59 = vrot.slane %v2195_v55, %v6452_v32  ;;  %v730_v0 = vcombine.high %v720_v20, %v720_v20 }
  0x53   : > { %v1039_v63 = vcombine.low %v1031_v56, %v1038_v47  ;;  %v1042_v31 = vcombine.low %v720_v20, %v728_v21  ;;  %v2204_v53 = vcombine.high %v2202_v38, %v2202_v38  ;;  %v2218_v6 = vrot.slane %v2202_v38, %v6452_v32 }
  0x54   : > { %v1040_v1 = vcombine.low %v665_v50, %v679_v57  ;;  %v1041_v3 = vcombine.low %v681_v58, %v706_v34  ;;  %v2225_v7 = vrot.slane %v2203_v60, %v6452_v32  ;;  %v1043_v8 = vcombine.low %v730_v0, %v6515_v5 }
  0x55   : > { %v1064_v9 = vrot.slane %v1042_v31, %v6452_v32  ;;  %v2232_v10 = vrot.slane %v2204_v53, %v6452_v32  ;;  %v2243_v11 = vrot.slane %v2143_v46, %v6452_v32  ;;  %6070 = vmatmul.mubr.msk.bf16.gmra.mrb[12].mxu0 %vm1241_vm1, %v1039_v63  ;;  %v2234_v25 = vcombine.high %v2218_v6, %v2218_v6 }
  0x56   : > { %v1050_v5 = vrot.slane %v1040_v1, %v6452_v32  ;;  %v1057_v14 = vrot.slane %v1041_v3, %v6452_v32  ;;  %v2777_v26 = vcombine.low %v2211_v59, %v2225_v7  ;;  %6073 = vmatprep.mubr.msk.bf16.mxu0 %vm6252_vm0, %v6251_v4  ;;  %v1071_v15 = vrot.slane %v1043_v8, %v6452_v32 }
  0x57   : > { %v2251_v2 = vcombine.high %v2243_v11, %v2243_v11  ;;  %v2259_v16 = vrot.slane %v2243_v11, %v6452_v32  ;;  %v5983_v51 = vcombine.high %v2211_v59, %v2225_v7  ;;  %v2779_v19 = vcombine.low %v2218_v6, %v2232_v10 }
  0x58   : > { %v1072_v18 = vcombine.low %v1050_v5, %v1057_v14  ;;  %v2787_v23 = vrot.slane %v2777_v26, %v6452_v32  ;;  %v5207_v24 = vpack.c.bf16 %v5196_v13, %v5195_v12  ;;  %v1073_v29 = vcombine.low %v1064_v9, %v1071_v15 }
  0x59   : > { %v2273_v35 = vrot.slane %v2251_v2, %v6452_v32  ;;  %v2586_v37 = vunpack.i.h.s16 %v2259_v16  ;;  %v5955_v41 = vpack.i.b16 %v2259_v16, %v2234_v25  ;;  %v2794_v45 = vrot.slane %v5983_v51, %v6452_v32 }
  0x5a   : > { %v1080_v46 = vrot.slane %v1072_v18, %v6452_v32  ;;  %v2801_v48 = vrot.slane %v2779_v19, %v6452_v32  ;;  %5523 = vmatpush1.bf16.msra.mxu0 %v5207_v24  ;;  %v5208_v49 = vpack.c.bf16 %v5198_v52, %v5197_v40  ;;  %v1087_v33 = vrot.slane %v1073_v29, %v6452_v32  ;;  %v5137_v52 = vld [vmem:[%s6820_s17 + $0x30] sm:$0xf]  ;;  %v5139_v24 = vld [vmem:[%s6820_s17 + $0x40] sm:$0xff] }
  0x5b   : > { %v5956_v36 = vpack.i.b16 %v2273_v35, %v2586_v37  ;;  %5524 = vmatprep.subr.bf16.mxu0 %v6255_v62  ;;  %v5988_v34 = vpack.c.bf16 %v5132_v17, %v5131_v61  ;;  %v5989_v47 = vpack.c.bf16 %v5134_v27, %v5133_v39  ;;  %v2809_v30 = vcombine.low %v2787_v23, %v2794_v45  ;;  %v5138_v61 = vld [vmem:[%s6820_s17 + $0x38] sm:$0xf]  ;;  %v2132_v37 = vld [vmem:[%s6769_s14 + $0x30] sm:$0xff] }
  0x5c   : > { %v5990_v50 = vpack.c.bf16 %v5136_v42, %v5135_v28  ;;  %v2144_v55 = vpack.c.bf16 %v6857_v44, %v2130_v43  ;;  %v5948_v56 = vpack.c.bf16 %v6787_v22, %v6787_v22  ;;  %v1088_v20 = vcombine.low %v1080_v46, %v1087_v33 }
  0x5d   : > { %v2780_v21 = vcombine.low %v5955_v41, %v5956_v36  ;;  %v5239_v38 = vrot.slane %v5988_v34, %v6496_v54  ;;  %v5246_v57 = vrot.slane %v5989_v47, %v6496_v54  ;;  %v2817_v58 = vrot.slane %v2809_v30, %v6452_v32  ;;  %v2133_v41 = vld [vmem:[%s6769_s14 + $0x38] sm:$0x1f]  ;;  %v5141_v30 = vld [vmem:[%s6820_s17 + $0x50] sm:$0xf] }
  0x5e   : > { %5525 = vmatpush1.bf16.msra.mxu0 %v5208_v49  ;;  %v6871_v62 = vrot.slane %v5990_v50, %v6496_v54  ;;  %v2250_v60 = vrot.slane %v5948_v56, %v6452_v32  ;;  %v2281_v59 = vcombine.high %v2259_v16, %v2259_v16  ;;  %v2283_v0 = vcombine.high %v2273_v35, %v2273_v35  ;;  %v5142_v50 = vld [vmem:[%s6820_s17 + $0x58] sm:$0xf] }
  0x5f   : > { %6074 = vmatmul.mubr.msk.bf16.gmra.mrb[16].mxu0 %vm1241_vm1, %v1088_v20  ;;  %v2808_v63 = vrot.slane %v2780_v21, %v6452_v32  ;;  %v5247_v22 = vcombine.high %v5239_v38, %v5239_v38  ;;  %v2291_v31 = vrot.slane %v2144_v55, %v6452_v32  ;;  %v2588_v6 = vunpack.i.h.s16 %v2273_v35  ;;  %v5140_v35 = vld [vmem:[%s6820_s17 + $0x48] sm:$0xff] }
  0x60   : > { %v5369_v53 = vcombine.low %v5246_v57, %v6871_v62  ;;  %v2252_v1 = vcombine.high %v2250_v60, %v2250_v60  ;;  %v2266_v3 = vrot.slane %v2250_v60, %v6452_v32  ;;  %v2590_v5 = vunpack.i.h.s16 %v2281_v59 }
  0x61   : > { %v2810_v7 = vcombine.low %v2801_v48, %v2808_v63  ;;  %v5368_v8 = vcombine.low %v5239_v38, %v5247_v22  ;;  %v2299_v9 = vcombine.high %v2291_v31, %v2291_v31  ;;  %v2307_v10 = vrot.slane %v2291_v31, %v6452_v32 }
  0x62   : > { %v5383_v11 = vrot.slane %v5369_v53, %v6496_v54  ;;  %v2280_v12 = vrot.slane %v2252_v1, %v6452_v32  ;;  %v2282_v13 = vcombine.high %v2266_v3, %v2266_v3  ;;  %v2592_v15 = vunpack.i.h.s16 %v2283_v0 }
  0x63   : > { %v2824_v14 = vrot.slane %v2810_v7, %v6452_v32  ;;  %v5376_v25 = vrot.slane %v5368_v8, %v6496_v54  ;;  %v6885_v26 = vrot.slane %v2299_v9, %v6452_v32  ;;  %v2329_v40 = vcombine.high %v2307_v10, %v2307_v10 }
  0x64   : > { %v2594_v2 = vunpack.i.h.s16 %v2266_v3  ;;  %v2596_v16 = vunpack.i.h.s16 %v2280_v12  ;;  %v5957_v51 = vpack.i.b16 %v2281_v59, %v2588_v6  ;;  %v5958_v23 = vpack.i.b16 %v2283_v0, %v2590_v5 }
  0x65   : > { %v2825_v17 = vcombine.low %v2817_v58, %v2824_v14  ;;  %v5384_v18 = vcombine.low %v5376_v25, %v5383_v11  ;;  %v5385_v19 = vcombine.high %v5376_v25, %v5383_v11  ;;  %v5959_v39 = vpack.i.b16 %v2266_v3, %v2592_v15 }
  0x66   : > { %v5960_v27 = vpack.i.b16 %v2280_v12, %v2594_v2  ;;  %v5961_v28 = vpack.i.b16 %v2282_v13, %v2596_v16  ;;  %v2829_v29 = vcombine.low %v6885_v26, %v2329_v40  ;;  %v2826_v42 = vcombine.low %v5957_v51, %v5958_v23  ;;  %v5143_v2 = vld [vmem:[%s6820_s17 + $0x60] sm:$0xff]  ;;  %v5144_v16 = vld [vmem:[%s6820_s17 + $0x68] sm:$0xff]  ;;  %v5145_v51 = vld [vmem:[%s6820_s17 + $0x70] sm:$0xf] }
  0x67   : > { %6102 = vmatmul.mubr.bf16.vlgmr.msra.gmra.mrb[8].mxu1 %v2825_v17  ;;  %6004 = vmatprep.mubr.msk.bf16.mxu0 %vm2052_vm2, %v5385_v19  ;;  %v5991_v43 = vpack.c.bf16 %v5138_v61, %v5137_v52  ;;  %v5264_v46 = vcombine.high %v6871_v62, %v6871_v62  ;;  %v5992_v34 = vpack.c.bf16 %v5140_v35, %v5139_v24  ;;  %v2134_v23 = vld [vmem:[%s6769_s14 + $0x40] sm:$0xff]  ;;  %v2135_v24 = vld [vmem:[%s6769_s14 + $0x48] sm:$0x1f] }
  0x68   : > { %6105 = vmatprep.mubr.msk.bf16.mxu1 %vm6252_vm0, %v6251_v4  ;;  %v2827_v45 = vcombine.low %v5959_v39, %v5960_v27  ;;  %v2828_v48 = vcombine.low %v5961_v28, %v2307_v10  ;;  %v2857_v49 = vrot.slane %v2829_v29, %v6452_v32  ;;  %5539 = vmatmul.mubr.bf16.vlgmr.msra.gmra.mrb[20].mxu0 %v5384_v18  ;;  %v5146_v18 = vld [vmem:[%s6820_s17 + $0x78] sm:$0xf] }
  0x69   : > { %v2836_v33 = vrot.slane %v2826_v42, %v6452_v32  ;;  %v5263_v36 = vrot.slane %v5991_v43, %v6496_v54  ;;  %v2145_v47 = vpack.c.bf16 %v2133_v41, %v2132_v37  ;;  %v5949_v20 = vpack.c.bf16 %v6857_v44, %v6857_v44 }
  0x6a   : > { %v2843_v55 = vrot.slane %v2827_v45, %v6452_v32  ;;  %v2850_v56 = vrot.slane %v2828_v48, %v6452_v32  ;;  %v2331_v21 = vcombine.high %v6885_v26, %v6885_v26  ;;  %v5273_v38 = vrot.slane %v5992_v34, %v6496_v54 }
  0x6b   : > { %v5386_v57 = vcombine.low %v5264_v46, %v5263_v36  ;;  %v5950_v58 = vpack.c.bf16 %v2133_v41, %v2133_v41  ;;  %v2339_v62 = vrot.slane %v2145_v47, %v6452_v32  ;;  %v2298_v63 = vrot.slane %v5949_v20, %v6452_v32 }
  0x6c   : > { %v2858_v60 = vcombine.low %v2836_v33, %v2843_v55  ;;  %v2859_v59 = vcombine.low %v2850_v56, %v2857_v49  ;;  %v5993_v22 = vpack.c.bf16 %v5142_v50, %v5141_v30  ;;  %v5281_v0 = vcombine.high %v5273_v38, %v5273_v38 }
  0x6d   : > { %v5394_v31 = vrot.slane %v5386_v57, %v6496_v54  ;;  %v2346_v53 = vrot.slane %v5950_v58, %v6452_v32  ;;  %v2347_v44 = vcombine.high %v2339_v62, %v2339_v62  ;;  %v2300_v6 = vcombine.high %v2298_v63, %v2298_v63 }
  0x6e   : > { %v2866_v1 = vrot.slane %v2858_v60, %v6452_v32  ;;  %v2873_v3 = vrot.slane %v2859_v59, %v6452_v32  ;;  %v2314_v7 = vrot.slane %v2298_v63, %v6452_v32  ;;  %v5387_v8 = vcombine.low %v5273_v38, %v5281_v0 }
  0x6f   : > { %v2355_v9 = vrot.slane %v2339_v62, %v6452_v32  ;;  %v6920_v10 = vrot.slane %v2346_v53, %v6452_v32  ;;  %v2369_v11 = vrot.slane %v2347_v44, %v6452_v32  ;;  %v2328_v13 = vrot.slane %v2300_v6, %v6452_v32 }
  0x70   : > { %v2874_v12 = vcombine.low %v2866_v1, %v2873_v3  ;;  %v2330_v5 = vcombine.high %v2314_v7, %v2314_v7  ;;  %v2875_v14 = vcombine.low %v2331_v21, %v2314_v7  ;;  %v5401_v25 = vrot.slane %v5387_v8, %v6496_v54  ;;  %v5149_v7 = vld [vmem:[%s6820_s17 + $0x90] sm:$0xf]  ;;  %v5150_v8 = vld [vmem:[%s6820_s17 + $0x98] sm:$0xf] }
  0x71   : > { %v2377_v26 = vcombine.high %v2355_v9, %v2355_v9  ;;  %v2379_v40 = vcombine.high %v2369_v11, %v2369_v11  ;;  %v2612_v15 = vunpack.i.h.s16 %v2355_v9  ;;  %v2614_v52 = vunpack.i.h.s16 %v2369_v11 }
  0x72   : > { %6106 = vmatmul.mubr.bf16.gmra.mrb[12].mxu1 %v2874_v12  ;;  %v5962_v61 = vpack.i.b16 %v2355_v9, %v2330_v5  ;;  %v2885_v17 = vrot.slane %v2875_v14, %v6452_v32  ;;  %v5280_v19 = vrot.slane %v5993_v22, %v6496_v54  ;;  %v5403_v39 = vcombine.high %v5394_v31, %v5401_v25 }
  0x73   : > { %6109 = vmatprep.mubr.msk.bf16.mxu1 %vm6252_vm0, %v6251_v4  ;;  %v2616_v27 = vunpack.i.h.s16 %v2377_v26  ;;  %v2618_v28 = vunpack.i.h.s16 %v2379_v40  ;;  %v5963_v29 = vpack.i.b16 %v2369_v11, %v2612_v15  ;;  %v5964_v35 = vpack.i.b16 %v2377_v26, %v2614_v52  ;;  %v5152_v26 = vld [vmem:[%s6820_s17 + $0xa8] sm:$0xff] }
  0x74   : > { %v2876_v37 = vcombine.low %v2328_v13, %v5962_v61  ;;  %v5402_v41 = vcombine.low %v5394_v31, %v5401_v25  ;;  %v5994_v42 = vpack.c.bf16 %v5144_v16, %v5143_v2  ;;  %6005 = vmatprep.mubr.msk.bf16.mxu0 %vm2052_vm2, %v5403_v39  ;;  %v5995_v45 = vpack.c.bf16 %v5146_v18, %v5145_v51  ;;  %v5147_v31 = vld [vmem:[%s6820_s17 + $0x80] sm:$0xff] }
  0x75   : > { %v5965_v43 = vpack.i.b16 %v2379_v40, %v2616_v27  ;;  %v5966_v46 = vpack.i.b16 %v6920_v10, %v2618_v28  ;;  %v2146_v48 = vpack.c.bf16 %v2135_v24, %v2134_v23  ;;  %v2877_v49 = vcombine.low %v5963_v29, %v5964_v35  ;;  %v5151_v25 = vld [vmem:[%s6820_s17 + $0xa0] sm:$0xff]  ;;  %v2137_v23 = vld [vmem:[%s6769_s14 + $0x58] sm:$0x1f]  ;;  %v6972_v35 = vld [vmem:[%s6769_s14 + $0x68] sm:$0x1f] }
  0x76   : > { %v2892_v33 = vrot.slane %v2876_v37, %v6452_v32  ;;  %5547 = vmatmul.mubr.bf16.gmra.mrb[24].mxu0 %v5402_v41  ;;  %v5290_v36 = vrot.slane %v5994_v42, %v6496_v54  ;;  %v2348_v34 = vcombine.high %v2346_v53, %v2346_v53  ;;  %v5297_v30 = vrot.slane %v5995_v45, %v6496_v54  ;;  %v5148_v53 = vld [vmem:[%s6820_s17 + $0x88] sm:$0xff]  ;;  %v2138_v29 = vld [vmem:[%s6769_s14 + $0x60] sm:$0xff] }
  0x77   : > { %v2878_v47 = vcombine.low %v5965_v43, %v5966_v46  ;;  %v2378_v50 = vcombine.high %v6920_v10, %v6920_v10  ;;  %v5951_v55 = vpack.c.bf16 %v2135_v24, %v2135_v24  ;;  %v2899_v56 = vrot.slane %v2877_v49, %v6452_v32  ;;  %v5153_v49 = vld [vmem:[%s6820_s17 + $0xb0] sm:$0xf] }
  0x78   : > { %v2907_v20 = vcombine.low %v2885_v17, %v2892_v33  ;;  %v5298_v21 = vcombine.high %v5290_v36, %v5290_v36  ;;  %v5404_v38 = vcombine.low %v5280_v19, %v5290_v36  ;;  %v2376_v58 = vrot.slane %v2348_v34, %v6452_v32  ;;  %v2136_v19 = vld [vmem:[%s6769_s14 + $0x50] sm:$0xff]  ;;  %v5154_v33 = vld [vmem:[%s6820_s17 + $0xb8] sm:$0xf] }
  0x79   : > { %v2906_v57 = vrot.slane %v2878_v47, %v6452_v32  ;;  %v2387_v62 = vrot.slane %v2146_v48, %v6452_v32  ;;  %v2394_v60 = vrot.slane %v5951_v55, %v6452_v32  ;;  %v2620_v0 = vunpack.i.h.s16 %v6920_v10 }
  0x7a   : > { %v2915_v59 = vrot.slane %v2907_v20, %v6452_v32  ;;  %v5405_v63 = vcombine.low %v5298_v21, %v5297_v30  ;;  %v5412_v22 = vrot.slane %v5404_v38, %v6496_v54  ;;  %v2622_v12 = vunpack.i.h.s16 %v2376_v58 }
  0x7b   : > { %v2908_v44 = vcombine.low %v2899_v56, %v2906_v57  ;;  %v2395_v1 = vcombine.high %v2387_v62, %v2387_v62  ;;  %v2396_v3 = vcombine.high %v2394_v60, %v2394_v60  ;;  %v2403_v6 = vrot.slane %v2387_v62, %v6452_v32 }
  0x7c   : > { %v5419_v9 = vrot.slane %v5405_v63, %v6496_v54  ;;  %v6957_v11 = vrot.slane %v2394_v60, %v6452_v32  ;;  %v5967_v13 = vpack.i.b16 %v2376_v58, %v2620_v0  ;;  %v5996_v40 = vpack.c.bf16 %v5148_v53, %v5147_v31 }
  0x7d   : > { %v2922_v10 = vrot.slane %v2908_v44, %v6452_v32  ;;  %v2417_v5 = vrot.slane %v2395_v1, %v6452_v32  ;;  %v2424_v14 = vrot.slane %v2396_v3, %v6452_v32  ;;  %v5968_v2 = vpack.i.b16 %v2378_v50, %v2622_v12 }
  0x7e   : > { %v5421_v15 = vcombine.high %v5412_v22, %v5419_v9  ;;  %v5420_v16 = vcombine.low %v5412_v22, %v5419_v9  ;;  %v5997_v51 = vpack.c.bf16 %v5150_v8, %v5149_v7  ;;  %v5307_v39 = vrot.slane %v5996_v40, %v6496_v54 }
  0x7f   : > { %v2923_v52 = vcombine.low %v2915_v59, %v2922_v10  ;;  %v2925_v61 = vcombine.low %v2403_v6, %v2417_v5  ;;  %v5984_v17 = vcombine.high %v2403_v6, %v2417_v5  ;;  %v2927_v18 = vcombine.low %v6957_v11, %v2424_v14  ;;  %v5155_v14 = vld [vmem:[%s6820_s17 + $0xc0] sm:$0xff] }
  0x80   : > { %6006 = vmatprep.mubr.msk.bf16.mxu0 %vm2052_vm2, %v5421_v15  ;;  %v2924_v24 = vcombine.low %v5967_v13, %v5968_v2  ;;  %v5314_v27 = vrot.slane %v5997_v51, %v6496_v54  ;;  %v5998_v28 = vpack.c.bf16 %v5152_v26, %v5151_v25  ;;  %v5315_v46 = vcombine.high %v5307_v39, %v5307_v39  ;;  %v5156_v25 = vld [vmem:[%s6820_s17 + $0xc8] sm:$0xff]  ;;  %v7011_v51 = vld [vmem:[%s6769_s14 + $0x78] sm:$0x1f] }
  0x81   : > { %6110 = vmatmul.mubr.bf16.gmra.mrb[16].mxu1 %v2923_v52  ;;  %v2941_v37 = vrot.slane %v2925_v61, %v6452_v32  ;;  %v2948_v41 = vrot.slane %v5984_v17, %v6452_v32  ;;  %v2955_v42 = vrot.slane %v2927_v18, %v6452_v32  ;;  %5555 = vmatmul.mubr.bf16.gmra.mrb[28].mxu0 %v5420_v16  ;;  %v2140_v16 = vld [vmem:[%s6769_s14 + $0x70] sm:$0xff]  ;;  %s5829_s14 = sshll.u32 %s364_s16, 4  ;;  %s7746_s14 = int_to_ptr.vmem [resolvable:$true] %s5829_s14 }
  0x82   : > { %6113 = vmatprep.mubr.msk.bf16.mxu1 %vm6252_vm0, %v6251_v4  ;;  %v2934_v43 = vrot.slane %v2924_v24, %v6452_v32  ;;  %v5324_v45 = vrot.slane %v5998_v28, %v6496_v54  ;;  %v2147_v48 = vpack.c.bf16 %v2137_v23, %v2136_v19  ;;  %v2148_v34 = vpack.c.bf16 %v6972_v35, %v2138_v29  ;;  %s6187_s21 = scalar_lea.vmem %s7746_s14, 128 }
  0x83   : > { %v2957_v36 = vcombine.low %v2948_v41, %v2955_v42  ;;  %v2426_v47 = vcombine.high %v6957_v11, %v6957_v11  ;;  %v5952_v30 = vpack.c.bf16 %v2137_v23, %v2137_v23  ;;  %v5422_v55 = vcombine.low %v5307_v39, %v5315_v46  ;;  %p6188_p11 = scmp.ne.s32.totalorder %s7746_s14, %s6187_s21 }
  0x84   : > { %v2956_v50 = vcombine.low %v2934_v43, %v2941_v37  ;;  %v5423_v56 = vcombine.low %v5314_v27, %v5324_v45  ;;  %v2435_v20 = vrot.slane %v2147_v48, %v6452_v32  ;;  %v6990_v57 = vrot.slane %v2148_v34, %v6452_v32  ;;  %v5158_v34 = vld [vmem:[%s6820_s17 + $0xd8] sm:$0xf] }
  0x85   : > { %v2971_v21 = vrot.slane %v2957_v36, %v6452_v32  ;;  %v2442_v38 = vrot.slane %v5952_v30, %v6452_v32  ;;  %v5999_v58 = vpack.c.bf16 %v5154_v33, %v5153_v49  ;;  %v5430_v60 = vrot.slane %v5422_v55, %v6496_v54  ;;  %v5157_v36 = vld [vmem:[%s6820_s17 + $0xd0] sm:$0xf]  ;;  %p6189_p12 = pnand %p6188_p11, %p6347_p5 }
  0x86   : > { %v2964_v62 = vrot.slane %v2956_v50, %v6452_v32  ;;  %v5437_v59 = vrot.slane %v5423_v56, %v6496_v54  ;;  %v2443_v63 = vcombine.high %v2435_v20, %v2435_v20  ;;  %v2451_v0 = vrot.slane %v2435_v20, %v6452_v32 }
  0x87   : > { %v2444_v22 = vcombine.high %v2442_v38, %v2442_v38  ;;  %v2458_v31 = vrot.slane %v2442_v38, %v6452_v32  ;;  %v6999_v53 = vrot.slane %v6990_v57, %v6452_v32  ;;  %v5331_v2 = vrot.slane %v5999_v58, %v6496_v54  ;;  %p6190_p13 = pneg %p6189_p12 }
  0x88   : > { %v2972_v44 = vcombine.low %v2964_v62, %v2971_v21  ;;  %v5439_v1 = vcombine.high %v5430_v60, %v5437_v59  ;;  %v2465_v3 = vrot.slane %v2443_v63, %v6452_v32  ;;  %v5438_v6 = vcombine.low %v5430_v60, %v5437_v59 }
  0x89   : > { %v2472_v7 = vrot.slane %v2444_v22, %v6452_v32  ;;  %v2473_v8 = vcombine.high %v2451_v0, %v2451_v0  ;;  %v2474_v9 = vcombine.high %v2458_v31, %v2458_v31  ;;  %v2638_v11 = vunpack.i.h.s16 %v2451_v0 }
  0x8a   : > { %6114 = vmatmul.mubr.bf16.gmra.mrb[20].mxu1 %v2972_v44  ;;  %6007 = vmatprep.mubr.msk.bf16.mxu0 %vm2052_vm2, %v5439_v1  ;;  %v2475_v12 = vcombine.high %v2465_v3, %v2465_v3  ;;  %v2640_v13 = vunpack.i.h.s16 %v2465_v3  ;;  %v2646_v10 = vunpack.i.h.s16 %v2458_v31  ;;  %v5969_v5 = vpack.i.b16 %v2451_v0, %v2426_v47 }
  0x8b   : > { %6117 = vmatprep.mubr.msk.bf16.mxu1 %vm6252_vm0, %v6251_v4  ;;  %v2642_v26 = vunpack.i.h.s16 %v2473_v8  ;;  %v2648_v40 = vunpack.i.h.s16 %v2472_v7  ;;  %v5970_v15 = vpack.i.b16 %v2465_v3, %v2638_v11  ;;  %5563 = vmatmul.mubr.bf16.gmra.mrb[32].mxu0 %v5438_v6  ;;  %v5332_v18 = vcombine.high %v5324_v45, %v5324_v45 }
  0x8c   : > { %v2644_v52 = vunpack.i.h.s16 %v2475_v12  ;;  %v5971_v61 = vpack.i.b16 %v2473_v8, %v2640_v13  ;;  %v5974_v17 = vpack.i.b16 %v2472_v7, %v2646_v10  ;;  %v6000_v39 = vpack.c.bf16 %v5156_v25, %v5155_v14  ;;  %v5159_v7 = vld [vmem:[%s6820_s17 + $0xe0] sm:$0xff]  ;;  %v5160_v8 = vld [vmem:[%s6820_s17 + $0xe8] sm:$0xff]  ;;  %v5162_v14 = vld [vmem:[%s6820_s17 + $0xf8] sm:$0xf] }
  0x8d   : > { %v5972_v19 = vpack.i.b16 %v2475_v12, %v2642_v26  ;;  %v5975_v23 = vpack.i.b16 %v2474_v9, %v2648_v40  ;;  %v2973_v24 = vcombine.low %v5969_v5, %v5970_v15  ;;  %v5440_v28 = vcombine.low %v5332_v18, %v5331_v2  ;;  %v5161_v5 = vld [vmem:[%s6820_s17 + $0xf0] sm:$0xf]  ;;  %s7744_s17 = scalar_lea.hbm %s7796_s9, %s6011_s29 }
  0x8e   : > { %v5973_v27 = vpack.i.b16 %v2458_v31, %v2644_v52  ;;  %v2149_v29 = vpack.c.bf16 %v7011_v51, %v2140_v16  ;;  %v5953_v37 = vpack.c.bf16 %v6972_v35, %v6972_v35  ;;  %v5341_v46 = vrot.slane %v6000_v39, %v6496_v54 }
  0x8f   : > { %v2974_v41 = vcombine.low %v5971_v61, %v5972_v19  ;;  %v2976_v42 = vcombine.low %v5975_v23, %v6999_v53  ;;  %v2983_v43 = vrot.slane %v2973_v24, %v6452_v32  ;;  %v5448_v48 = vrot.slane %v5440_v28, %v6496_v54 }
  0x90   : > { %v2975_v45 = vcombine.low %v5973_v27, %v5974_v17  ;;  %v2490_v49 = vrot.slane %v5953_v37, %v6452_v32  ;;  %v2491_v33 = vcombine.high %v6990_v57, %v6990_v57  ;;  %v5349_v30 = vcombine.high %v5341_v46, %v5341_v46 }
  0x91   : > { %v2990_v47 = vrot.slane %v2974_v41, %v6452_v32  ;;  %v3004_v35 = vrot.slane %v2976_v42, %v6452_v32  ;;  %v2521_v50 = vcombine.high %v6999_v53, %v6999_v53  ;;  %v2531_v58 = vrot.slane %v2149_v29, %v6452_v32 }
  0x92   : > { %v2997_v55 = vrot.slane %v2975_v45, %v6452_v32  ;;  %v2492_v56 = vcombine.high %v2490_v49, %v2490_v49  ;;  %v2506_v20 = vrot.slane %v2490_v49, %v6452_v32  ;;  %v2513_v21 = vrot.slane %v2491_v33, %v6452_v32 }
  0x93   : > { %v3005_v38 = vcombine.low %v2983_v43, %v2990_v47  ;;  %v5441_v57 = vcombine.low %v5341_v46, %v5349_v30  ;;  %v6001_v62 = vpack.c.bf16 %v5158_v34, %v5157_v36  ;;  %v2539_v53 = vcombine.high %v2531_v58, %v2531_v58 }
  0x94   : > { %v3006_v60 = vcombine.low %v2997_v55, %v3004_v35  ;;  %v2520_v59 = vrot.slane %v2492_v56, %v6452_v32  ;;  %v2522_v63 = vcombine.high %v2506_v20, %v2506_v20  ;;  %v2523_v22 = vcombine.high %v2513_v21, %v2513_v21 }
  0x95   : > { %v3013_v0 = vrot.slane %v3005_v38, %v6452_v32  ;;  %v5455_v31 = vrot.slane %v5441_v57, %v6496_v54  ;;  %v2547_v44 = vrot.slane %v2531_v58, %v6452_v32  ;;  %v3022_v3 = vcombine.low %v2513_v21, %v2521_v50 }
  0x96   : > { %v3020_v1 = vrot.slane %v3006_v60, %v6452_v32  ;;  %v3023_v6 = vcombine.low %v2523_v22, %v2506_v20  ;;  %v5348_v9 = vrot.slane %v6001_v62, %v6496_v54  ;;  %v2561_v12 = vrot.slane %v2539_v53, %v6452_v32 }
  0x97   : > { %v5457_v11 = vcombine.high %v5448_v48, %v5455_v31  ;;  %v2569_v13 = vcombine.high %v2547_v44, %v2547_v44  ;;  %v2664_v10 = vunpack.i.h.s16 %v2547_v44  ;;  %v5976_v26 = vpack.i.b16 %v2547_v44, %v2522_v63 }
  0x98   : > { %v3021_v25 = vcombine.low %v3013_v0, %v3020_v1  ;;  %v3032_v40 = vrot.slane %v3022_v3, %v6452_v32  ;;  %v3039_v15 = vrot.slane %v3023_v6, %v6452_v32  ;;  %v2666_v2 = vunpack.i.h.s16 %v2561_v12  ;;  %v5946_v1 = vld [vmem:[%s7794_s7] ss:$0 sm:$0xff] }
  0x99   : > { %6008 = vmatprep.mubr.msk.bf16.mxu0 %vm2052_vm2, %v5457_v11  ;;  %v5977_v16 = vpack.i.b16 %v2561_v12, %v2664_v10  ;;  %v5456_v52 = vcombine.low %v5448_v48, %v5455_v31  ;;  %v6002_v61 = vpack.c.bf16 %v5160_v8, %v5159_v7  ;;  %v3024_v17 = vcombine.low %v2520_v59, %v5976_v26  ;;  %v5926_v8 = vld [vmem:[%s7793_s6] ss:$0 sm:$0xff] }
  0x9a   : > { %6118 = vmatmul.mubr.bf16.gmra.mrb[24].mxu1 %v3021_v25  ;;  %v6003_v18 = vpack.c.bf16 %v5162_v14, %v5161_v5  ;;  %v5954_v19 = vpack.c.bf16 %v7011_v51, %v7011_v51  ;;  %v5978_v23 = vpack.i.b16 %v2569_v13, %v2666_v2  ;;  %v2571_v39 = vcombine.high %v2561_v12, %v2561_v12 }
  0x9b   : > { %6121 = vmatprep.mubr.msk.bf16.mxu1 %vm6252_vm0, %v6251_v4  ;;  %5571 = vmatmul.mubr.bf16.gmra.mrb[36].mxu0 %v5456_v52  ;;  %v5358_v24 = vrot.slane %v6002_v61, %v6496_v54  ;;  %v2668_v27 = vunpack.i.h.s16 %v2569_v13  ;;  %v3046_v28 = vrot.slane %v3024_v17, %v6452_v32  ;;  %v3054_v29 = vcombine.low %v3032_v40, %v3039_v15 }
  0x9c   : > { %v5365_v37 = vrot.slane %v6003_v18, %v6496_v54  ;;  %v2538_v41 = vrot.slane %v5954_v19, %v6452_v32  ;;  %v3025_v42 = vcombine.low %v5977_v16, %v5978_v23  ;;  %v2670_v51 = vunpack.i.h.s16 %v2571_v39 }
  0x9d   : > { %v5366_v43 = vcombine.high %v5358_v24, %v5358_v24  ;;  %v5458_v46 = vcombine.low %v5348_v9, %v5358_v24  ;;  %v5979_v49 = vpack.i.b16 %v2571_v39, %v2668_v27  ;;  %v3062_v56 = vrot.slane %v3054_v29, %v6452_v32 }
  0x9e   : > { %v2540_v45 = vcombine.high %v2538_v41, %v2538_v41  ;;  %v2554_v48 = vrot.slane %v2538_v41, %v6452_v32  ;;  %v3053_v33 = vrot.slane %v3025_v42, %v6452_v32  ;;  %v2676_v3 = vcombine.high %v5946_v1, %v5946_v1 }
  0x9f   : > { %v5459_v36 = vcombine.low %v5366_v43, %v5365_v37  ;;  %v5466_v34 = vrot.slane %v5458_v46, %v6496_v54  ;;  %v2683_v6 = vrot.slane %v5946_v1, %v6452_v32  ;;  %v827_v9 = vcombine.high %v5926_v8, %v5926_v8 }
  0xa0   : > { %v2568_v47 = vrot.slane %v2540_v45, %v6452_v32  ;;  %v2570_v35 = vcombine.high %v2554_v48, %v2554_v48  ;;  %v2672_v30 = vunpack.i.h.s16 %v2554_v48  ;;  %v5980_v50 = vpack.i.b16 %v2554_v48, %v2670_v51 }
  0xa1   : > { %v3055_v55 = vcombine.low %v3046_v28, %v3053_v33  ;;  %v5473_v20 = vrot.slane %v5459_v36, %v6496_v54  ;;  %v2690_v7 = vrot.slane %v2676_v3, %v6452_v32  ;;  %v2699_v12 = vrot.slane %v2683_v6, %v6452_v32 }
  0xa2   : > { %v2674_v21 = vunpack.i.h.s16 %v2568_v47  ;;  %v5981_v38 = vpack.i.b16 %v2568_v47, %v2672_v30  ;;  %v3071_v57 = vcombine.low %v5979_v49, %v5980_v50  ;;  %v834_v13 = vrot.slane %v5926_v8, %v6496_v54 }
  0xa3   : > { %v3069_v58 = vrot.slane %v3055_v55, %v6452_v32  ;;  %v5475_v62 = vcombine.high %v5466_v34, %v5473_v20  ;;  %v5474_v60 = vcombine.low %v5466_v34, %v5473_v20  ;;  %v2692_v11 = vcombine.high %v2690_v7, %v2690_v7 }
  0xa4   : > { %v5982_v59 = vpack.i.b16 %v2570_v35, %v2674_v21  ;;  %v3079_v0 = vrot.slane %v3071_v57, %v6452_v32  ;;  %v2706_v10 = vrot.slane %v2690_v7, %v6452_v32  ;;  %v841_v14 = vrot.slane %v827_v9, %v6496_v54 }
  0xa5   : > { %v3070_v63 = vcombine.low %v3062_v56, %v3069_v58  ;;  %6009 = vmatprep.mubr.msk.bf16.mxu0 %vm2052_vm2, %v5475_v62  ;;  %v2720_v25 = vrot.slane %v2692_v11, %v6452_v32  ;;  %v2721_v26 = vcombine.high %v2699_v12, %v2699_v12  ;;  %v842_v2 = vcombine.high %v834_v13, %v834_v13 }
  0xa6   : > { %v3072_v22 = vcombine.low %v5981_v38, %v5982_v59  ;;  %5579 = vmatmul.mubr.bf16.gmra.mrb[40].mxu0 %v5474_v60  ;;  %v2722_v40 = vcombine.high %v2706_v10, %v2706_v10  ;;  %v843_v17 = vcombine.high %v841_v14, %v841_v14  ;;  %v3151_v23 = vcombine.low %v2706_v10, %v2699_v12 }
  0xa7   : > { %6122 = vmatmul.mubr.bf16.gmra.mrb[28].mxu1 %v3070_v63  ;;  %v2724_v16 = vcombine.high %v2720_v25, %v2720_v25  ;;  %v3104_v18 = vcombine.low %v2706_v10, %v2720_v25  ;;  %v5986_v19 = vcombine.high %v2706_v10, %v2720_v25  ;;  %v1187_v28 = vcombine.low %v834_v13, %v842_v2 }
  0xa8   : > { %6125 = vmatprep.mubr.msk.bf16.mxu1 %vm6252_vm0, %v6251_v4  ;;  %v3086_v31 = vrot.slane %v3072_v22, %v6452_v32  ;;  %v2691_v4 = vcombine.high %v2683_v6, %v2683_v6  ;;  %v3177_v27 = vcombine.low %v2720_v25, %v2722_v40  ;;  %v1213_v29 = vcombine.low %v842_v2, %v841_v14 }
  0xa9   : > { %v3178_v37 = vcombine.low %v2724_v16, %v2699_v12  ;;  %v1204_v41 = vcombine.low %v841_v14, %v834_v13  ;;  %v1188_v46 = vcombine.low %v841_v14, %v843_v17  ;;  %v3126_v51 = vrot.slane %v3104_v18, %v6452_v32 }
  0xaa   : > { %v3087_v53 = vcombine.low %v3079_v0, %v3086_v31  ;;  %v2713_v5 = vrot.slane %v2691_v4, %v6452_v32  ;;  %v3133_v45 = vrot.slane %v5986_v19, %v6452_v32  ;;  %v3159_v48 = vrot.slane %v3151_v23, %v6452_v32  ;;  %v5987_v31 = vld [vmem:[%s7795_s8] ss:$0 sm:$0xff] }
  0xab   : > { %v3192_v36 = vrot.slane %v3177_v27, %v6452_v32  ;;  %v1195_v34 = vrot.slane %v1187_v28, %v6496_v54  ;;  %v1221_v47 = vrot.slane %v1213_v29, %v6496_v54  ;;  %v3199_v35 = vrot.slane %v3178_v37, %v6452_v32 }
  0xac   : > { %v3094_v44 = vrot.slane %v3087_v53, %v6452_v32  ;;  %v2723_v15 = vcombine.high %v2713_v5, %v2713_v5  ;;  %v3102_v52 = vcombine.low %v2699_v12, %v2713_v5  ;;  %v5985_v61 = vcombine.high %v2699_v12, %v2713_v5 }
  0xad   : > { %v3152_v24 = vcombine.low %v2713_v5, %v2721_v26  ;;  %v1211_v30 = vrot.slane %v1204_v41, %v6496_v54  ;;  %v1214_v50 = vcombine.low %v843_v17, %v834_v13  ;;  %v3135_v56 = vcombine.low %v3126_v51, %v3133_v45 }
  0xae   : > { %v3176_v39 = vcombine.low %v2723_v15, %v2706_v10  ;;  %v3112_v42 = vrot.slane %v3102_v52, %v6452_v32  ;;  %v3119_v43 = vrot.slane %v5985_v61, %v6452_v32  ;;  %v1202_v20 = vrot.slane %v1188_v46, %v6496_v54 }
  0xaf   : > { %6126 = vmatmul.mubr.bf16.gmra.mrb[32].mxu1 %v3094_v44  ;;  %v3166_v49 = vrot.slane %v3152_v24, %v6452_v32  ;;  %v7095_v57 = vcombine.low %v1221_v47, %v1195_v34  ;;  %v7099_v63 = vcombine.low %v1195_v34, %v1211_v30  ;;  %v1228_v22 = vrot.slane %v1214_v50, %v6496_v54 }
  0xb0   : > { %v3185_v33 = vrot.slane %v3176_v39, %v6452_v32  ;;  %v3134_v55 = vcombine.low %v3112_v42, %v3119_v43  ;;  %v3218_v60 = vcombine.low %v3119_v43, %v3126_v51  ;;  %v7097_v59 = vcombine.low %v1195_v34, %v1202_v20 }
  0xb1   : > { %v3167_v21 = vcombine.low %v3159_v48, %v3166_v49  ;;  %v3201_v58 = vcombine.low %v3199_v35, %v3166_v49  ;;  %v7109_v53 = vrot.slane %v3135_v56, %v6452_v32  ;;  %v3234_v44 = vcombine.low %v3133_v45, %v3112_v42 }
  0xb2   : > { %v3200_v38 = vcombine.low %v3185_v33, %v3192_v36  ;;  %v3217_v62 = vcombine.low %v3185_v33, %v3112_v42  ;;  %v7103_v0 = vrot.slane %v3134_v55, %v6452_v32  ;;  %v3235_v1 = vcombine.low %v3119_v43, %v3159_v48 }
  0xb3   : > { %v3251_v3 = vcombine.low %v3166_v49, %v3185_v33  ;;  %v7111_v6 = vcombine.low %v1211_v30, %v1221_v47  ;;  %v7114_v7 = vrot.slane %v3167_v21, %v6452_v32  ;;  %v3252_v4 = vcombine.low %v3192_v36, %v3199_v35 }
  0xb4   : > { %v7117_v8 = vrot.slane %v3200_v38, %v6452_v32  ;;  %v7120_v11 = vrot.slane %v3201_v58, %v6452_v32  ;;  %v7123_v12 = vrot.slane %v3217_v62, %v6452_v32  ;;  %v7126_v13 = vrot.slane %v3218_v60, %v6452_v32 }
  0xb5   : > { %v5367_v10 = vcombine.high %v5987_v31, %v5987_v31  ;;  %v7128_v5 = vcombine.low %v1202_v20, %v1195_v34  ;;  %v7131_v26 = vcombine.low %v1221_v47, %v1228_v22  ;;  %v7133_v40 = vcombine.low %v1228_v22, %v1221_v47 }
  0xb6   : > { %v3150_v2 = vcombine.low %v7103_v0, %v7109_v53  ;;  %v7138_v16 = vrot.slane %v3234_v44, %v6452_v32  ;;  %v7141_v52 = vrot.slane %v3235_v1, %v6452_v32  ;;  %v7144_v61 = vrot.slane %v3251_v3, %v6452_v32 }
  0xb7   : > { %v7149_v24 = vrot.slane %v3252_v4, %v6452_v32  ;;  %v7157_v29 = vcombine.low %v5987_v31, %v5367_v10  ;;  %v7164_v33 = vcombine.low %v5987_v31, %v5987_v31  ;;  %v7173_v60 = vcombine.low %v5367_v10, %v5987_v31 }
 0x103   : > { %v1297_v9 = vpop.f32.mrb[0].mxu0 }
 0x104   : > { %v1298_v14 = vadd.f32 %v1297_v9, %v7097_v59  ;;  %v6059_v25 = vpop.f32.mrb[1].mxu0 }
 0x105   : > { %v1300_v15 = vpop.f32.mrb[2].mxu0 }
 0x106   : > { %v1366_v17 = vcombine.high %v1298_v14, %v1298_v14  ;;  %v1373_v18 = vrot.slane %v1298_v14, %v6496_v54  ;;  %v1301_v19 = vadd.f32 %v1300_v15, %v7099_v63  ;;  %v6060_v23 = vpop.f32.mrb[3].mxu0 }
 0x107   : > { %v1337_v37 = vpop.f32.mrb[0].mxu1 }
 0x108   : > { %v1380_v41 = vrot.slane %v1366_v17, %v6496_v54  ;;  %v1381_v42 = vcombine.high %v1373_v18, %v1373_v18  ;;  %v1660_v43 = vmax.f32 %v1373_v18, 0.0  ;;  %v1383_v46 = vcombine.high %v1301_v19, %v1301_v19  ;;  %v6079_v45 = vpop.f32.mrb[1].mxu1 }
 0x109   : > { %v1338_v51 = vadd.f32 %v1337_v37, %v7095_v57  ;;  %v1390_v48 = vrot.slane %v1301_v19, %v6496_v54  ;;  %v1340_v36 = vpop.f32.mrb[2].mxu1 }
 0x10a   : > { %v1382_v34 = vcombine.high %v1380_v41, %v1380_v41  ;;  %v1661_v47 = vmax.f32 %v1381_v42, 0.0  ;;  %v1662_v35 = vmax.f32 %v1380_v41, 0.0  ;;  %v1341_v56 = vadd.f32 %v1340_v36, %v7128_v5  ;;  %v6080_v20 = vpop.f32.mrb[3].mxu1 }
 0x10b   : > { %v1536_v50 = vcombine.high %v1338_v51, %v1338_v51  ;;  %v7169_v55 = vrot.slane %v1338_v51, %v6496_v54  ;;  %v1398_v21 = vcombine.high %v1390_v48, %v1390_v48  ;;  %v1397_v62 = vrot.slane %v1383_v46, %v6496_v54 }
 0x10c   : > { %v1663_v38 = vmax.f32 %v1382_v34, 0.0  ;;  %v1772_v58 = vcombine.low %v1660_v43, %v1661_v47  ;;  %v1553_v1 = vcombine.high %v1341_v56, %v1341_v56  ;;  %v1664_v3 = vmax.f32 %v1390_v48, 0.0 }
 0x10d   : > { %v1550_v22 = vrot.slane %v1536_v50, %v6496_v54  ;;  %v1551_v44 = vcombine.high %v7169_v55, %v7169_v55  ;;  %v1560_v4 = vrot.slane %v1341_v56, %v6496_v54  ;;  %v1665_v25 = vmax.f32 %v1398_v21, 0.0 }
 0x10e   : > { %v1773_v9 = vcombine.low %v1662_v35, %v1663_v38  ;;  %v1780_v14 = vrot.slane %v1772_v58, %v6496_v54  ;;  %v1567_v18 = vrot.slane %v1553_v1, %v6496_v54  ;;  %v1399_v23 = vcombine.high %v1397_v62, %v1397_v62 }
 0x10f   : > { %v1552_v15 = vcombine.high %v1550_v22, %v1550_v22  ;;  %v1702_v17 = vmax.f32 %v1550_v22, 0.0  ;;  %v1568_v10 = vcombine.high %v1560_v4, %v1560_v4  ;;  %v1666_v37 = vmax.f32 %v1397_v62, 0.0 }
 0x110   : > { %v1787_v19 = vrot.slane %v1773_v9, %v6496_v54  ;;  %v1700_v41 = vmax.f32 %v7169_v55, 0.0  ;;  %v7185_v42 = vmax.f32 %v1551_v44, 0.0  ;;  %v1569_v46 = vcombine.high %v1567_v18, %v1567_v18 }
 0x111   : > { %v1703_v43 = vmax.f32 %v1552_v15, 0.0  ;;  %v1704_v51 = vmax.f32 %v1560_v4, 0.0  ;;  %v1705_v45 = vmax.f32 %v1568_v10, 0.0  ;;  %v1789_v36 = vcombine.low %v1664_v3, %v1665_v25 }
 0x112   : > { %v1788_v48 = vcombine.low %v1780_v14, %v1787_v19  ;;  %v1305_v34 = vpop.f32.mrb[4].mxu0  ;;  %v1707_v35 = vmax.f32 %v1569_v46, 0.0  ;;  %v1803_v50 = vrot.slane %v1666_v37, %v6496_v54  ;;  %v1706_v21 = vmax.f32 %v1567_v18, 0.0 }
 0x113   : > { %v1970_v47 = vcombine.low %v1702_v17, %v1703_v43  ;;  %v1306_v56 = vadd.f32 %v1305_v34, %v7131_v26  ;;  %v6063_v20 = vpop.f32.mrb[5].mxu0  ;;  %v1971_v38 = vcombine.low %v1704_v51, %v1705_v45  ;;  %v1667_v58 = vmax.f32 %v1399_v23, 0.0 }
 0x114   : > { %v1796_v62 = vrot.slane %v1789_v36, %v6496_v54  ;;  %v1308_v22 = vpop.f32.mrb[6].mxu0  ;;  %v2053_v1 = vsel %vm2052_vm2, %v1788_v48, -inf  ;;  %v1987_v25 = vcombine.low %v1706_v21, %v1707_v35 }
 0x115   : > { %v1978_v44 = vrot.slane %v1970_v47, %v6496_v54  ;;  %v1400_v4 = vcombine.high %v1306_v56, %v1306_v56  ;;  %v1407_v3 = vrot.slane %v1306_v56, %v6496_v54  ;;  %v6064_v9 = vpop.f32.mrb[7].mxu0  ;;  %v1985_v14 = vrot.slane %v1971_v38, %v6496_v54 }
 0x116   : > { %v1804_v15 = vcombine.low %v1796_v62, %v1803_v50  ;;  %v1309_v17 = vadd.f32 %v1308_v22, %v7095_v57  ;;  %v1994_v56 = vrot.slane %v1987_v25, %v6496_v54 }
 0x117   : > { %v1414_v10 = vrot.slane %v1400_v4, %v6496_v54  ;;  %v1415_v19 = vcombine.high %v1407_v3, %v1407_v3  ;;  %v1668_v23 = vmax.f32 %v1407_v3, 0.0  ;;  %v1986_v37 = vcombine.low %v1978_v44, %v1985_v14 }
 0x118   : > { %v2055_v43 = vsel %vm2054_vm3, %v1804_v15, -inf  ;;  %v1345_v46 = vpop.f32.mrb[4].mxu1  ;;  %v1417_v51 = vcombine.high %v1309_v17, %v1309_v17  ;;  %v1424_v45 = vrot.slane %v1309_v17, %v6496_v54 }
 0x119   : > { %v2056_v48 = vmax.f32 %v2053_v1, %v2055_v43  ;;  %v1416_v36 = vcombine.high %v1414_v10, %v1414_v10  ;;  %v1669_v34 = vmax.f32 %v1415_v19, 0.0  ;;  %v1670_v47 = vmax.f32 %v1414_v10, 0.0  ;;  %v6083_v35 = vpop.f32.mrb[5].mxu1 }
 0x11a   : > { %v1805_v57 = vcombine.low %v1667_v58, %v1668_v23  ;;  %v1346_v50 = vadd.f32 %v1345_v46, %v7111_v6  ;;  %v1431_v20 = vrot.slane %v1417_v51, %v6496_v54  ;;  %v1348_v21 = vpop.f32.mrb[6].mxu1  ;;  %v1432_v44 = vcombine.high %v1424_v45, %v1424_v45 }
 0x11b   : > { %v2057_v38 = vrot.slane %v2056_v48, 4  ;;  %v1671_v62 = vmax.f32 %v1416_v36, 0.0  ;;  %v1806_v22 = vcombine.low %v1669_v34, %v1670_v47  ;;  %v6084_v4 = vpop.f32.mrb[7].mxu1  ;;  %v1672_v17 = vmax.f32 %v1424_v45, 0.0 }
 0x11c   : > { %v1813_v3 = vrot.slane %v1805_v57, %v6496_v54  ;;  %v1570_v1 = vcombine.high %v1346_v50, %v1346_v50  ;;  %v1577_v9 = vrot.slane %v1346_v50, %v6496_v54  ;;  %v1433_v14 = vcombine.high %v1431_v20, %v1431_v20 }
 0x11d   : > { %v2058_v15 = vmax.f32 %v2056_v48, %v2057_v38  ;;  %v1820_v58 = vrot.slane %v1806_v22, %v6496_v54  ;;  %v1673_v10 = vmax.f32 %v1432_v44, 0.0  ;;  %v1674_v43 = vmax.f32 %v1431_v20, 0.0 }
 0x11e   : > { %v1584_v25 = vrot.slane %v1570_v1, %v6496_v54  ;;  %v1585_v19 = vcombine.high %v1577_v9, %v1577_v9  ;;  %v1708_v23 = vmax.f32 %v1577_v9, 0.0  ;;  %v1675_v36 = vmax.f32 %v1433_v14, 0.0 }
 0x11f   : > { %v2059_v46 = vrot.slane %v2058_v15, 2  ;;  %v1821_v51 = vcombine.low %v1813_v3, %v1820_v58  ;;  %v1822_v34 = vcombine.low %v1671_v62, %v1672_v17  ;;  %v1836_v45 = vrot.slane %v1673_v10, %v6496_v54 }
 0x120   : > { %v1586_v47 = vcombine.high %v1584_v25, %v1584_v25  ;;  %v1709_v35 = vmax.f32 %v1585_v19, 0.0  ;;  %v1710_v57 = vmax.f32 %v1584_v25, 0.0  ;;  %v2001_v50 = vrot.slane %v1708_v23, %v6496_v54  ;;  %v1313_v38 = vpop.f32.mrb[8].mxu0 }
 0x121   : > { %v7208_v4 = vmax.f32 %v2058_v15, %v2059_v46  ;;  %v1829_v48 = vrot.slane %v1822_v34, %v6496_v54  ;;  %v2063_v20 = vsel %vm2052_vm2, %v1821_v51, -inf  ;;  %v2108_v62 = vsel %vm2052_vm2, %v1986_v37, -inf  ;;  %v6067_v1 = vpop.f32.mrb[9].mxu0 }
 0x122   : > { %v2002_v44 = vcombine.low %v1994_v56, %v2001_v50  ;;  %v7215_v3 = vcombine.low %v1709_v35, %v1710_v57  ;;  %v1838_v14 = vcombine.low %v1674_v43, %v1675_v36  ;;  %v1314_v15 = vadd.f32 %v1313_v38, %v7128_v5  ;;  %v1316_v17 = vpop.f32.mrb[10].mxu0 }
 0x123   : > { %v1837_v9 = vcombine.low %v1829_v48, %v1836_v45  ;;  %v1349_v58 = vadd.f32 %v1348_v21, %v7133_v40  ;;  %v2061_v10 = vrot.slane %v7208_v4, 1  ;;  %v1711_v25 = vmax.f32 %v1586_v47, 0.0  ;;  %v6068_v56 = vpop.f32.mrb[11].mxu0 }
 0x124   : > { %v2109_v19 = vsel %vm2054_vm3, %v2002_v44, -inf  ;;  %v1317_v23 = vadd.f32 %v1316_v17, %v7111_v6  ;;  %v2011_v46 = vrot.slane %v7215_v3, %v6496_v54  ;;  %v1434_v43 = vcombine.high %v1314_v15, %v1314_v15 }
 0x125   : > { %v2110_v37 = vmax.f32 %v2108_v62, %v2109_v19  ;;  %v2064_v51 = vsel %vm2054_vm3, %v1837_v9, -inf  ;;  %v1441_v5 = vrot.slane %v1314_v15, %v6496_v54  ;;  %v1587_v21 = vcombine.high %v1349_v58, %v1349_v58 }
 0x126   : > { %v2065_v36 = vmax.f32 %v2063_v20, %v2064_v51  ;;  %v1594_v34 = vrot.slane %v1349_v58, %v6496_v54  ;;  %v1846_v47 = vrot.slane %v1838_v14, %v6496_v54  ;;  %v1448_v57 = vrot.slane %v1434_v43, %v6496_v54 }
 0x127   : > { %v2111_v35 = vrot.slane %v2110_v37, 4  ;;  %v1451_v6 = vcombine.high %v1317_v23, %v1317_v23  ;;  %v1449_v48 = vcombine.high %v1441_v5, %v1441_v5  ;;  %v1676_v45 = vmax.f32 %v1441_v5, 0.0 }
 0x128   : > { %v2066_v50 = vrot.slane %v2065_v36, 4  ;;  %v1601_v38 = vrot.slane %v1587_v21, %v6496_v54  ;;  %v1450_v44 = vcombine.high %v1448_v57, %v1448_v57  ;;  %v1678_v3 = vmax.f32 %v1448_v57, 0.0  ;;  %v1321_v1 = vpop.f32.mrb[12].mxu0 }
 0x129   : > { %v1602_v62 = vcombine.high %v1594_v34, %v1594_v34  ;;  %v1458_v20 = vrot.slane %v1317_v23, %v6496_v54  ;;  %v1677_v15 = vmax.f32 %v1449_v48, 0.0  ;;  %v1712_v17 = vmax.f32 %v1594_v34, 0.0  ;;  %v6071_v19 = vpop.f32.mrb[13].mxu0 }
 0x12a   : > { %v2067_v9 = vmax.f32 %v2065_v36, %v2066_v50  ;;  %v1603_v58 = vcombine.high %v1601_v38, %v1601_v38  ;;  %v1679_v14 = vmax.f32 %v1450_v44, 0.0  ;;  %v1714_v51 = vmax.f32 %v1601_v38, 0.0  ;;  %v1324_v22 = vpop.f32.mrb[14].mxu0 }
 0x12b   : > { %v1713_v56 = vmax.f32 %v1602_v62, 0.0  ;;  %v1465_v43 = vrot.slane %v1451_v6, %v6496_v54  ;;  %v1839_v31 = vcombine.low %v1676_v45, %v1677_v15  ;;  %v2004_v30 = vcombine.low %v1711_v25, %v1712_v17  ;;  %v6072_v57 = vpop.f32.mrb[15].mxu0 }
 0x12c   : > { %v2068_v5 = vrot.slane %v2067_v9, 2  ;;  %v1715_v21 = vmax.f32 %v1603_v58, 0.0  ;;  %v1855_v49 = vcombine.low %v1678_v3, %v1679_v14  ;;  %v1466_v23 = vcombine.high %v1458_v20, %v1458_v20 }
 0x12d   : > { %v2020_v28 = vcombine.low %v1713_v56, %v1714_v51  ;;  %v1467_v18 = vcombine.high %v1465_v43, %v1465_v43  ;;  %v1853_v34 = vrot.slane %v1839_v31, %v6496_v54  ;;  %v2018_v50 = vrot.slane %v2004_v30, %v6496_v54 }
 0x12e   : > { %v7233_v36 = vmax.f32 %v2067_v9, %v2068_v5  ;;  %v2034_v48 = vrot.slane %v1715_v21, %v6496_v54  ;;  %v1680_v38 = vmax.f32 %v1458_v20, 0.0  ;;  %v1681_v44 = vmax.f32 %v1466_v23, 0.0 }
 0x12f   : > { %v2027_v6 = vrot.slane %v2020_v28, %v6496_v54  ;;  %v1682_v45 = vmax.f32 %v1465_v43, 0.0  ;;  %v7240_v25 = vmax.f32 %v7208_v4, %v2061_v10  ;;  %v7242_v3 = vmax.f32 %v2110_v37, %v2111_v35 }
 0x130   : > { %v1854_v62 = vcombine.low %v1846_v47, %v1853_v34  ;;  %v2019_v15 = vcombine.low %v2011_v46, %v2018_v50  ;;  %v1862_v58 = vrot.slane %v1855_v49, %v6496_v54  ;;  %v1869_v31 = vrot.slane %v1680_v38, %v6496_v54 }
 0x131   : > { %7806 = vst [vmem:[#allocation5_spill] sm:$0xff] %v7240_v25  ;;  %7807 = vst [vmem:[#allocation6_spill] sm:$0xff] %v7242_v3  ;;  %v2035_v9 = vcombine.low %v2027_v6, %v2034_v48  ;;  %v1871_v30 = vcombine.low %v1681_v44, %v1682_v45  ;;  %v2070_v17 = vrot.slane %v7233_v36, 1  ;;  %v1683_v20 = vmax.f32 %v1467_v18, 0.0 }
 0x132   : > { %v2117_v28 = vsel %vm2052_vm2, %v2019_v15, -inf  ;;  %v1322_v19 = vadd.f32 %v1321_v1, %v7133_v40  ;;  %v1329_v14 = vpop.f32.mrb[16].mxu0  ;;  %v1870_v10 = vcombine.low %v1862_v58, %v1869_v31  ;;  %v2072_v37 = vsel %vm2052_vm2, %v1854_v62, -inf }
 0x133   : > { %v2118_v4 = vsel %vm2054_vm3, %v2035_v9, -inf  ;;  %v1325_v46 = vadd.f32 %v1324_v22, %v7097_v59  ;;  %v6075_v35 = vpop.f32.mrb[17].mxu0  ;;  %v1879_v47 = vrot.slane %v1871_v30, %v6496_v54  ;;  %v1330_v5 = vadd.f32 %v1329_v14, %v7099_v63 }
 0x134   : > { %v7252_v49 = vmax.f32 %v2117_v28, %v2118_v4  ;;  %v1468_v56 = vcombine.high %v1322_v19, %v1322_v19  ;;  %v1475_v51 = vrot.slane %v1322_v19, %v6496_v54  ;;  %v1332_v43 = vpop.f32.mrb[18].mxu0  ;;  %v2073_v18 = vsel %vm2054_vm3, %v1870_v10, -inf }
 0x135   : > { %v1485_v40 = vcombine.high %v1325_v46, %v1325_v46  ;;  %v1492_v1 = vrot.slane %v1325_v46, %v6496_v54  ;;  %v6076_v21 = vpop.f32.mrb[19].mxu0  ;;  %v2074_v57 = vmax.f32 %v2072_v37, %v2073_v18  ;;  %v1502_v6 = vcombine.high %v1330_v5, %v1330_v5 }
 0x136   : > { %7808 = vst [vmem:[#allocation7_spill] sm:$0xff] %v7252_v49  ;;  %v1482_v59 = vrot.slane %v1468_v56, %v6496_v54  ;;  %v1483_v22 = vcombine.high %v1475_v51, %v1475_v51  ;;  %v1684_v23 = vmax.f32 %v1475_v51, 0.0  ;;  %v1509_v19 = vrot.slane %v1330_v5, %v6496_v54 }
 0x137   : > { %v1499_v34 = vrot.slane %v1485_v40, %v6496_v54  ;;  %v1500_v50 = vcombine.high %v1492_v1, %v1492_v1  ;;  %v1688_v48 = vmax.f32 %v1492_v1, 0.0  ;;  %v2075_v38 = vrot.slane %v2074_v57, 4 }
 0x138   : > { %v1484_v44 = vcombine.high %v1482_v59, %v1482_v59  ;;  %v1685_v45 = vmax.f32 %v1483_v22, 0.0  ;;  %v1686_v62 = vmax.f32 %v1482_v59, 0.0  ;;  %v1872_v15 = vcombine.low %v1683_v20, %v1684_v23 }
 0x139   : > { %v1501_v9 = vcombine.high %v1499_v34, %v1499_v34  ;;  %v1689_v58 = vmax.f32 %v1500_v50, 0.0  ;;  %v1690_v31 = vmax.f32 %v1499_v34, 0.0  ;;  %v2076_v63 = vmax.f32 %v2074_v57, %v2075_v38 }
 0x13a   : > { %v1687_v30 = vmax.f32 %v1484_v44, 0.0  ;;  %v1888_v28 = vcombine.low %v1685_v45, %v1686_v62  ;;  %v3322_v14 = vpop.f32.mrb[8].mxu1  ;;  %v1886_v4 = vrot.slane %v1872_v15, %v6496_v54  ;;  %v1516_v46 = vrot.slane %v1502_v6, %v6496_v54 }
 0x13b   : > { %v1691_v10 = vmax.f32 %v1501_v9, 0.0  ;;  %v1904_v37 = vcombine.low %v1688_v48, %v1689_v58  ;;  %v6103_v35 = vpop.f32.mrb[9].mxu1  ;;  %v7264_v56 = vpop.f32.mrb[20].mxu0  ;;  %v2077_v51 = vrot.slane %v2076_v63, 2  ;;  %v1517_v40 = vcombine.high %v1509_v19, %v1509_v19 }
 0x13c   : > { %v1895_v20 = vrot.slane %v1888_v28, %v6496_v54  ;;  %v1902_v18 = vrot.slane %v1687_v30, %v6496_v54  ;;  %v7268_v1 = vpop.f32.mrb[10].mxu1  ;;  %v5542_v21 = vpop.f32.mrb[21].mxu0  ;;  %v1887_v5 = vcombine.low %v1879_v47, %v1886_v4  ;;  %v1333_v22 = vadd.f32 %v1332_v43, %v7131_v26 }
 0x13d   : > { %v1905_v57 = vcombine.low %v1690_v31, %v1691_v10  ;;  %v1912_v59 = vrot.slane %v1904_v37, %v6496_v54  ;;  %v6104_v23 = vpop.f32.mrb[11].mxu1  ;;  %v7272_v34 = vpop.f32.mrb[22].mxu0  ;;  %v2078_v50 = vmax.f32 %v2076_v63, %v2077_v51  ;;  %v1692_v6 = vmax.f32 %v1509_v19, 0.0 }
 0x13e   : > { %v1903_v48 = vcombine.low %v1895_v20, %v1902_v18  ;;  %v1693_v38 = vmax.f32 %v1517_v40, 0.0  ;;  %v5545_v44 = vpop.f32.mrb[23].mxu0  ;;  %v2081_v45 = vsel %vm2052_vm2, %v1887_v5, -inf  ;;  %v1518_v15 = vcombine.high %v1516_v46, %v1516_v46 }
 0x13f   : > { %v1919_v62 = vrot.slane %v1905_v57, %v6496_v54  ;;  %v1694_v9 = vmax.f32 %v1516_v46, 0.0  ;;  %v2079_v47 = vrot.slane %v2078_v50, 1  ;;  %v3323_v26 = vadd.f32 %v3322_v14, %v3150_v2 }
 0x140   : > { %v2082_v58 = vsel %vm2054_vm3, %v1903_v48, -inf  ;;  %v1921_v31 = vcombine.low %v1692_v6, %v1693_v38  ;;  %v1519_v28 = vcombine.high %v1333_v22, %v1333_v22  ;;  %v7284_v19 = vmax.f32 %v7233_v36, %v2070_v17 }
 0x141   : > { %v2083_v43 = vmax.f32 %v2081_v45, %v2082_v58  ;;  %v1920_v63 = vcombine.low %v1912_v59, %v1919_v62  ;;  %v1935_v30 = vrot.slane %v1694_v9, %v6496_v54  ;;  %v3389_v10 = vcombine.high %v3323_v26, %v3323_v26 }
 0x142   : > { %7809 = vst [vmem:[#allocation8_spill] sm:$0xff] %v7284_v19  ;;  %v1928_v4 = vrot.slane %v1921_v31, %v6496_v54  ;;  %v3396_v37 = vrot.slane %v3323_v26, %v6452_v32  ;;  %v1526_v2 = vrot.slane %v1333_v22, %v6496_v54  ;;  %v1533_v14 = vrot.slane %v1519_v28, %v6496_v54 }
 0x143   : > { %v2084_v46 = vrot.slane %v2083_v43, 4  ;;  %v2090_v35 = vsel %vm2052_vm2, %v1920_v63, -inf  ;;  %v3403_v20 = vrot.slane %v3389_v10, %v6452_v32  ;;  %v7293_v36 = vmax.f32 %v2078_v50, %v2079_v47 }
 0x144   : > { %v1936_v51 = vcombine.low %v1928_v4, %v1935_v30  ;;  %v3404_v18 = vcombine.high %v3396_v37, %v3396_v37  ;;  %v3412_v40 = vrot.slane %v3396_v37, %v6452_v32  ;;  %v1695_v21 = vmax.f32 %v1518_v15, 0.0 }
 0x145   : > { %7810 = vst [vmem:[#allocation9_spill] sm:$0xff] %v7293_v36  ;;  %v2085_v17 = vmax.f32 %v2083_v43, %v2084_v46  ;;  %v1534_v5 = vcombine.high %v1526_v2, %v1526_v2  ;;  %v3330_v57 = vpop.f32.mrb[12].mxu1  ;;  %v3405_v23 = vcombine.high %v3403_v20, %v3403_v20  ;;  %v3419_v48 = vrot.slane %v3403_v20, %v6452_v32 }
 0x146   : > { %v2091_v59 = vsel %vm2054_vm3, %v1936_v51, -inf  ;;  %v3426_v22 = vrot.slane %v3404_v18, %v6452_v32  ;;  %v6107_v6 = vpop.f32.mrb[13].mxu1  ;;  %v3434_v44 = vcombine.high %v3412_v40, %v3412_v40  ;;  %v1535_v45 = vcombine.high %v1533_v14, %v1533_v14 }
 0x147   : > { %v2092_v38 = vmax.f32 %v2090_v35, %v2091_v59  ;;  %v1696_v62 = vmax.f32 %v1526_v2, 0.0  ;;  %v7298_v9 = vpop.f32.mrb[14].mxu1  ;;  %v3433_v50 = vrot.slane %v3405_v23, %v6452_v32  ;;  %v3435_v47 = vcombine.high %v3419_v48, %v3419_v48 }
 0x148   : > { %v3436_v15 = vcombine.high %v3426_v22, %v3426_v22  ;;  %v4131_v58 = vmax.f32 %v3426_v22, 0.0  ;;  %v6108_v31 = vpop.f32.mrb[15].mxu1  ;;  %v2086_v26 = vrot.slane %v2085_v17, 2  ;;  %v4130_v63 = vmax.f32 %v3412_v40, 0.0 }
 0x149   : > { %v2093_v43 = vrot.slane %v2092_v38, 4  ;;  %v4132_v30 = vmax.f32 %v3434_v44, 0.0  ;;  %v7301_v28 = vpop.f32.mrb[24].mxu0  ;;  %v3437_v4 = vcombine.high %v3433_v50, %v3433_v50  ;;  %v4134_v37 = vmax.f32 %v3419_v48, 0.0 }
 0x14a   : > { %v4133_v10 = vmax.f32 %v3436_v15, 0.0  ;;  %v4135_v46 = vmax.f32 %v3433_v50, 0.0  ;;  %v5550_v35 = vpop.f32.mrb[25].mxu0  ;;  %v4136_v2 = vmax.f32 %v3435_v47, 0.0  ;;  %v4338_v51 = vcombine.low %v4130_v63, %v4131_v58 }
 0x14b   : > { %v1697_v20 = vmax.f32 %v1534_v5, 0.0  ;;  %v1698_v18 = vmax.f32 %v1533_v14, 0.0  ;;  %v7303_v59 = vpop.f32.mrb[26].mxu0  ;;  %v4137_v23 = vmax.f32 %v3437_v4, 0.0  ;;  %v1699_v31 = vmax.f32 %v1535_v45, 0.0 }
 0x14c   : > { %v4339_v22 = vcombine.low %v4132_v30, %v4133_v10  ;;  %v4340_v6 = vcombine.low %v4134_v37, %v4135_v46  ;;  %v5553_v27 = vpop.f32.mrb[27].mxu0  ;;  %v7305_v40 = vmax.f32 %v2085_v17, %v2086_v26  ;;  %v7307_v44 = vmax.f32 %v2092_v38, %v2093_v43 }
 0x14d   : > { %v1937_v39 = vcombine.low %v1695_v21, %v1696_v62  ;;  %v1938_v15 = vcombine.low %v1697_v20, %v1698_v18  ;;  %v4341_v48 = vcombine.low %v4136_v2, %v4137_v23  ;;  %v4348_v50 = vrot.slane %v4338_v51, %v6452_v32 }
 0x14e   : > { %7811 = vst [vmem:[#allocation10_spill] sm:$0xff] %v7305_v40  ;;  %7812 = vst [vmem:[#allocation11_spill] sm:$0xff] %v7307_v44  ;;  %v4355_v47 = vrot.slane %v4339_v22, %v6452_v32  ;;  %v1954_v14 = vcombine.low %v1699_v31, %v1700_v41  ;;  %v7813_v27 = vcombine.low %v7103_v0, %v7114_v7 }
 0x14f   : > { %v1945_v5 = vrot.slane %v1937_v39, %v6496_v54  ;;  %v1952_v58 = vrot.slane %v1938_v15, %v6496_v54  ;;  %v7814_v21 = vcombine.low %v7117_v8, %v7120_v11  ;;  %v4362_v45 = vrot.slane %v4340_v6, %v6452_v32 }
 0x150   : > { %v3326_v17 = vadd.f32 %v7268_v1, %v7813_v27  ;;  %v4369_v62 = vrot.slane %v4341_v48, %v6452_v32  ;;  %v4370_v26 = vcombine.low %v4348_v50, %v4355_v47  ;;  %v1961_v55 = vrot.slane %v1954_v14, %v6496_v54 }
 0x151   : > { %v3331_v38 = vadd.f32 %v3330_v57, %v7814_v21  ;;  %v1953_v41 = vcombine.low %v1945_v5, %v1952_v58  ;;  %v7815_v1 = vrot.slane %v7185_v42, %v6496_v54  ;;  %v7816_v58 = vcombine.low %v7123_v12, %v7126_v13 }
 0x152   : > { %v3438_v39 = vcombine.high %v3326_v17, %v3326_v17  ;;  %v3445_v43 = vrot.slane %v3326_v17, %v6452_v32  ;;  %v4371_v4 = vcombine.low %v4362_v45, %v4369_v62  ;;  %v4378_v51 = vrot.slane %v4370_v26, %v6452_v32 }
 0x153   : > { %v3487_v63 = vcombine.high %v3331_v38, %v3331_v38  ;;  %v1969_v10 = vcombine.low %v1961_v55, %v7815_v1  ;;  %v3494_v57 = vrot.slane %v3331_v38, %v6452_v32  ;;  %v2099_v37 = vsel %vm2052_vm2, %v1953_v41, -inf }
 0x154   : > { %v3452_v46 = vrot.slane %v3438_v39, %v6452_v32  ;;  %v3453_v35 = vcombine.high %v3445_v43, %v3445_v43  ;;  %v3461_v2 = vrot.slane %v3445_v43, %v6452_v32  ;;  %v4385_v20 = vrot.slane %v4371_v4, %v6452_v32  ;;  %v7338_v22 = vpop.f32.mrb[16].mxu1  ;;  %v7340_v54 = vpop.f32.mrb[28].mxu0 }
 0x155   : > { %v2100_v18 = vsel %vm2054_vm3, %v1969_v10, -inf  ;;  %v3501_v23 = vrot.slane %v3487_v63, %v6452_v32  ;;  %v6111_v48 = vpop.f32.mrb[17].mxu1  ;;  %v5558_v50 = vpop.f32.mrb[29].mxu0  ;;  %v3502_v5 = vcombine.high %v3494_v57, %v3494_v57  ;;  %v3334_v27 = vadd.f32 %v7298_v9, %v7816_v58 }
 0x156   : > { %v7342_v42 = vmax.f32 %v2099_v37, %v2100_v18  ;;  %v3454_v6 = vcombine.high %v3452_v46, %v3452_v46  ;;  %v3468_v31 = vrot.slane %v3452_v46, %v6452_v32  ;;  %v3475_v15 = vrot.slane %v3453_v35, %v6452_v32  ;;  %v7350_v17 = vpop.f32.mrb[18].mxu1  ;;  %v7352_v21 = vpop.f32.mrb[30].mxu0 }
 0x157   : > { %v4386_v47 = vcombine.low %v4378_v51, %v4385_v20  ;;  %v3483_v14 = vcombine.high %v3461_v2, %v3461_v2  ;;  %v3503_v26 = vcombine.high %v3501_v23, %v3501_v23  ;;  %v6112_v55 = vpop.f32.mrb[19].mxu1  ;;  %v5561_v41 = vpop.f32.mrb[31].mxu0  ;;  %v4138_v43 = vmax.f32 %v3461_v2, 0.0 }
 0x158   : > { %v3482_v38 = vrot.slane %v3454_v6, %v6452_v32  ;;  %v3484_v45 = vcombine.high %v3468_v31, %v3468_v31  ;;  %v3485_v62 = vcombine.high %v3475_v15, %v3475_v15  ;;  %v4139_v63 = vmax.f32 %v3475_v15, 0.0 }
 0x159   : > { %v4142_v4 = vmax.f32 %v3468_v31, 0.0  ;;  %v4140_v10 = vmax.f32 %v3483_v14, 0.0  ;;  %v3510_v20 = vrot.slane %v3494_v57, %v6452_v32  ;;  %v3517_v6 = vrot.slane %v3501_v23, %v6452_v32 }
 0x15a   : > { %v3486_v1 = vcombine.high %v3482_v38, %v3482_v38  ;;  %v4141_v37 = vmax.f32 %v3485_v62, 0.0  ;;  %v4143_v9 = vmax.f32 %v3482_v38, 0.0  ;;  %v4144_v46 = vmax.f32 %v3484_v45, 0.0 }
 0x15b   : > { %v4387_v35 = vcombine.low %v4138_v43, %v4139_v63  ;;  %v4409_v51 = vrot.slane %v4142_v4, %v6452_v32  ;;  %v3524_v48 = vrot.slane %v3502_v5, %v6452_v32  ;;  %v3531_v2 = vrot.slane %v3503_v26, %v6452_v32 }
 0x15c   : > { %v4388_v18 = vcombine.low %v4140_v10, %v4141_v37  ;;  %v5058_v50 = vsel %vm2052_vm2, %v4386_v47, -inf  ;;  %v3532_v14 = vcombine.high %v3510_v20, %v3510_v20  ;;  %v4426_v38 = vcombine.low %v4143_v9, %v4144_v46 }
 0x15d   : > { %v4395_v31 = vrot.slane %v4387_v35, %v6452_v32  ;;  %v4424_v15 = vrot.slane %v4409_v51, %v6452_v32  ;;  %v3533_v45 = vcombine.high %v3517_v6, %v3517_v6  ;;  %v3534_v62 = vcombine.high %v3524_v48, %v3524_v48  ;;  %v7365_v57 = vpop.f32.mrb[20].mxu1 }
 0x15e   : > { %v4402_v58 = vrot.slane %v4388_v18, %v6452_v32  ;;  %v3535_v55 = vcombine.high %v3531_v2, %v3531_v2  ;;  %v4145_v23 = vmax.f32 %v3486_v1, 0.0  ;;  %v4146_v41 = vmax.f32 %v3510_v20, 0.0  ;;  %v6115_v43 = vpop.f32.mrb[21].mxu1  ;;  %v7367_v26 = vpop.f32.mrb[32].mxu0 }
 0x15f   : > { %v4147_v5 = vmax.f32 %v3524_v48, 0.0  ;;  %v4148_v4 = vmax.f32 %v3532_v14, 0.0  ;;  %v4149_v10 = vmax.f32 %v3534_v62, 0.0  ;;  %v4150_v37 = vmax.f32 %v3517_v6, 0.0  ;;  %v7369_v47 = vpop.f32.mrb[22].mxu1  ;;  %v5566_v35 = vpop.f32.mrb[33].mxu0 }
 0x160   : > { %v4410_v63 = vcombine.low %v4395_v31, %v4402_v58  ;;  %v4151_v51 = vmax.f32 %v3531_v2, 0.0  ;;  %v4152_v9 = vmax.f32 %v3533_v45, 0.0  ;;  %v4427_v46 = vcombine.low %v4145_v23, %v4146_v41  ;;  %v6116_v30 = vpop.f32.mrb[23].mxu1  ;;  %v7371_v39 = vpop.f32.mrb[34].mxu0 }
 0x161   : > { %v3536_v18 = vcombine.high %v3334_v27, %v3334_v27  ;;  %v4428_v20 = vcombine.low %v4147_v5, %v4148_v4  ;;  %v4429_v48 = vcombine.low %v4149_v10, %v4150_v37  ;;  %v3543_v43 = vrot.slane %v3334_v27, %v6452_v32  ;;  %v5569_v31 = vpop.f32.mrb[35].mxu0 }
 0x162   : > { %v4417_v1 = vrot.slane %v4410_v63, %v6452_v32  ;;  %v4436_v14 = vrot.slane %v4426_v38, %v6452_v32  ;;  %v4443_v6 = vrot.slane %v4427_v46, %v6452_v32  ;;  %v4475_v58 = vcombine.low %v4151_v51, %v4152_v9 }
 0x163   : > { %v3550_v2 = vrot.slane %v3536_v18, %v6452_v32  ;;  %v4450_v62 = vrot.slane %v4428_v20, %v6452_v32  ;;  %v4457_v30 = vrot.slane %v4429_v48, %v6452_v32  ;;  %v3551_v23 = vcombine.high %v3543_v43, %v3543_v43 }
 0x164   : > { %v4425_v45 = vcombine.low %v4417_v1, %v4424_v15  ;;  %v4458_v41 = vcombine.low %v4436_v14, %v4443_v6  ;;  %v3559_v5 = vrot.slane %v3543_v43, %v6452_v32  ;;  %v4153_v4 = vmax.f32 %v3535_v55, 0.0 }
 0x165   : > { %v3552_v63 = vcombine.high %v3550_v2, %v3550_v2  ;;  %v4459_v10 = vcombine.low %v4450_v62, %v4457_v30  ;;  %v3566_v38 = vrot.slane %v3550_v2, %v6452_v32  ;;  %v3573_v37 = vrot.slane %v3551_v23, %v6452_v32 }
 0x166   : > { %v5060_v27 = vsel %vm5059_vm4, %v4425_v45, -inf  ;;  %v4466_v15 = vrot.slane %v4458_v41, %v6452_v32  ;;  %v3581_v9 = vcombine.high %v3559_v5, %v3559_v5  ;;  %v4154_v20 = vmax.f32 %v3559_v5, 0.0 }
 0x167   : > { %v5061_v35 = vmax.f32 %v5058_v50, %v5060_v27  ;;  %v3580_v51 = vrot.slane %v3552_v63, %v6452_v32  ;;  %v4473_v46 = vrot.slane %v4459_v10, %v6452_v32  ;;  %v3582_v18 = vcombine.high %v3566_v38, %v3566_v38 }
 0x168   : > { %v3583_v1 = vcombine.high %v3573_v37, %v3573_v37  ;;  %v4155_v43 = vmax.f32 %v3573_v37, 0.0  ;;  %v4156_v31 = vmax.f32 %v3581_v9, 0.0  ;;  %v4158_v2 = vmax.f32 %v3566_v38, 0.0 }
 0x169   : > { %v5062_v48 = vrot.slane %v5061_v35, 4  ;;  %v3584_v55 = vcombine.high %v3580_v51, %v3580_v51  ;;  %v4474_v14 = vcombine.low %v4466_v15, %v4473_v46  ;;  %v4159_v45 = vmax.f32 %v3580_v51, 0.0 }
 0x16a   : > { %v4157_v6 = vmax.f32 %v3583_v1, 0.0  ;;  %v4160_v50 = vmax.f32 %v3582_v18, 0.0  ;;  %v4476_v23 = vcombine.low %v4153_v4, %v4154_v20  ;;  %v7817_v41 = vrot.slane %v7342_v42, 4 }
 0x16b   : > { %v7387_v62 = vmax.f32 %v5061_v35, %v5062_v48  ;;  %v4161_v30 = vmax.f32 %v3584_v55, 0.0  ;;  %v4497_v5 = vrot.slane %v4155_v43, %v6452_v32  ;;  %v4515_v10 = vcombine.low %v4158_v2, %v4159_v45 }
 0x16c   : > { %v7392_v63 = vmax.f32 %v7342_v42, %v7817_v41  ;;  %v4514_v27 = vcombine.low %v4156_v31, %v4157_v6  ;;  %v4483_v37 = vrot.slane %v4475_v58, %v6452_v32  ;;  %v4490_v38 = vrot.slane %v4476_v23, %v6452_v32 }
 0x16d   : > { %v4516_v15 = vcombine.low %v4160_v50, %v4161_v30  ;;  %v5541_v35 = vadd.f32 %v7264_v56, %v7157_v29  ;;  %v4531_v51 = vrot.slane %v4515_v10, %v6452_v32  ;;  %v5068_v42 = vsel %vm2052_vm2, %v4474_v14, -inf  ;;  %v7406_v18 = vpop.f32.mrb[24].mxu1 }
 0x16e   : > { %7818 = vst [vmem:[#allocation12_spill] sm:$0xff] %v7392_v63  ;;  %v4524_v4 = vrot.slane %v4514_v27, %v6452_v32  ;;  %v7819_v9 = vcombine.low %v7138_v16, %v7141_v52  ;;  %v4498_v1 = vcombine.low %v4483_v37, %v4490_v38  ;;  %v6119_v55 = vpop.f32.mrb[25].mxu1  ;;  %v7409_v56 = vpop.f32.mrb[36].mxu0  ;;  %v4512_v43 = vrot.slane %v4497_v5, %v6452_v32 }
 0x16f   : > { %v5599_v20 = vcombine.high %v5541_v35, %v5541_v35  ;;  %v5623_v48 = vmax.f32 %v5541_v35, 0.0  ;;  %v4538_v31 = vrot.slane %v4516_v15, %v6452_v32  ;;  %v7414_v2 = vpop.f32.mrb[26].mxu1  ;;  %v7421_v23 = vadd.f32 %v7272_v34, %v7164_v33 }
 0x170   : > { %v3339_v46 = vadd.f32 %v7338_v22, %v7819_v9  ;;  %v5574_v22 = vpop.f32.mrb[37].mxu0  ;;  %v4505_v45 = vrot.slane %v4498_v1, %v6452_v32  ;;  %v7417_v50 = vcombine.low %v4524_v4, %v4531_v51  ;;  %v6120_v41 = vpop.f32.mrb[27].mxu1  ;;  %v7820_v38 = vcombine.low %v7144_v61, %v7149_v24 }
 0x171   : > { %v5624_v30 = vmax.f32 %v5599_v20, 0.0  ;;  %v7423_v27 = vpop.f32.mrb[38].mxu0  ;;  %v5625_v9 = vmax.f32 %v7421_v23, 0.0  ;;  %v7434_v34 = vadd.f32 %v7301_v28, %v7173_v60 }
 0x172   : > { %v3585_v14 = vcombine.high %v3339_v46, %v3339_v46  ;;  %v3592_v6 = vrot.slane %v3339_v46, %v6452_v32  ;;  %v3342_v15 = vadd.f32 %v7350_v17, %v7820_v38  ;;  %v5577_v35 = vpop.f32.mrb[39].mxu0  ;;  %v4513_v4 = vcombine.low %v4505_v45, %v4512_v43 }
 0x173   : > { %v5663_v51 = vcombine.low %v5623_v48, %v5624_v30  ;;  %v5600_v48 = vcombine.high %v7421_v23, %v7421_v23 }
 0x174   : > { %v3599_v5 = vrot.slane %v3585_v14, %v6452_v32  ;;  %v3600_v10 = vcombine.high %v3592_v6, %v3592_v6  ;;  %v3608_v37 = vrot.slane %v3592_v6, %v6452_v32  ;;  %v4554_v14 = vrot.slane %v7417_v50, %v6452_v32 }
 0x175   : > { %v5069_v17 = vsel %vm5059_vm4, %v4513_v4, -inf  ;;  %v5679_v43 = vsel %vm2052_vm2, %v5663_v51, -inf  ;;  %v3634_v23 = vcombine.high %v3342_v15, %v3342_v15 }
 0x176   : > { %v3601_v46 = vcombine.high %v3599_v5, %v3599_v5  ;;  %v3615_v1 = vrot.slane %v3599_v5, %v6452_v32  ;;  %v3622_v20 = vrot.slane %v3600_v10, %v6452_v32  ;;  %v3630_v55 = vcombine.high %v3608_v37, %v3608_v37 }
 0x177   : > { %v5070_v6 = vmax.f32 %v5068_v42, %v5069_v17  ;;  %v4162_v30 = vmax.f32 %v3608_v37, 0.0  ;;  %v5681_v10 = vsel %vm5680_vm5, %v5625_v9, -inf }
 0x178   : > { %v3629_v28 = vrot.slane %v3601_v46, %v6452_v32  ;;  %v3631_v22 = vcombine.high %v3615_v1, %v3615_v1  ;;  %v3632_v45 = vcombine.high %v3622_v20, %v3622_v20  ;;  %v4163_v41 = vmax.f32 %v3622_v20, 0.0 }
 0x179   : > { %v4164_v5 = vmax.f32 %v3630_v55, 0.0  ;;  %v5071_v38 = vrot.slane %v5070_v6, 4  ;;  %v4166_v50 = vmax.f32 %v3615_v1, 0.0  ;;  %v5682_v19 = vmax.f32 %v5679_v43, %v5681_v10  ;;  %v7447_v17 = vpop.f32.mrb[40].mxu0 }
 0x17a   : > { %v4165_v35 = vmax.f32 %v3632_v45, 0.0  ;;  %v4167_v58 = vmax.f32 %v3629_v28, 0.0  ;;  %v4168_v4 = vmax.f32 %v3631_v22, 0.0  ;;  %v4517_v36 = vcombine.low %v4162_v30, %v4163_v41  ;;  %v7452_v1 = vpop.f32.mrb[28].mxu1  ;;  %v5582_v22 = vpop.f32.mrb[41].mxu0 }
 0x17b   : > { %v3633_v25 = vcombine.high %v3629_v28, %v3629_v28  ;;  %v3641_v46 = vrot.slane %v3342_v15, %v6452_v32  ;;  %v5683_v9 = vrot.slane %v5682_v19, 4  ;;  %v3648_v55 = vrot.slane %v3634_v23, %v6452_v32  ;;  %v6123_v15 = vpop.f32.mrb[29].mxu1  ;;  %v7458_v30 = vpop.f32.mrb[42].mxu0 }
 0x17c   : > { %v4563_v51 = vcombine.low %v4164_v5, %v4165_v35  ;;  %v4564_v42 = vcombine.low %v4166_v50, %v4167_v58  ;;  %v4545_v37 = vrot.slane %v4517_v36, %v6452_v32  ;;  %v4585_v20 = vrot.slane %v4168_v4, %v6452_v32  ;;  %v7461_v35 = vpop.f32.mrb[30].mxu1  ;;  %v5585_v50 = vpop.f32.mrb[43].mxu0 }
 0x17d   : > { %v7454_v45 = vmax.f32 %v5070_v6, %v5071_v38  ;;  %v3649_v28 = vcombine.high %v3641_v46, %v3641_v46  ;;  %v5684_v5 = vmax.f32 %v5682_v19, %v5683_v9  ;;  %v3650_v10 = vcombine.high %v3648_v55, %v3648_v55 }
 0x17e   : > { %v4571_v43 = vrot.slane %v4563_v51, %v6452_v32  ;;  %v4578_v58 = vrot.slane %v4564_v42, %v6452_v32  ;;  %v4547_v41 = vcombine.low %v4538_v31, %v4545_v37  ;;  %v4600_v36 = vrot.slane %v4585_v20, %v6452_v32  ;;  %v6124_v51 = vpop.f32.mrb[31].mxu1 }
 0x17f   : > { %v3657_v6 = vrot.slane %v3641_v46, %v6452_v32  ;;  %v3664_v38 = vrot.slane %v3648_v55, %v6452_v32  ;;  %v3671_v23 = vrot.slane %v3649_v28, %v6452_v32  ;;  %v5685_v22 = vrot.slane %v5684_v5, 2 }
 0x180   : > { %v4586_v4 = vcombine.low %v4571_v43, %v4578_v58  ;;  %v4561_v42 = vrot.slane %v4547_v41, %v6452_v32  ;;  %v3678_v31 = vrot.slane %v3650_v10, %v6452_v32  ;;  %v4169_v37 = vmax.f32 %v3633_v25, 0.0 }
 0x181   : > { %v3679_v20 = vcombine.high %v3657_v6, %v3657_v6  ;;  %v3680_v9 = vcombine.high %v3664_v38, %v3664_v38  ;;  %v3681_v15 = vcombine.high %v3671_v23, %v3671_v23  ;;  %v5626_v43 = vmax.f32 %v5600_v48, 0.0 }
 0x182   : > { %v4593_v19 = vrot.slane %v4586_v4, %v6452_v32  ;;  %v4562_v50 = vcombine.low %v4554_v14, %v4561_v42  ;;  %v5686_v58 = vmax.f32 %v5684_v5, %v5685_v22  ;;  %v4170_v46 = vmax.f32 %v3657_v6, 0.0  ;;  %v7471_v25 = vpop.f32.mrb[32].mxu1 }
 0x183   : > { %v4171_v55 = vmax.f32 %v3671_v23, 0.0  ;;  %v4172_v44 = vmax.f32 %v3679_v20, 0.0  ;;  %v4173_v28 = vmax.f32 %v3681_v15, 0.0  ;;  %v5073_v51 = vrot.slane %v7454_v45, 2  ;;  %v6127_v48 = vpop.f32.mrb[33].mxu1 }
 0x184   : > { %v4601_v63 = vcombine.low %v4593_v19, %v4600_v36  ;;  %v5077_v41 = vsel %vm2052_vm2, %v4562_v50, -inf  ;;  %v4174_v40 = vmax.f32 %v3664_v38, 0.0  ;;  %v4175_v10 = vmax.f32 %v3678_v31, 0.0  ;;  %v3373_v42 = vpop.f32.mrb[34].mxu1 }
 0x185   : > { %v4176_v49 = vmax.f32 %v3680_v9, 0.0  ;;  %v4602_v3 = vcombine.low %v4169_v37, %v4170_v46  ;;  %v4603_v14 = vcombine.low %v4171_v55, %v4172_v44  ;;  %v5687_v6 = vrot.slane %v5686_v58, 1  ;;  %v6128_v15 = vpop.f32.mrb[35].mxu1 }
 0x186   : > { %v5078_v4 = vsel %vm5059_vm4, %v4601_v63, -inf  ;;  %v4604_v36 = vcombine.low %v4173_v28, %v4174_v40  ;;  %v5601_v23 = vcombine.high %v7434_v34, %v7434_v34  ;;  %v5627_v20 = vmax.f32 %v7434_v34, 0.0 }
 0x187   : > { %v5079_v5 = vmax.f32 %v5077_v41, %v5078_v4  ;;  %v4605_v22 = vcombine.low %v4175_v10, %v4176_v49  ;;  %v4612_v19 = vrot.slane %v4602_v3, %v6452_v32  ;;  %v4619_v38 = vrot.slane %v4603_v14, %v6452_v32 }
 0x188   : > { %v4626_v37 = vrot.slane %v4604_v36, %v6452_v32  ;;  %v5628_v44 = vmax.f32 %v5601_v23, 0.0  ;;  %v5552_v9 = vadd.f32 %v7303_v59, %v7157_v29  ;;  %v5664_v46 = vcombine.low %v5626_v43, %v5627_v20 }
 0x189   : > { %v5080_v63 = vrot.slane %v5079_v5, 4  ;;  %v4633_v40 = vrot.slane %v4605_v22, %v6452_v32  ;;  %v4634_v50 = vcombine.low %v4612_v19, %v4619_v38  ;;  %v7821_v49 = vcombine.low %v7144_v61, %v7103_v0 }
 0x18a   : > { %v7487_v55 = vmax.f32 %v5686_v58, %v5687_v6  ;;  %v3682_v34 = vcombine.high %v3678_v31, %v3678_v31  ;;  %v5690_v28 = vsel %vm5680_vm5, %v5628_v44, -inf  ;;  %v5602_v41 = vcombine.high %v5552_v9, %v5552_v9 }
 0x18b   : > { %v3347_v3 = vadd.f32 %v7365_v57, %v7821_v49  ;;  %v4635_v10 = vcombine.low %v4626_v37, %v4633_v40  ;;  %v4642_v4 = vrot.slane %v4634_v50, %v6452_v32  ;;  %v5689_v59 = vsel %vm2052_vm2, %v5664_v46, -inf }
 0x18c   : > { %v7492_v48 = vmax.f32 %v5079_v5, %v5080_v63  ;;  %v5691_v43 = vmax.f32 %v5689_v59, %v5690_v28  ;;  %v5629_v36 = vmax.f32 %v5552_v9, 0.0  ;;  %v5630_v58 = vmax.f32 %v5602_v41, 0.0 }
 0x18d   : > { %v3683_v14 = vcombine.high %v3347_v3, %v3347_v3  ;;  %v3690_v23 = vrot.slane %v3347_v3, %v6452_v32  ;;  %v4649_v57 = vrot.slane %v4635_v10, %v6452_v32  ;;  %v5557_v6 = vadd.f32 %v7340_v54, %v7164_v33 }
 0x18e   : > { %v5692_v42 = vrot.slane %v5691_v43, 4  ;;  %v4177_v38 = vmax.f32 %v3682_v34, 0.0  ;;  %v7822_v63 = vcombine.low %v7109_v53, %v7103_v0  ;;  %v5665_v54 = vcombine.low %v5629_v36, %v5630_v58 }
 0x18f   : > { %v3697_v31 = vrot.slane %v3683_v14, %v6452_v32  ;;  %v3698_v22 = vcombine.high %v3690_v23, %v3690_v23  ;;  %v3706_v19 = vrot.slane %v3690_v23, %v6452_v32  ;;  %v4650_v20 = vcombine.low %v4642_v4, %v4649_v57 }
 0x190   : > { %v3350_v37 = vadd.f32 %v7369_v47, %v7822_v63  ;;  %v5693_v44 = vmax.f32 %v5691_v43, %v5692_v42  ;;  %v5603_v3 = vcombine.high %v5557_v6, %v5557_v6  ;;  %v5631_v23 = vmax.f32 %v5557_v6, 0.0 }
 0x191   : > { %v3699_v5 = vcombine.high %v3697_v31, %v3697_v31  ;;  %v3713_v15 = vrot.slane %v3697_v31, %v6452_v32  ;;  %v3720_v9 = vrot.slane %v3698_v22, %v6452_v32  ;;  %v3728_v40 = vcombine.high %v3706_v19, %v3706_v19 }
 0x192   : > { %v4178_v50 = vmax.f32 %v3706_v19, 0.0  ;;  %v5694_v34 = vrot.slane %v5693_v44, 2 }
 0x193   : > { %v3727_v46 = vrot.slane %v3699_v5, %v6452_v32  ;;  %v3729_v49 = vcombine.high %v3713_v15, %v3713_v15  ;;  %v3730_v28 = vcombine.high %v3720_v9, %v3720_v9  ;;  %v4179_v41 = vmax.f32 %v3720_v9, 0.0 }
 0x194   : > { %v4180_v10 = vmax.f32 %v3728_v40, 0.0  ;;  %v4182_v59 = vmax.f32 %v3713_v15, 0.0  ;;  %v4651_v0 = vcombine.low %v4177_v38, %v4178_v50  ;;  %v5695_v53 = vmax.f32 %v5693_v44, %v5694_v34 }
 0x195   : > { %v3731_v4 = vcombine.high %v3727_v46, %v3727_v46  ;;  %v4183_v14 = vmax.f32 %v3727_v46, 0.0  ;;  %v4181_v47 = vmax.f32 %v3730_v28, 0.0  ;;  %v4184_v57 = vmax.f32 %v3729_v49, 0.0 }
 0x196   : > { %v4652_v43 = vcombine.low %v4179_v41, %v4180_v10  ;;  %v4659_v36 = vrot.slane %v4651_v0, %v6452_v32  ;;  %v5696_v42 = vrot.slane %v5695_v53, 1  ;;  %v5698_v5 = vsel %vm2052_vm2, %v5665_v54, -inf }
 0x197   : > { %v4185_v31 = vmax.f32 %v3731_v4, 0.0  ;;  %v4690_v58 = vcombine.low %v4182_v59, %v4183_v14  ;;  %v4673_v19 = vrot.slane %v4181_v47, %v6452_v32  ;;  %v5086_v15 = vsel %vm2052_vm2, %v4650_v20, -inf }
 0x198   : > { %v4666_v22 = vrot.slane %v4652_v43, %v6452_v32  ;;  %v5699_v38 = vsel %vm5680_vm5, %v5631_v23, -inf  ;;  %v3732_v44 = vcombine.high %v3350_v37, %v3350_v37  ;;  %v5632_v40 = vmax.f32 %v5603_v3, 0.0 }
 0x199   : > { %v4691_v63 = vcombine.low %v4184_v57, %v4185_v31  ;;  %v4700_v6 = vrot.slane %v4690_v58, %v6452_v32  ;;  %v5700_v50 = vmax.f32 %v5698_v5, %v5699_v38  ;;  %v3739_v49 = vrot.slane %v3350_v37, %v6452_v32 }
 0x19a   : > { %v4674_v9 = vcombine.low %v4659_v36, %v4666_v22  ;;  %v3746_v34 = vrot.slane %v3732_v44, %v6452_v32  ;;  %v5560_v54 = vadd.f32 %v7352_v21, %v7173_v60  ;;  %v7519_v28 = vmax.f32 %v5695_v53, %v5696_v42 }
 0x19b   : > { %v4707_v46 = vrot.slane %v4691_v63, %v6452_v32  ;;  %v4688_v41 = vrot.slane %v4673_v19, %v6452_v32  ;;  %v5701_v10 = vrot.slane %v5700_v50, 4  ;;  %v3747_v4 = vcombine.high %v3739_v49, %v3739_v49 }
 0x19c   : > { %v4681_v20 = vrot.slane %v4674_v9, %v6452_v32  ;;  %v3748_v59 = vcombine.high %v3746_v34, %v3746_v34  ;;  %v3755_v3 = vrot.slane %v3739_v49, %v6452_v32  ;;  %v3270_v14 = vcombine.low %v7114_v7, %v7117_v8 }
 0x19d   : > { %v4722_v0 = vcombine.low %v4700_v6, %v4707_v46  ;;  %v5702_v47 = vmax.f32 %v5700_v50, %v5701_v10  ;;  %v3762_v43 = vrot.slane %v3746_v34, %v6452_v32  ;;  %v3769_v21 = vrot.slane %v3747_v4, %v6452_v32 }
 0x19e   : > { %v4689_v37 = vcombine.low %v4681_v20, %v4688_v41  ;;  %v3776_v53 = vrot.slane %v3748_v59, %v6452_v32  ;;  %v3777_v23 = vcombine.high %v3755_v3, %v3755_v3  ;;  %v5604_v57 = vcombine.high %v5560_v54, %v5560_v54 }
 0x19f   : > { %v5703_v36 = vrot.slane %v5702_v47, 2  ;;  %v3778_v58 = vcombine.high %v3762_v43, %v3762_v43  ;;  %v4186_v42 = vmax.f32 %v3755_v3, 0.0  ;;  %v3779_v19 = vcombine.high %v3769_v21, %v3769_v21 }
 0x1a0   : > { %v5087_v31 = vsel %vm5059_vm4, %v4689_v37, -inf  ;;  %v3780_v7 = vcombine.high %v3776_v53, %v3776_v53  ;;  %v4187_v8 = vmax.f32 %v3769_v21, 0.0  ;;  %v4188_v63 = vmax.f32 %v3777_v23, 0.0 }
 0x1a1   : > { %v7530_v22 = vmax.f32 %v5086_v15, %v5087_v31  ;;  %v5704_v5 = vmax.f32 %v5702_v47, %v5703_v36  ;;  %v4190_v38 = vmax.f32 %v3762_v43, 0.0  ;;  %v4191_v44 = vmax.f32 %v3776_v53, 0.0 }
 0x1a2   : > { %v4189_v9 = vmax.f32 %v3779_v19, 0.0  ;;  %v4192_v6 = vmax.f32 %v3778_v58, 0.0  ;;  %v4193_v50 = vmax.f32 %v3780_v7, 0.0  ;;  %v4692_v46 = vcombine.low %v4186_v42, %v4187_v8 }
 0x1a3   : > { %v5705_v49 = vrot.slane %v5704_v5, 1  ;;  %v4739_v34 = vcombine.low %v4190_v38, %v4191_v44  ;;  %v5633_v20 = vmax.f32 %v5560_v54, 0.0  ;;  %v5634_v41 = vmax.f32 %v5604_v57, 0.0 }
 0x1a4   : > { %v4693_v10 = vcombine.low %v4188_v63, %v4189_v9  ;;  %v4740_v4 = vcombine.low %v4192_v6, %v4193_v50  ;;  %v3355_v15 = vadd.f32 %v7406_v18, %v3270_v14  ;;  %v5565_v59 = vadd.f32 %v7367_v26, %v7157_v29 }
 0x1a5   : > { %v4730_v3 = vrot.slane %v4722_v0, %v6452_v32  ;;  %v4714_v37 = vrot.slane %v4692_v46, %v6452_v32  ;;  %v5666_v47 = vcombine.low %v5632_v40, %v5633_v20  ;;  %v5708_v43 = vsel %vm5680_vm5, %v5634_v41, -inf }
 0x1a6   : > { %v4721_v21 = vrot.slane %v4693_v10, %v6452_v32  ;;  %v4754_v53 = vrot.slane %v4740_v4, %v6452_v32  ;;  %v3781_v54 = vcombine.high %v3355_v15, %v3355_v15  ;;  %v3788_v23 = vrot.slane %v3355_v15, %v6452_v32 }
 0x1a7   : > { %v7541_v57 = vmax.f32 %v5704_v5, %v5705_v49  ;;  %v4747_v18 = vrot.slane %v4739_v34, %v6452_v32  ;;  %v5707_v26 = vsel %vm2052_vm2, %v5666_v47, -inf  ;;  %v3271_v14 = vcombine.low %v7120_v11, %v7123_v12 }
 0x1a8   : > { %v4723_v0 = vcombine.low %v4714_v37, %v4721_v21  ;;  %v5709_v40 = vmax.f32 %v5707_v26, %v5708_v43  ;;  %v3795_v31 = vrot.slane %v3781_v54, %v6452_v32  ;;  %v5605_v36 = vcombine.high %v5565_v59, %v5565_v59 }
 0x1a9   : > { %v4762_v58 = vcombine.low %v4747_v18, %v4754_v53  ;;  %v3796_v42 = vcombine.high %v3788_v23, %v3788_v23  ;;  %v3804_v19 = vrot.slane %v3788_v23, %v6452_v32  ;;  %v5635_v7 = vmax.f32 %v5565_v59, 0.0 }
 0x1aa   : > { %v4737_v8 = vrot.slane %v4723_v0, %v6452_v32  ;;  %v5710_v5 = vrot.slane %v5709_v40, 4  ;;  %v3797_v63 = vcombine.high %v3795_v31, %v3795_v31  ;;  %v3811_v38 = vrot.slane %v3795_v31, %v6452_v32 }
 0x1ab   : > { %v3818_v44 = vrot.slane %v3796_v42, %v6452_v32  ;;  %v3826_v9 = vcombine.high %v3804_v19, %v3804_v19  ;;  %v4194_v11 = vmax.f32 %v3804_v19, 0.0  ;;  %v3358_v12 = vadd.f32 %v7414_v2, %v3271_v14 }
 0x1ac   : > { %v4738_v6 = vcombine.low %v4730_v3, %v4737_v8  ;;  %v5711_v50 = vmax.f32 %v5709_v40, %v5710_v5  ;;  %v3825_v46 = vrot.slane %v3797_v63, %v6452_v32  ;;  %v3827_v49 = vcombine.high %v3811_v38, %v3811_v38 }
 0x1ad   : > { %v3828_v34 = vcombine.high %v3818_v44, %v3818_v44  ;;  %v4195_v20 = vmax.f32 %v3818_v44, 0.0  ;;  %v4196_v41 = vmax.f32 %v3826_v9, 0.0  ;;  %v5636_v10 = vmax.f32 %v5605_v36, 0.0 }
 0x1ae   : > { %v5712_v4 = vrot.slane %v5711_v50, 2  ;;  %v4199_v15 = vmax.f32 %v3825_v46, 0.0  ;;  %v4200_v59 = vmax.f32 %v3827_v49, 0.0  ;;  %v4769_v37 = vrot.slane %v4762_v58, %v6452_v32 }
 0x1af   : > { %v4197_v47 = vmax.f32 %v3828_v34, 0.0  ;;  %v4198_v43 = vmax.f32 %v3811_v38, 0.0  ;;  %v4761_v21 = vrot.slane %v4194_v11, %v6452_v32  ;;  %v4778_v53 = vcombine.low %v4195_v20, %v4196_v41 }
 0x1b0   : > { %v5713_v2 = vmax.f32 %v5711_v50, %v5712_v4  ;;  %v3829_v3 = vcombine.high %v3825_v46, %v3825_v46  ;;  %v4780_v54 = vcombine.low %v4199_v15, %v4200_v59  ;;  %v3830_v23 = vcombine.high %v3358_v12, %v3358_v12 }
 0x1b1   : > { %v4776_v18 = vrot.slane %v4761_v21, %v6452_v32  ;;  %v4779_v26 = vcombine.low %v4197_v47, %v4198_v43  ;;  %v5095_v14 = vsel %vm2052_vm2, %v4738_v6, -inf  ;;  %v3837_v0 = vrot.slane %v3358_v12, %v6452_v32 }
 0x1b2   : > { %v5714_v40 = vrot.slane %v5713_v2, 1  ;;  %v4788_v31 = vrot.slane %v4778_v53, %v6452_v32  ;;  %v5667_v36 = vcombine.low %v5635_v7, %v5636_v10  ;;  %v3844_v58 = vrot.slane %v3830_v23, %v6452_v32 }
 0x1b3   : > { %v4777_v42 = vcombine.low %v4769_v37, %v4776_v18  ;;  %v4795_v19 = vrot.slane %v4779_v26, %v6452_v32  ;;  %v3845_v8 = vcombine.high %v3837_v0, %v3837_v0  ;;  %v3853_v5 = vrot.slane %v3837_v0, %v6452_v32 }
 0x1b4   : > { %v4802_v63 = vrot.slane %v4780_v54, %v6452_v32  ;;  %v3846_v38 = vcombine.high %v3844_v58, %v3844_v58  ;;  %v3860_v44 = vrot.slane %v3844_v58, %v6452_v32  ;;  %v4201_v9 = vmax.f32 %v3829_v3, 0.0 }
 0x1b5   : > { %v4810_v11 = vcombine.low %v4788_v31, %v4795_v19  ;;  %v5096_v12 = vsel %vm5059_vm4, %v4777_v42, -inf  ;;  %v3867_v6 = vrot.slane %v3845_v8, %v6452_v32  ;;  %v3875_v7 = vcombine.high %v3853_v5, %v3853_v5 }
 0x1b6   : > { %v7567_v50 = vmax.f32 %v5095_v14, %v5096_v12  ;;  %v3874_v46 = vrot.slane %v3846_v38, %v6452_v32  ;;  %v3876_v49 = vcombine.high %v3860_v44, %v3860_v44  ;;  %v5568_v34 = vadd.f32 %v7371_v39, %v7164_v33 }
 0x1b7   : > { %v3877_v20 = vcombine.high %v3867_v6, %v3867_v6  ;;  %v4202_v41 = vmax.f32 %v3853_v5, 0.0  ;;  %v4203_v10 = vmax.f32 %v3867_v6, 0.0  ;;  %v4204_v4 = vmax.f32 %v3875_v7, 0.0 }
 0x1b8   : > { %v7572_v15 = vmax.f32 %v5713_v2, %v5714_v40  ;;  %v4818_v59 = vrot.slane %v4810_v11, %v6452_v32  ;;  %v3878_v37 = vcombine.high %v3874_v46, %v3874_v46  ;;  %v4207_v47 = vmax.f32 %v3874_v46, 0.0 }
 0x1b9   : > { %v4205_v43 = vmax.f32 %v3877_v20, 0.0  ;;  %v4206_v21 = vmax.f32 %v3860_v44, 0.0  ;;  %v4781_v53 = vcombine.low %v4201_v9, %v4202_v41  ;;  %v4827_v3 = vcombine.low %v4203_v10, %v4204_v4 }
 0x1ba   : > { %v4208_v54 = vmax.f32 %v3876_v49, 0.0  ;;  %v4209_v23 = vmax.f32 %v3878_v37, 0.0  ;;  %v5606_v18 = vcombine.high %v5568_v34, %v5568_v34  ;;  %v5637_v26 = vmax.f32 %v5568_v34, 0.0 }
 0x1bb   : > { %v5098_v39 = vrot.slane %v7567_v50, 4  ;;  %v4809_v14 = vrot.slane %v4781_v53, %v6452_v32  ;;  %v4828_v0 = vcombine.low %v4205_v43, %v4206_v21  ;;  %v5716_v2 = vsel %vm2052_vm2, %v5667_v36, -inf }
 0x1bc   : > { %v4835_v40 = vrot.slane %v4827_v3, %v6452_v32  ;;  %v7580_v31 = vrot.slane %v4207_v47, %v6452_v32  ;;  %v4866_v58 = vcombine.low %v4208_v54, %v4209_v23  ;;  %v5717_v42 = vsel %vm5680_vm5, %v5637_v26, -inf }
 0x1bd   : > { %v4811_v19 = vcombine.low %v4802_v63, %v4809_v14  ;;  %v4842_v8 = vrot.slane %v4828_v0, %v6452_v32  ;;  %v5718_v5 = vmax.f32 %v5716_v2, %v5717_v42  ;;  %v3272_v38 = vcombine.low %v7126_v13, %v7138_v16 }
 0x1be   : > { %v5638_v44 = vmax.f32 %v5606_v18, 0.0  ;;  %v5573_v9 = vadd.f32 %v7409_v56, %v7173_v60  ;;  %v3273_v36 = vcombine.low %v7141_v52, %v7144_v61  ;;  %v7592_v11 = vadd.f32 %v7423_v27, %v7157_v29 }
 0x1bf   : > { %v4825_v12 = vrot.slane %v4811_v19, %v6452_v32  ;;  %v4850_v63 = vcombine.low %v4835_v40, %v4842_v8  ;;  %v5719_v6 = vrot.slane %v5718_v5, 4  ;;  %v3363_v7 = vadd.f32 %v7452_v1, %v3272_v38 }
 0x1c0   : > { %v4864_v13 = vrot.slane %v7580_v31, %v6452_v32  ;;  %v5607_v16 = vcombine.high %v5573_v9, %v5573_v9  ;;  %v5639_v46 = vmax.f32 %v5573_v9, 0.0  ;;  %v3366_v56 = vadd.f32 %v7461_v35, %v3273_v36 }
 0x1c1   : > { %v7599_v49 = vcombine.low %v4818_v59, %v4825_v12  ;;  %v4876_v52 = vrot.slane %v4866_v58, %v6452_v32  ;;  %v5720_v34 = vmax.f32 %v5718_v5, %v5719_v6  ;;  %v3879_v29 = vcombine.high %v3363_v7, %v3363_v7 }
 0x1c2   : > { %v3886_v27 = vrot.slane %v3363_v7, %v6452_v32  ;;  %v5640_v20 = vmax.f32 %v5607_v16, 0.0  ;;  %v5668_v41 = vcombine.low %v5638_v44, %v5639_v46  ;;  %v5608_v1 = vcombine.high %v7592_v11, %v7592_v11 }
 0x1c3   : > { %v4857_v10 = vrot.slane %v4850_v63, %v6452_v32  ;;  %v5721_v4 = vrot.slane %v5720_v34, 2  ;;  %v3893_v37 = vrot.slane %v3879_v29, %v6452_v32  ;;  %v3928_v47 = vcombine.high %v3366_v56, %v3366_v56 }
 0x1c4   : > { %v3894_v35 = vcombine.high %v3886_v27, %v3886_v27  ;;  %v3902_v59 = vrot.slane %v3886_v27, %v6452_v32  ;;  %v5725_v43 = vsel %vm2052_vm2, %v5668_v41, -inf  ;;  %v5726_v21 = vsel %vm5680_vm5, %v5640_v20, -inf }
 0x1c5   : > { %v5722_v53 = vmax.f32 %v5720_v34, %v5721_v4  ;;  %v3895_v3 = vcombine.high %v3893_v37, %v3893_v37  ;;  %v3909_v54 = vrot.slane %v3893_v37, %v6452_v32  ;;  %v5727_v23 = vmax.f32 %v5725_v43, %v5726_v21 }
 0x1c6   : > { %v3916_v18 = vrot.slane %v3894_v35, %v6452_v32  ;;  %v3924_v26 = vcombine.high %v3902_v59, %v3902_v59  ;;  %v4210_v14 = vmax.f32 %v3902_v59, 0.0  ;;  %v3935_v0 = vrot.slane %v3366_v56, %v6452_v32 }
 0x1c7   : > { %v5723_v2 = vrot.slane %v5722_v53, 1  ;;  %v3923_v40 = vrot.slane %v3895_v3, %v6452_v32  ;;  %v3925_v31 = vcombine.high %v3909_v54, %v3909_v54  ;;  %v3942_v58 = vrot.slane %v3928_v47, %v6452_v32 }
 0x1c8   : > { %v3926_v42 = vcombine.high %v3916_v18, %v3916_v18  ;;  %v4211_v19 = vmax.f32 %v3916_v18, 0.0  ;;  %v4214_v8 = vmax.f32 %v3909_v54, 0.0  ;;  %v5728_v5 = vrot.slane %v5727_v23, 4 }
 0x1c9   : > { %v3927_v38 = vcombine.high %v3923_v40, %v3923_v40  ;;  %v4212_v44 = vmax.f32 %v3924_v26, 0.0  ;;  %v4215_v9 = vmax.f32 %v3923_v40, 0.0  ;;  %v4216_v36 = vmax.f32 %v3925_v31, 0.0 }
 0x1ca   : > { %v4213_v12 = vmax.f32 %v3926_v42, 0.0  ;;  %v4867_v63 = vcombine.low %v4210_v14, %v4211_v19  ;;  %v5729_v6 = vmax.f32 %v5727_v23, %v5728_v5  ;;  %v3943_v7 = vcombine.high %v3935_v0, %v3935_v0 }
 0x1cb   : > { %v4217_v16 = vmax.f32 %v3927_v38, 0.0  ;;  %v4869_v46 = vcombine.low %v4214_v8, %v4215_v9  ;;  %v3944_v56 = vcombine.high %v3942_v58, %v3942_v58  ;;  %v3951_v34 = vrot.slane %v3935_v0, %v6452_v32 }
 0x1cc   : > { %v4868_v29 = vcombine.low %v4212_v44, %v4213_v12  ;;  %v4883_v27 = vrot.slane %v4867_v63, %v6452_v32  ;;  %v5730_v20 = vrot.slane %v5729_v6, 2  ;;  %v3958_v41 = vrot.slane %v3942_v58, %v6452_v32 }
 0x1cd   : > { %v4897_v4 = vrot.slane %v4869_v46, %v6452_v32  ;;  %v4915_v37 = vcombine.low %v4216_v36, %v4217_v16  ;;  %v3965_v47 = vrot.slane %v3943_v7, %v6452_v32  ;;  %v3972_v35 = vrot.slane %v3944_v56, %v6452_v32 }
 0x1ce   : > { %v7621_v59 = vcombine.low %v4857_v10, %v4864_v13  ;;  %v4890_v43 = vrot.slane %v4868_v29, %v6452_v32  ;;  %v4898_v21 = vcombine.low %v4876_v52, %v4883_v27  ;;  %v3973_v3 = vcombine.high %v3951_v34, %v3951_v34 }
 0x1cf   : > { %v7624_v54 = vmax.f32 %v5722_v53, %v5723_v2  ;;  %v7626_v23 = vmax.f32 %v5729_v6, %v5730_v20  ;;  %v3974_v18 = vcombine.high %v3958_v41, %v3958_v41  ;;  %v3975_v26 = vcombine.high %v3965_v47, %v3965_v47 }
 0x1d0   : > { %v4899_v14 = vcombine.low %v4890_v43, %v4897_v4  ;;  %v4906_v0 = vrot.slane %v4898_v21, %v6452_v32  ;;  %v4923_v40 = vrot.slane %v4915_v37, %v6452_v32  ;;  %v3976_v31 = vcombine.high %v3972_v35, %v3972_v35 }
 0x1d1   : > { %v4218_v58 = vmax.f32 %v3951_v34, 0.0  ;;  %v4219_v42 = vmax.f32 %v3965_v47, 0.0  ;;  %v4220_v13 = vmax.f32 %v3973_v3, 0.0  ;;  %v4221_v10 = vmax.f32 %v3975_v26, 0.0 }
 0x1d2   : > { %v4222_v19 = vmax.f32 %v3958_v41, 0.0  ;;  %v4223_v8 = vmax.f32 %v3972_v35, 0.0  ;;  %v4224_v52 = vmax.f32 %v3974_v18, 0.0  ;;  %v5641_v53 = vmax.f32 %v7592_v11, 0.0 }
 0x1d3   : > { %v4913_v2 = vrot.slane %v4899_v14, %v6452_v32  ;;  %v4916_v5 = vcombine.low %v4218_v58, %v4219_v42  ;;  %v4937_v38 = vrot.slane %v4220_v13, %v6452_v32  ;;  %v5642_v44 = vmax.f32 %v5608_v1, 0.0 }
 0x1d4   : > { %v5732_v9 = vrot.slane %v7626_v23, 1  ;;  %v4954_v36 = vcombine.low %v4221_v10, %v4222_v19  ;;  %v3274_v12 = vcombine.low %v7149_v24, %v7144_v61  ;;  %v5581_v63 = vadd.f32 %v7447_v17, %v7164_v33 }
 0x1d5   : > { %v4930_v6 = vrot.slane %v4916_v5, %v6452_v32  ;;  %v4955_v7 = vcombine.low %v4223_v8, %v4224_v52  ;;  %v5669_v16 = vcombine.low %v5641_v53, %v5642_v44  ;;  %v4225_v46 = vmax.f32 %v3976_v31, 0.0 }
 0x1d6   : > { %v4952_v56 = vrot.slane %v4937_v38, %v6452_v32  ;;  %v3371_v34 = vadd.f32 %v7471_v25, %v3274_v12  ;;  %v5609_v11 = vcombine.high %v5581_v63, %v5581_v63  ;;  %v5643_v1 = vmax.f32 %v5581_v63, 0.0 }
 0x1d7   : > { %v4938_v29 = vcombine.low %v4923_v40, %v4930_v6  ;;  %v5734_v27 = vsel %vm2052_vm2, %v5669_v16, -inf  ;;  %v5584_v61 = vadd.f32 %v7458_v30, %v7173_v60  ;;  %v7647_v24 = vcombine.low %v4906_v0, %v4913_v2 }
 0x1d8   : > { %v4964_v33 = vrot.slane %v4954_v36, %v6452_v32  ;;  %v3977_v17 = vcombine.high %v3371_v34, %v3371_v34  ;;  %v3984_v20 = vrot.slane %v3371_v34, %v6452_v32  ;;  %v5644_v41 = vmax.f32 %v5609_v11, 0.0 }
 0x1d9   : > { %v4945_v4 = vrot.slane %v4938_v29, %v6452_v32  ;;  %v5735_v25 = vsel %vm5680_vm5, %v5643_v1, -inf  ;;  %v5610_v37 = vcombine.high %v5584_v61, %v5584_v61  ;;  %v5645_v47 = vmax.f32 %v5584_v61, 0.0 }
 0x1da   : > { %v3991_v35 = vrot.slane %v3977_v17, %v6452_v32  ;;  %v3992_v43 = vcombine.high %v3984_v20, %v3984_v20  ;;  %v4000_v21 = vrot.slane %v3984_v20, %v6452_v32  ;;  %v5736_v60 = vmax.f32 %v5734_v27, %v5735_v25 }
 0x1db   : > { %v7655_v30 = vcombine.low %v4945_v4, %v4952_v56  ;;  %v4971_v3 = vrot.slane %v4955_v7, %v6452_v32  ;;  %v5646_v18 = vmax.f32 %v5610_v37, 0.0  ;;  %v5670_v26 = vcombine.low %v5644_v41, %v5645_v47 }
 0x1dc   : > { %v3993_v14 = vcombine.high %v3991_v35, %v3991_v35  ;;  %v4007_v0 = vrot.slane %v3991_v35, %v6452_v32  ;;  %v4014_v40 = vrot.slane %v3992_v43, %v6452_v32  ;;  %v4022_v31 = vcombine.high %v4000_v21, %v4000_v21 }
 0x1dd   : > { %v4226_v58 = vmax.f32 %v4000_v21, 0.0  ;;  %v5737_v42 = vrot.slane %v5736_v60, 4  ;;  %v5743_v13 = vsel %vm2052_vm2, %v5670_v26, -inf  ;;  %v5744_v10 = vsel %vm5680_vm5, %v5646_v18, -inf }
 0x1de   : > { %v4021_v19 = vrot.slane %v3993_v14, %v6452_v32  ;;  %v4023_v8 = vcombine.high %v4007_v0, %v4007_v0  ;;  %v4024_v52 = vcombine.high %v4014_v40, %v4014_v40  ;;  %v4227_v53 = vmax.f32 %v4014_v40, 0.0 }
 0x1df   : > { %v4228_v2 = vmax.f32 %v4022_v31, 0.0  ;;  %v4230_v5 = vmax.f32 %v4007_v0, 0.0  ;;  %v4956_v38 = vcombine.low %v4225_v46, %v4226_v58  ;;  %v5738_v44 = vmax.f32 %v5736_v60, %v5737_v42 }
 0x1e0   : > { %v4025_v36 = vcombine.high %v4021_v19, %v4021_v19  ;;  %v4229_v12 = vmax.f32 %v4024_v52, 0.0  ;;  %v4231_v63 = vmax.f32 %v4021_v19, 0.0  ;;  %v4232_v6 = vmax.f32 %v4023_v8, 0.0 }
 0x1e1   : > { %v4986_v7 = vcombine.low %v4964_v33, %v4971_v3  ;;  %v4957_v16 = vcombine.low %v4227_v53, %v4228_v2  ;;  %v5739_v56 = vrot.slane %v5738_v44, 2  ;;  %v5745_v34 = vmax.f32 %v5743_v13, %v5744_v10 }
 0x1e2   : > { %v4233_v11 = vmax.f32 %v4025_v36, 0.0  ;;  %v5003_v1 = vcombine.low %v4229_v12, %v4230_v5  ;;  %v5004_v29 = vcombine.low %v4231_v63, %v4232_v6  ;;  %v7823_v27 = vrot.slane %v7387_v62, 2 }
 0x1e3   : > { %v4978_v17 = vrot.slane %v4956_v38, %v6452_v32  ;;  %v4985_v46 = vrot.slane %v4957_v16, %v6452_v32  ;;  %v5746_v20 = vrot.slane %v5745_v34, 4  ;;  %v5074_v41 = vmax.f32 %v7454_v45, %v5073_v51 }
 0x1e4   : > { %v5065_v61 = vmax.f32 %v7387_v62, %v7823_v27  ;;  %v5011_v33 = vrot.slane %v5003_v1, %v6452_v32  ;;  %v5018_v4 = vrot.slane %v5004_v29, %v6452_v32  ;;  %v5025_v25 = vrot.slane %v4233_v11, %v6452_v32 }
 0x1e5   : > { %v4987_v47 = vcombine.low %v4978_v17, %v4985_v46  ;;  %v5747_v35 = vmax.f32 %v5745_v34, %v5746_v20  ;;  %v4994_v62 = vrot.slane %v4986_v7, %v6452_v32  ;;  %v5082_v43 = vrot.slane %v7492_v48, 2 }
 0x1e6   : > { %v5066_v37 = vrot.slane %v5065_v61, 1  ;;  %v5026_v21 = vcombine.low %v5011_v33, %v5018_v4  ;;  %v5740_v60 = vmax.f32 %v5738_v44, %v5739_v56  ;;  %v5075_v3 = vrot.slane %v5074_v41, 1 }
 0x1e7   : > { %v5089_v18 = vrot.slane %v7530_v22, 4  ;;  %v5001_v45 = vrot.slane %v4987_v47, %v6452_v32  ;;  %v5040_v51 = vrot.slane %v5025_v25, %v6452_v32  ;;  %v5083_v14 = vmax.f32 %v7492_v48, %v5082_v43  ;;  %v7824_v43 = vld [vmem:[#allocation6_spill] sm:$0xff] }
 0x1e8   : > { %v5067_v26 = vmax.f32 %v5065_v61, %v5066_v37  ;;  %v5033_v0 = vrot.slane %v5026_v21, %v6452_v32  ;;  %v5099_v31 = vmax.f32 %v7567_v50, %v5098_v39  ;;  %v5104_v58 = vsel %vm2052_vm2, %v7599_v49, -inf }
 0x1e9   : > { %v5090_v40 = vmax.f32 %v7530_v22, %v5089_v18  ;;  %v5748_v42 = vrot.slane %v5747_v35, 2  ;;  %v5002_v13 = vcombine.low %v4994_v62, %v5001_v45  ;;  %v5084_v10 = vrot.slane %v5083_v14, 1 }
 0x1ea   : > { %v5105_v19 = vsel %vm5059_vm4, %v7621_v59, -inf  ;;  %v5041_v8 = vcombine.low %v5033_v0, %v5040_v51  ;;  %v5100_v48 = vrot.slane %v5099_v31, 2  ;;  %v5076_v32 = vmax.f32 %v5074_v41, %v5075_v3 }
 0x1eb   : > { %v5091_v52 = vrot.slane %v5090_v40, 2  ;;  %v5106_v53 = vmax.f32 %v5104_v58, %v5105_v19  ;;  %v5085_v2 = vmax.f32 %v5083_v14, %v5084_v10  ;;  %v5113_v22 = vsel %vm2052_vm2, %v7647_v24, -inf }
 0x1ec   : > { %v5114_v50 = vsel %vm5059_vm4, %v7655_v30, -inf  ;;  %v5101_v49 = vmax.f32 %v5099_v31, %v5100_v48  ;;  %v5122_v44 = vsel %vm2052_vm2, %v5002_v13, -inf  ;;  %v5123_v59 = vsel %vm5059_vm4, %v5041_v8, -inf  ;;  %v7827_v8 = vld [vmem:[#allocation11_spill] sm:$0xff] }
 0x1ed   : > { %v5092_v39 = vmax.f32 %v5090_v40, %v5091_v52  ;;  %v5107_v5 = vrot.slane %v5106_v53, 4  ;;  %v5115_v38 = vmax.f32 %v5113_v22, %v5114_v50  ;;  %v5124_v7 = vmax.f32 %v5122_v44, %v5123_v59  ;;  %v7826_v40 = vld [vmem:[#allocation10_spill] sm:$0xff]  ;;  %v7832_v59 = vld [vmem:[#allocation9_spill] sm:$0xff] }
 0x1ee   : > { %v5102_v12 = vrot.slane %v5101_v49, 1  ;;  %v5783_v11 = vsel %vm5760_vm6, %v5076_v32, %v5067_v26  ;;  %v5733_v1 = vmax.f32 %v7626_v23, %v5732_v9  ;;  %v5741_v29 = vrot.slane %v5740_v60, 1 }
 0x1ef   : > { %v5093_v36 = vrot.slane %v5092_v39, 1  ;;  %v5108_v63 = vmax.f32 %v5106_v53, %v5107_v5  ;;  %v5116_v6 = vrot.slane %v5115_v38, 4  ;;  %v5125_v34 = vrot.slane %v5124_v7, 4 }
 0x1f0   : > { %v5103_v30 = vmax.f32 %v5101_v49, %v5102_v12  ;;  %v5784_v17 = vsel %vm5762_vm7, %v5085_v2, %v5783_v11  ;;  %v5749_v46 = vmax.f32 %v5747_v35, %v5748_v42  ;;  %v5742_v33 = vmax.f32 %v5740_v60, %v5741_v29  ;;  %v7825_v35 = vld [vmem:[#allocation7_spill] sm:$0xff]  ;;  %v7829_v2 = vld [vmem:[#allocation12_spill] sm:$0xff] }
 0x1f1   : > { %v5094_v24 = vmax.f32 %v5092_v39, %v5093_v36  ;;  %v5109_v16 = vrot.slane %v5108_v63, 2  ;;  %v5117_v56 = vmax.f32 %v5115_v38, %v5116_v6  ;;  %v5126_v20 = vmax.f32 %v5124_v7, %v5125_v34  ;;  %v7830_v39 = vld [vmem:[#allocation5_spill] sm:$0xff]  ;;  %v7831_v49 = vld [vmem:[#allocation8_spill] sm:$0xff] }
 0x1f2   : > { %v5801_v4 = vsel %vm5760_vm6, %v7519_v28, %v7487_v55  ;;  %v5750_v62 = vrot.slane %v5749_v46, 1  ;;  %v2113_v21 = vrot.slane %v7824_v43, 2  ;;  %v2120_v3 = vrot.slane %v7825_v35, 4 }
 0x1f3   : > { %v5110_v27 = vmax.f32 %v5108_v63, %v5109_v16  ;;  %v5118_v61 = vrot.slane %v5117_v56, 2  ;;  %v5785_v41 = vsel %vm5764_vm8, %v5094_v24, %v5784_v17  ;;  %v5127_v23 = vrot.slane %v5126_v20, 2 }
 0x1f4   : > { %v5786_v47 = vsel %vm5766_vm9, %v5103_v30, %v5785_v41  ;;  %v5802_v9 = vsel %vm5762_vm7, %v7541_v57, %v5801_v4  ;;  %v5751_v60 = vmax.f32 %v5749_v46, %v5750_v62  ;;  %v2121_v26 = vmax.f32 %v7825_v35, %v2120_v3 }
 0x1f5   : > { %v5111_v25 = vrot.slane %v5110_v27, 1  ;;  %v5119_v37 = vmax.f32 %v5117_v56, %v5118_v61  ;;  %v5803_v51 = vsel %vm5764_vm8, %v7572_v15, %v5802_v9  ;;  %v5128_v55 = vmax.f32 %v5126_v20, %v5127_v23 }
 0x1f6   : > { %v5804_v28 = vsel %vm5766_vm9, %v7624_v54, %v5803_v51  ;;  %v2088_v31 = vrot.slane %v7826_v40, 1  ;;  %v2114_v13 = vmax.f32 %v7824_v43, %v2113_v21  ;;  %v2122_v15 = vrot.slane %v2121_v26, 2 }
 0x1f7   : > { %v5112_v18 = vmax.f32 %v5110_v27, %v5111_v25  ;;  %v5120_v45 = vrot.slane %v5119_v37, 1  ;;  %v5805_v0 = vsel %vm5768_vm10, %v5733_v1, %v5804_v28  ;;  %v5129_v58 = vrot.slane %v5128_v55, 1 }
 0x1f8   : > { %v5806_v42 = vsel %vm5770_vm11, %v5742_v33, %v5805_v0  ;;  %v2089_v54 = vmax.f32 %v7826_v40, %v2088_v31  ;;  %v7828_v52 = vrot.slane %v7827_v8, 2  ;;  %v2123_v32 = vmax.f32 %v2121_v26, %v2122_v15 }
 0x1f9   : > { %v5121_v14 = vmax.f32 %v5119_v37, %v5120_v45  ;;  %v5787_v57 = vsel %vm5768_vm10, %v5112_v18, %v5786_v47  ;;  %v5807_v19 = vsel %vm5772_vm12, %v5751_v60, %v5806_v42  ;;  %v5130_v53 = vmax.f32 %v5128_v55, %v5129_v58 }
 0x1fa   : > { %v2096_v48 = vmax.f32 %v7827_v8, %v7828_v52  ;;  %v2104_v22 = vrot.slane %v7829_v2, 2  ;;  %v5761_v5 = vsel %vm5760_vm6, %v7831_v49, %v7830_v39  ;;  %v2115_v12 = vrot.slane %v2114_v13, 1 }
 0x1fb   : > { %v5788_v10 = vsel %vm5770_vm11, %v5121_v14, %v5787_v57  ;;  %v5763_v36 = vsel %vm5762_vm7, %v7832_v59, %v5761_v5  ;;  %v2124_v7 = vrot.slane %v2123_v32, 1 }
 0x1fc   : > { %v2097_v50 = vrot.slane %v2096_v48, 1  ;;  %v5789_v38 = vsel %vm5772_vm12, %v5130_v53, %v5788_v10  ;;  %v2105_v44 = vmax.f32 %v7829_v2, %v2104_v22  ;;  %v5765_v6 = vsel %vm5764_vm8, %v2089_v54, %v5763_v36 }
 0x1fd   : > { %5790 = vrot.lane.b32.xlu0 %v5789_v38, %s6256_s24  ;;  %v2116_v56 = vmax.f32 %v2114_v13, %v2115_v12  ;;  %v2125_v34 = vmax.f32 %v2123_v32, %v2124_v7  ;;  %s6191_s24 = sshll.u32 %s6258_s23, 4  ;;  %s6192_s24 = int_to_ptr.vmem [resolvable:$false] %s6191_s24 }
 0x1fe   : > { %v2098_v63 = vmax.f32 %v2096_v48, %v2097_v50  ;;  %v2106_v24 = vrot.slane %v2105_v44, 1  ;;  %p6194_p0 = scmp.lt.s32.totalorder %s7746_s14, %s6192_s24 }
 0x200   : > { %v5767_v30 = vsel %vm5766_vm9, %v2098_v63, %v5765_v6  ;;  %v2107_v16 = vmax.f32 %v2105_v44, %v2106_v24 }
 0x201   : > { %5808 = vrot.lane.b32.xlu0 %v5807_v19, %s6257_s25  ;;  %s6193_s25 = scalar_lea.vmem %s6192_s24, 256 }
 0x202   : > { %v5769_v11 = vsel %vm5768_vm10, %v2107_v16, %v5767_v30  ;;  %p6195_p1 = scmp.lt.s32.totalorder %s6193_s25, %s6187_s21 }
 0x203   : > { %v5771_v1 = vsel %vm5770_vm11, %v2116_v56, %v5769_v11 }
 0x204   : > { %v5773_v29 = vsel %vm5772_vm12, %v2125_v34, %v5771_v1  ;;  %p6196_p2 = por %p6195_p1, %p6194_p0 }
 0x206   : > { %p6197_p3 = pnand %p6196_p2, %p6190_p13 }
 0x26f   : > { %v5791_v27 = vpop.permute.xlu0 %5790 }
 0x270   : > { %v5811_v61 = vsel %vm2052_vm2, %v5773_v29, %v5791_v27 }
 0x273   : > { %v5809_v17 = vpop.permute.xlu0 %5808 }
 0x274   : > { %v5813_v46 = vsel %vm5812_vm13, %v5811_v61, %v5809_v17 }
 0x275   : > { %5814 = vst.msk [vmem:[%s364_s16] sm:$0xff] %vm1241_vm1, %v5813_v46 }
 0x276   : > { %6200 = shalt.err (!%p6197_p3)
}
 0x277   : > { %s6201_s26 = scalar_lea.hbm %s7744_s17, 128  ;;  %s6205_s16 = scalar_lea.hbm %s7796_s9, 256 }
 0x278   : > { %p6202_p4 = scmp.ne.s32.totalorder %s7744_s17, %s6201_s26  ;;  %p6206_p9 = scmp.lt.u32.totalorder %s7744_s17, %s7796_s9 }
 0x279   : > { %p6207_p10 = scmp.lt.u32.totalorder %s6205_s16, %s6201_s26  ;;  %p6209_p12 = scmp.lt.u32.totalorder %s6201_s26, %s7744_s17 }
 0x27a   : > { %p6203_p7 = pnand %p6202_p4, %p6347_p5 }
 0x27b   : > { %p6208_p11 = por %p6207_p10, %p6206_p9 }
 0x27c   : > { %p6204_p8 = pneg %p6203_p7 }
 0x27d   : > { %p6210_p13 = por %p6209_p12, %p6208_p11 }
 0x27f   : > { %p6211_p0 = pnand %p6210_p13, %p6204_p8 }
 0x281   : > { %6214 = shalt.err (!%p6211_p0)
}
 0x282   : > { %6141 = dma.vmem_to_hbm [thread:$0]  (%p6347_p5), %s7746_s14, 128, %s7744_s17, %s5816_s13  }
 0x283 PF: > { %p6147_p1 = scmp.ge.s32.totalorder %s6249_s12, 2  ;;  %s5841_s21 = sand.u32 1, %s6237_s30  }
 0x284   : > { %s5842_s23 = scalar_lea.sflag [#allocation3], %s5841_s21 }
 0x285   : > { %p6144_p2 = pnand %p6147_p1, %p6351_p6 }
 0x287   : > { %6232 = dma.done.wait (!%p6144_p2), %s5842_s23, 128  }
 0x288   : > { %6234 = vsyncadd (!%p6144_p2), %s5842_s23, 4294967168  ;;  %p19_p3 = scmp.ge.s32.totalorder %s6334_s15, 4   ;;  %s7833_s30 = smov %s6241_s10 }
 0x289   : > { %s7834_s10 = smov %s6245_s11  ;;  %s7835_s11 = smov %s6345_s18 }
 0x28a   : > { %s7836_s12 = smov %s6334_s15  ;;  %21 = sbr.rel (!%p19_p3) target bundleno = 3 (0x3), region = 97 }
 0x291   :  { %5847 = vsyncpa [#allocation3], 1 }
 0x292   :  { %5849 = vsyncpa [#allocation3 + $0x1], 1 }

</bundles_post_ra>
